<compile_context>
chip_gen: v7x
topology: tpu7x:2x2x1
jax: 0.10.0
libtpu: 0.0.40
codegen_flags: <defaults>
</compile_context>

<pallas_src>
import math
import functools

import jax
import jax.numpy as jnp
from jax.experimental import pallas as pl
from jax.experimental.pallas import tpu as pltpu  # noqa: F401  (TPU backend)

# ---- BASELINE_MODEL config (small, self-chosen) + PyTorch layer defaults ----
MATRIX_SIZE = 8          # SPD matrix size  -> n_triu = 8*9/2 = 36
BATCH = 2
SEQ = 8
EMBED_DIM = 32           # BASELINE_MODEL['embed_dim']
NHEAD = 4                # BASELINE_MODEL['nhead']
NLAYER = 2               # BASELINE_MODEL['nlayer']
NCLASS = 4               # BASELINE_MODEL['nclass']
DIM_FF = 2048            # nn.TransformerEncoderLayer default dim_feedforward
LN_EPS = 1e-5
N_TRIU = MATRIX_SIZE * (MATRIX_SIZE + 1) // 2

STACK_NAMES = ("wq", "wk", "wv", "bq", "bk", "bv", "wo", "bo",
               "g1", "be1", "w1", "bf1", "w2", "bf2", "g2", "be2")


# --------------------------- fused Pallas kernel ------------------------------
def fused_forward_kernel(
    x_ref, w_in_ref, bpe_ref, mask_ref, bias_ref,
    wq_ref, wk_ref, wv_ref, bq_ref, bk_ref, bv_ref, wo_ref, bo_ref,
    g1_ref, be1_ref, w1_ref, bf1_ref, w2_ref, bf2_ref, g2_ref, be2_ref,
    wc_ref, bc_ref, o_ref,
    *, batch, seq, nhead, head_dim, nlayer, eps,
):
    """Whole forward pass for the tiny model; everything stays in VMEM."""
    bs = batch * seq
    e = nhead * head_dim
    scale = 1.0 / math.sqrt(head_dim)

    # ---- input projection (triu gather already folded into w_in) + pos enc ----
    h = jnp.dot(x_ref[...], w_in_ref[...], preferred_element_type=jnp.float32)   # [BS, E]
    h = (h.reshape(batch, seq, e) + bpe_ref[...]).reshape(bs, e)                  # +b_in +pe

    mask4 = mask_ref[...].reshape(1, nhead, 1, e)     # [1,H,1,E] head lane mask
    bias = bias_ref[...]                              # [B*H*S, B*S] block-diag bias

    for l in range(nlayer):
        # ---- self attention: separate q/k/v projections on the [BS, E] slab ----
        q = jnp.dot(h, wq_ref[l], preferred_element_type=jnp.float32) + bq_ref[l]
        k = jnp.dot(h, wk_ref[l], preferred_element_type=jnp.float32) + bk_ref[l]
        v = jnp.dot(h, wv_ref[l], preferred_element_type=jnp.float32) + bv_ref[l]
        q = q * scale                                 # PyTorch scales q (incl. bias)

        # Stack heads along rows via head-lane mask: one matmul + ONE softmax for
        # the whole batch (cross-batch terms killed by the additive block bias).
        qstack = (q.reshape(batch, 1, seq, e) * mask4).reshape(batch * nhead * seq, e)
        scores = jnp.einsum("qe,ke->qk", qstack, k,
                            preferred_element_type=jnp.float32) + bias            # [BHS, BS]
        scores = scores - jnp.max(scores, axis=-1, keepdims=True)
        p = jnp.exp(scores)
        p = p / jnp.sum(p, axis=-1, keepdims=True)
        ostack = jnp.dot(p, v, preferred_element_type=jnp.float32)                # [BHS, E]
        # keep only each head's own lane block and sum the head stack
        attn = jnp.sum(ostack.reshape(batch, nhead, seq, e) * mask4, axis=1)      # [B,S,E]
        attn = attn.reshape(bs, e)
        attn = jnp.dot(attn, wo_ref[l], preferred_element_type=jnp.float32) + bo_ref[l]

        # ---- residual + LayerNorm1 (dropout = identity in eval) ----
        h1 = h + attn
        mu = jnp.mean(h1, axis=-1, keepdims=True)
        var = jnp.mean((h1 - mu) ** 2, axis=-1, keepdims=True)
        h1 = (h1 - mu) * jax.lax.rsqrt(var + eps) * g1_ref[l] + be1_ref[l]

        # ---- feed-forward (relu) + residual + LayerNorm2 ----
        ff = jnp.dot(h1, w1_ref[l], preferred_element_type=jnp.float32) + bf1_ref[l]
        ff = jnp.maximum(ff, 0.0)
        ff = jnp.dot(ff, w2_ref[l], preferred_element_type=jnp.float32) + bf2_ref[l]
        h2 = h1 + ff
        mu2 = jnp.mean(h2, axis=-1, keepdims=True)
        var2 = jnp.mean((h2 - mu2) ** 2, axis=-1, keepdims=True)
        h = (h2 - mu2) * jax.lax.rsqrt(var2 + eps) * g2_ref[l] + be2_ref[l]

    # ---- max over sequence + classifier; single tiny HBM store ----
    pooled = jnp.max(h.reshape(batch, seq, e), axis=1)                            # [B, E]
    o_ref[...] = (jnp.dot(pooled, wc_ref[...], preferred_element_type=jnp.float32)
                  + bc_ref[...])


# --------------------------- host-side wrapper --------------------------------
def forward(x, params, pe):
    b, s, m, _ = x.shape
    bs = b * s
    hd = EMBED_DIM // NHEAD

    # raw [B,S,M,M] -> flat [B*S, M*M]; triu gather folded into the weight below.
    x_flat = x.reshape(bs, m * m)

    tri0, tri1 = jnp.triu_indices(m)                 # matches torch.triu_indices order
    flat_idx = tri0 * m + tri1
    w_in_full = jnp.zeros((m * m, EMBED_DIM), jnp.float32).at[flat_idx].set(params["w_in"])

    bpe = pe + params["b_in"]                        # [S, E]  (bias + positional enc)

    # head lane mask [H,1,E]: lane belongs to head h
    head_id = jnp.arange(EMBED_DIM, dtype=jnp.int32) // hd
    head_mask = (head_id[None, :] == jnp.arange(NHEAD, dtype=jnp.int32)[:, None])
    head_mask = head_mask.astype(jnp.float32)[:, None, :]                          # [H,1,E]

    # block-diagonal additive bias so all batches share a single softmax
    row_b = jnp.arange(b * NHEAD * s, dtype=jnp.int32)[:, None] // (NHEAD * s)
    col_b = jnp.arange(b * s, dtype=jnp.int32)[None, :] // s
    attn_bias = jnp.where(row_b == col_b, 0.0, -1e30).astype(jnp.float32)           # [BHS,BS]

    stacks = [jnp.stack([lp[n] for lp in params["layers"]], axis=0) for n in STACK_NAMES]

    operands = [x_flat, w_in_full, bpe, head_mask, attn_bias,
                *stacks, params["wc"], params["bc"]]

    flops_layer = 2 * bs * EMBED_DIM * (4 * EMBED_DIM + 2 * DIM_FF) \
        + 2 * (b * NHEAD * s) * (b * s) * EMBED_DIM * 2
    cost = pl.CostEstimate(
        flops=2 * bs * m * m * EMBED_DIM + NLAYER * flops_layer + 2 * b * EMBED_DIM * NCLASS,
        transcendentals=NLAYER * (b * NHEAD * s) * (b * s),
        bytes_accessed=sum(int(a.size) * 4 for a in operands) + b * NCLASS * 4,
    )

    kern = functools.partial(
        fused_forward_kernel, batch=b, seq=s, nhead=NHEAD,
        head_dim=hd, nlayer=NLAYER, eps=LN_EPS,
    )
    return pl.pallas_call(
        kern,
        out_shape=jax.ShapeDtypeStruct((b, NCLASS), jnp.float32),
        cost_estimate=cost,
    )(*operands)


# --------------------------- params / pos-encoding ----------------------------
def make_pe(seq_len, d_model):
    position = jnp.arange(seq_len, dtype=jnp.float32)[:, None]
    div_term = jnp.exp(
        jnp.arange(0, d_model, 2, dtype=jnp.float32) * (-math.log(10000.0) / d_model)
    )
    pe = jnp.zeros((seq_len, d_model), jnp.float32)
    pe = pe.at[:, 0::2].set(jnp.sin(position * div_term))
    pe = pe.at[:, 1::2].set(jnp.cos(position * div_term))
    return pe


def init_params(key):
    keys = iter(jax.random.split(key, 128))

    def w(shape, scale=0.02):
        return scale * jax.random.normal(next(keys), shape, jnp.float32)

    params = {
        "w_in": w((N_TRIU, EMBED_DIM)),
        "b_in": w((1, EMBED_DIM)),
        "wc": w((EMBED_DIM, NCLASS)),
        "bc": w((1, NCLASS)),
        "layers": [],
    }
    for _ in range(NLAYER):
        params["layers"].append(dict(
            wq=w((EMBED_DIM, EMBED_DIM)), bq=w((1, EMBED_DIM)),
            wk=w((EMBED_DIM, EMBED_DIM)), bk=w((1, EMBED_DIM)),
            wv=w((EMBED_DIM, EMBED_DIM)), bv=w((1, EMBED_DIM)),
            wo=w((EMBED_DIM, EMBED_DIM)), bo=w((1, EMBED_DIM)),
            g1=jnp.ones((1, EMBED_DIM), jnp.float32), be1=jnp.zeros((1, EMBED_DIM), jnp.float32),
            w1=w((EMBED_DIM, DIM_FF)), bf1=w((1, DIM_FF)),
            w2=w((DIM_FF, EMBED_DIM)), bf2=w((1, EMBED_DIM)),
            g2=jnp.ones((1, EMBED_DIM), jnp.float32), be2=jnp.zeros((1, EMBED_DIM), jnp.float32),
        ))
    return params


# --------------------------- pure-JAX reference (sanity) ----------------------
def _layer_norm(h, g, b):
    mu = jnp.mean(h, axis=-1, keepdims=True)
    var = jnp.mean((h - mu) ** 2, axis=-1, keepdims=True)
    return (h - mu) / jnp.sqrt(var + LN_EPS) * g + b


def reference_forward(x, params, pe):
    b, s = x.shape[0], x.shape[1]
    hd = EMBED_DIM // NHEAD
    tri0, tri1 = jnp.triu_indices(MATRIX_SIZE)
    h = x[:, :, tri0, tri1] @ params["w_in"] + params["b_in"]
    h = h + pe[None]
    for lp in params["layers"]:
        q = h @ lp["wq"] + lp["bq"]
        k = h @ lp["wk"] + lp["bk"]
        v = h @ lp["wv"] + lp["bv"]

        def heads(t):
            return t.reshape(b, s, NHEAD, hd).transpose(0, 2, 1, 3)

        sc = jnp.einsum("bhqd,bhkd->bhqk", heads(q), heads(k)) / math.sqrt(hd)
        p = jax.nn.softmax(sc, axis=-1)
        a = jnp.einsum("bhqk,bhkd->bhqd", p, heads(v)).transpose(0, 2, 1, 3)
        a = a.reshape(b, s, EMBED_DIM) @ lp["wo"] + lp["bo"]
        h1 = _layer_norm(h + a, lp["g1"], lp["be1"])
        ff = jax.nn.relu(h1 @ lp["w1"] + lp["bf1"]) @ lp["w2"] + lp["bf2"]
        h = _layer_norm(h1 + ff, lp["g2"], lp["be2"])
    m = jnp.max(h, axis=1)
    return m @ params["wc"] + params["bc"]


# --------------------------------- main ----------------------------------------
if __name__ == "__main__":
    key = jax.random.PRNGKey(0)
    kx, kp = jax.random.split(key)
    # input: [batch, seq, matrix_size, matrix_size]
    x = jax.random.normal(kx, (BATCH, SEQ, MATRIX_SIZE, MATRIX_SIZE), jnp.float32)
    params = init_params(kp)
    pe = make_pe(SEQ, EMBED_DIM)

    out = jax.block_until_ready(forward(x, params, pe))
    assert out.shape == (BATCH, NCLASS)

    ref = reference_forward(x, params, pe)
    max_err = float(jnp.max(jnp.abs(out - ref)))
    if max_err < 1e-3:
        print("KERNEL_OK")
    else:
        print(f"MISMATCH max_err={max_err}")
</pallas_src>

<mosaic_0001>
module attributes {stable_mosaic.version = 11 : i64} {
  func.func @fused_forward_kernel(%arg0: memref<16x64xf32, #tpu.memory_space<vmem>>, %arg1: memref<64x32xf32, #tpu.memory_space<vmem>>, %arg2: memref<8x32xf32, #tpu.memory_space<vmem>>, %arg3: memref<4x1x32xf32, #tpu.memory_space<vmem>>, %arg4: memref<64x16xf32, #tpu.memory_space<vmem>>, %arg5: memref<2x32x32xf32, #tpu.memory_space<vmem>>, %arg6: memref<2x32x32xf32, #tpu.memory_space<vmem>>, %arg7: memref<2x32x32xf32, #tpu.memory_space<vmem>>, %arg8: memref<2x1x32xf32, #tpu.memory_space<vmem>>, %arg9: memref<2x1x32xf32, #tpu.memory_space<vmem>>, %arg10: memref<2x1x32xf32, #tpu.memory_space<vmem>>, %arg11: memref<2x32x32xf32, #tpu.memory_space<vmem>>, %arg12: memref<2x1x32xf32, #tpu.memory_space<vmem>>, %arg13: memref<2x1x32xf32, #tpu.memory_space<vmem>>, %arg14: memref<2x1x32xf32, #tpu.memory_space<vmem>>, %arg15: memref<2x32x2048xf32, #tpu.memory_space<vmem>>, %arg16: memref<2x1x2048xf32, #tpu.memory_space<vmem>>, %arg17: memref<2x2048x32xf32, #tpu.memory_space<vmem>>, %arg18: memref<2x1x32xf32, #tpu.memory_space<vmem>>, %arg19: memref<2x1x32xf32, #tpu.memory_space<vmem>>, %arg20: memref<2x1x32xf32, #tpu.memory_space<vmem>>, %arg21: memref<32x4xf32, #tpu.memory_space<vmem>>, %arg22: memref<1x4xf32, #tpu.memory_space<vmem>>, %arg23: memref<2x4xf32, #tpu.memory_space<vmem>>) attributes {dimension_semantics = [], scalar_prefetch = 0 : i64, scratch_operands = 0 : i64, tpu.core_type = #tpu.core_type<tc>} {
    %c0 = arith.constant 0 : index
    %c0_0 = arith.constant 0 : index
    %0 = vector.load %arg0[%c0, %c0_0] : memref<16x64xf32, #tpu.memory_space<vmem>>, vector<16x64xf32>
    %c0_1 = arith.constant 0 : index
    %c0_2 = arith.constant 0 : index
    %1 = vector.load %arg1[%c0_1, %c0_2] : memref<64x32xf32, #tpu.memory_space<vmem>>, vector<64x32xf32>
    %cst = arith.constant dense<0.000000e+00> : vector<16x32xf32>
    %2 = tpu.matmul %0, %1, %cst {dimension_numbers = #tpu.dot_dimension_numbers<[1], [0], [0], [1], [0, 0, 1, 1], [], []>} : vector<16x64xf32>, vector<64x32xf32>, vector<16x32xf32> -> vector<16x32xf32>
    %3 = vector.shape_cast %2 : vector<16x32xf32> to vector<2x8x32xf32>
    %c0_3 = arith.constant 0 : index
    %c0_4 = arith.constant 0 : index
    %4 = vector.load %arg2[%c0_3, %c0_4] : memref<8x32xf32, #tpu.memory_space<vmem>>, vector<8x32xf32>
    %5 = vector.shape_cast %4 : vector<8x32xf32> to vector<1x8x32xf32>
    %6 = vector.broadcast %5 : vector<1x8x32xf32> to vector<2x8x32xf32>
    %7 = arith.addf %3, %6 : vector<2x8x32xf32>
    %8 = vector.shape_cast %7 : vector<2x8x32xf32> to vector<16x32xf32>
    %c0_5 = arith.constant 0 : index
    %c0_6 = arith.constant 0 : index
    %c0_7 = arith.constant 0 : index
    %9 = vector.load %arg3[%c0_5, %c0_6, %c0_7] : memref<4x1x32xf32, #tpu.memory_space<vmem>>, vector<4x1x32xf32>
    %10 = vector.shape_cast %9 : vector<4x1x32xf32> to vector<1x4x1x32xf32>
    %c0_8 = arith.constant 0 : index
    %c0_9 = arith.constant 0 : index
    %11 = vector.load %arg4[%c0_8, %c0_9] : memref<64x16xf32, #tpu.memory_space<vmem>>, vector<64x16xf32>
    %c0_10 = arith.constant 0 : index
    %c0_11 = arith.constant 0 : index
    %c0_12 = arith.constant 0 : index
    %12 = vector.load %arg5[%c0_10, %c0_11, %c0_12] : memref<2x32x32xf32, #tpu.memory_space<vmem>>, vector<1x32x32xf32>
    %13 = vector.shape_cast %12 : vector<1x32x32xf32> to vector<32x32xf32>
    %cst_13 = arith.constant dense<0.000000e+00> : vector<16x32xf32>
    %14 = tpu.matmul %8, %13, %cst_13 {dimension_numbers = #tpu.dot_dimension_numbers<[1], [0], [0], [1], [0, 0, 1, 1], [], []>} : vector<16x32xf32>, vector<32x32xf32>, vector<16x32xf32> -> vector<16x32xf32>
    %c0_14 = arith.constant 0 : index
    %c0_15 = arith.constant 0 : index
    %c0_16 = arith.constant 0 : index
    %15 = vector.load %arg8[%c0_14, %c0_15, %c0_16] : memref<2x1x32xf32, #tpu.memory_space<vmem>>, vector<1x1x32xf32>
    %16 = vector.shape_cast %15 : vector<1x1x32xf32> to vector<1x32xf32>
    %17 = vector.broadcast %16 : vector<1x32xf32> to vector<16x32xf32>
    %18 = arith.addf %14, %17 : vector<16x32xf32>
    %c0_17 = arith.constant 0 : index
    %c0_18 = arith.constant 0 : index
    %c0_19 = arith.constant 0 : index
    %19 = vector.load %arg6[%c0_17, %c0_18, %c0_19] : memref<2x32x32xf32, #tpu.memory_space<vmem>>, vector<1x32x32xf32>
    %20 = vector.shape_cast %19 : vector<1x32x32xf32> to vector<32x32xf32>
    %cst_20 = arith.constant dense<0.000000e+00> : vector<16x32xf32>
    %21 = tpu.matmul %8, %20, %cst_20 {dimension_numbers = #tpu.dot_dimension_numbers<[1], [0], [0], [1], [0, 0, 1, 1], [], []>} : vector<16x32xf32>, vector<32x32xf32>, vector<16x32xf32> -> vector<16x32xf32>
    %c0_21 = arith.constant 0 : index
    %c0_22 = arith.constant 0 : index
    %c0_23 = arith.constant 0 : index
    %22 = vector.load %arg9[%c0_21, %c0_22, %c0_23] : memref<2x1x32xf32, #tpu.memory_space<vmem>>, vector<1x1x32xf32>
    %23 = vector.shape_cast %22 : vector<1x1x32xf32> to vector<1x32xf32>
    %24 = vector.broadcast %23 : vector<1x32xf32> to vector<16x32xf32>
    %25 = arith.addf %21, %24 : vector<16x32xf32>
    %c0_24 = arith.constant 0 : index
    %c0_25 = arith.constant 0 : index
    %c0_26 = arith.constant 0 : index
    %26 = vector.load %arg7[%c0_24, %c0_25, %c0_26] : memref<2x32x32xf32, #tpu.memory_space<vmem>>, vector<1x32x32xf32>
    %27 = vector.shape_cast %26 : vector<1x32x32xf32> to vector<32x32xf32>
    %cst_27 = arith.constant dense<0.000000e+00> : vector<16x32xf32>
    %28 = tpu.matmul %8, %27, %cst_27 {dimension_numbers = #tpu.dot_dimension_numbers<[1], [0], [0], [1], [0, 0, 1, 1], [], []>} : vector<16x32xf32>, vector<32x32xf32>, vector<16x32xf32> -> vector<16x32xf32>
    %c0_28 = arith.constant 0 : index
    %c0_29 = arith.constant 0 : index
    %c0_30 = arith.constant 0 : index
    %29 = vector.load %arg10[%c0_28, %c0_29, %c0_30] : memref<2x1x32xf32, #tpu.memory_space<vmem>>, vector<1x1x32xf32>
    %30 = vector.shape_cast %29 : vector<1x1x32xf32> to vector<1x32xf32>
    %31 = vector.broadcast %30 : vector<1x32xf32> to vector<16x32xf32>
    %32 = arith.addf %28, %31 : vector<16x32xf32>
    %cst_31 = arith.constant 0.353553385 : f32
    %33 = vector.broadcast %cst_31 : f32 to vector<16x32xf32>
    %34 = arith.mulf %18, %33 : vector<16x32xf32>
    %35 = vector.shape_cast %34 : vector<16x32xf32> to vector<2x1x8x32xf32>
    %36 = vector.broadcast %35 : vector<2x1x8x32xf32> to vector<2x4x8x32xf32>
    %37 = vector.broadcast %10 : vector<1x4x1x32xf32> to vector<2x4x8x32xf32>
    %38 = arith.mulf %36, %37 : vector<2x4x8x32xf32>
    %39 = vector.shape_cast %38 : vector<2x4x8x32xf32> to vector<64x32xf32>
    "tpu.trace_start"() <{level = 10 : i32, message = "qe,ke->qk"}> : () -> ()
    %cst_32 = arith.constant dense<0.000000e+00> : vector<64x16xf32>
    %40 = tpu.matmul %39, %25, %cst_32 {dimension_numbers = #tpu.dot_dimension_numbers<[1], [1], [0], [0], [0, 0, 1, 0], [], []>} : vector<64x32xf32>, vector<16x32xf32>, vector<64x16xf32> -> vector<64x16xf32>
    "tpu.trace_stop"() : () -> ()
    %41 = arith.addf %40, %11 : vector<64x16xf32>
    %cst_33 = arith.constant dense<0xFF800000> : vector<64xf32>
    %42 = vector.multi_reduction <maximumf>, %41, %cst_33 [1] : vector<64x16xf32> to vector<64xf32>
    %43 = vector.shape_cast %42 : vector<64xf32> to vector<64x1xf32>
    %44 = vector.broadcast %43 : vector<64x1xf32> to vector<64x16xf32>
    %45 = arith.subf %41, %44 : vector<64x16xf32>
    %46 = math.exp %45 : vector<64x16xf32>
    %cst_34 = arith.constant dense<0.000000e+00> : vector<64xf32>
    %47 = vector.multi_reduction <add>, %46, %cst_34 [1] : vector<64x16xf32> to vector<64xf32>
    %48 = vector.shape_cast %47 : vector<64xf32> to vector<64x1xf32>
    %49 = vector.broadcast %48 : vector<64x1xf32> to vector<64x16xf32>
    %50 = arith.divf %46, %49 : vector<64x16xf32>
    %cst_35 = arith.constant dense<0.000000e+00> : vector<64x32xf32>
    %51 = tpu.matmul %50, %32, %cst_35 {dimension_numbers = #tpu.dot_dimension_numbers<[1], [0], [0], [1], [0, 0, 1, 1], [], []>} : vector<64x16xf32>, vector<16x32xf32>, vector<64x32xf32> -> vector<64x32xf32>
    %52 = vector.shape_cast %51 : vector<64x32xf32> to vector<2x4x8x32xf32>
    %53 = vector.broadcast %10 : vector<1x4x1x32xf32> to vector<2x4x8x32xf32>
    %54 = arith.mulf %52, %53 : vector<2x4x8x32xf32>
    %cst_36 = arith.constant dense<0.000000e+00> : vector<2x8x32xf32>
    %55 = vector.multi_reduction <add>, %54, %cst_36 [1] : vector<2x4x8x32xf32> to vector<2x8x32xf32>
    %56 = vector.shape_cast %55 : vector<2x8x32xf32> to vector<16x32xf32>
    %c0_37 = arith.constant 0 : index
    %c0_38 = arith.constant 0 : index
    %c0_39 = arith.constant 0 : index
    %57 = vector.load %arg11[%c0_37, %c0_38, %c0_39] : memref<2x32x32xf32, #tpu.memory_space<vmem>>, vector<1x32x32xf32>
    %58 = vector.shape_cast %57 : vector<1x32x32xf32> to vector<32x32xf32>
    %cst_40 = arith.constant dense<0.000000e+00> : vector<16x32xf32>
    %59 = tpu.matmul %56, %58, %cst_40 {dimension_numbers = #tpu.dot_dimension_numbers<[1], [0], [0], [1], [0, 0, 1, 1], [], []>} : vector<16x32xf32>, vector<32x32xf32>, vector<16x32xf32> -> vector<16x32xf32>
    %c0_41 = arith.constant 0 : index
    %c0_42 = arith.constant 0 : index
    %c0_43 = arith.constant 0 : index
    %60 = vector.load %arg12[%c0_41, %c0_42, %c0_43] : memref<2x1x32xf32, #tpu.memory_space<vmem>>, vector<1x1x32xf32>
    %61 = vector.shape_cast %60 : vector<1x1x32xf32> to vector<1x32xf32>
    %62 = vector.broadcast %61 : vector<1x32xf32> to vector<16x32xf32>
    %63 = arith.addf %59, %62 : vector<16x32xf32>
    %64 = arith.addf %8, %63 : vector<16x32xf32>
    %cst_44 = arith.constant dense<0.000000e+00> : vector<16xf32>
    %65 = vector.multi_reduction <add>, %64, %cst_44 [1] : vector<16x32xf32> to vector<16xf32>
    %66 = vector.shape_cast %65 : vector<16xf32> to vector<16x1xf32>
    %cst_45 = arith.constant 3.200000e+01 : f32
    %67 = vector.broadcast %cst_45 : f32 to vector<16x1xf32>
    %68 = arith.divf %66, %67 : vector<16x1xf32>
    %69 = vector.broadcast %68 : vector<16x1xf32> to vector<16x32xf32>
    %70 = arith.subf %64, %69 : vector<16x32xf32>
    %71 = arith.mulf %70, %70 : vector<16x32xf32>
    %cst_46 = arith.constant dense<0.000000e+00> : vector<16xf32>
    %72 = vector.multi_reduction <add>, %71, %cst_46 [1] : vector<16x32xf32> to vector<16xf32>
    %73 = vector.shape_cast %72 : vector<16xf32> to vector<16x1xf32>
    %cst_47 = arith.constant 3.200000e+01 : f32
    %74 = vector.broadcast %cst_47 : f32 to vector<16x1xf32>
    %75 = arith.divf %73, %74 : vector<16x1xf32>
    %76 = vector.broadcast %68 : vector<16x1xf32> to vector<16x32xf32>
    %77 = arith.subf %64, %76 : vector<16x32xf32>
    %cst_48 = arith.constant 9.99999974E-6 : f32
    %78 = vector.broadcast %cst_48 : f32 to vector<16x1xf32>
    %79 = arith.addf %75, %78 : vector<16x1xf32>
    %80 = math.rsqrt %79 : vector<16x1xf32>
    %81 = vector.broadcast %80 : vector<16x1xf32> to vector<16x32xf32>
    %82 = arith.mulf %77, %81 : vector<16x32xf32>
    %c0_49 = arith.constant 0 : index
    %c0_50 = arith.constant 0 : index
    %c0_51 = arith.constant 0 : index
    %83 = vector.load %arg13[%c0_49, %c0_50, %c0_51] : memref<2x1x32xf32, #tpu.memory_space<vmem>>, vector<1x1x32xf32>
    %84 = vector.shape_cast %83 : vector<1x1x32xf32> to vector<1x32xf32>
    %85 = vector.broadcast %84 : vector<1x32xf32> to vector<16x32xf32>
    %86 = arith.mulf %82, %85 : vector<16x32xf32>
    %c0_52 = arith.constant 0 : index
    %c0_53 = arith.constant 0 : index
    %c0_54 = arith.constant 0 : index
    %87 = vector.load %arg14[%c0_52, %c0_53, %c0_54] : memref<2x1x32xf32, #tpu.memory_space<vmem>>, vector<1x1x32xf32>
    %88 = vector.shape_cast %87 : vector<1x1x32xf32> to vector<1x32xf32>
    %89 = vector.broadcast %88 : vector<1x32xf32> to vector<16x32xf32>
    %90 = arith.addf %86, %89 : vector<16x32xf32>
    %c0_55 = arith.constant 0 : index
    %c0_56 = arith.constant 0 : index
    %c0_57 = arith.constant 0 : index
    %91 = vector.load %arg15[%c0_55, %c0_56, %c0_57] : memref<2x32x2048xf32, #tpu.memory_space<vmem>>, vector<1x32x2048xf32>
    %92 = vector.shape_cast %91 : vector<1x32x2048xf32> to vector<32x2048xf32>
    %cst_58 = arith.constant dense<0.000000e+00> : vector<16x2048xf32>
    %93 = tpu.matmul %90, %92, %cst_58 {dimension_numbers = #tpu.dot_dimension_numbers<[1], [0], [0], [1], [0, 0, 1, 1], [], []>} : vector<16x32xf32>, vector<32x2048xf32>, vector<16x2048xf32> -> vector<16x2048xf32>
    %c0_59 = arith.constant 0 : index
    %c0_60 = arith.constant 0 : index
    %c0_61 = arith.constant 0 : index
    %94 = vector.load %arg16[%c0_59, %c0_60, %c0_61] : memref<2x1x2048xf32, #tpu.memory_space<vmem>>, vector<1x1x2048xf32>
    %95 = vector.shape_cast %94 : vector<1x1x2048xf32> to vector<1x2048xf32>
    %96 = vector.broadcast %95 : vector<1x2048xf32> to vector<16x2048xf32>
    %97 = arith.addf %93, %96 : vector<16x2048xf32>
    %cst_62 = arith.constant 0.000000e+00 : f32
    %98 = vector.broadcast %cst_62 : f32 to vector<16x2048xf32>
    %99 = arith.maximumf %97, %98 : vector<16x2048xf32>
    %c0_63 = arith.constant 0 : index
    %c0_64 = arith.constant 0 : index
    %c0_65 = arith.constant 0 : index
    %100 = vector.load %arg17[%c0_63, %c0_64, %c0_65] : memref<2x2048x32xf32, #tpu.memory_space<vmem>>, vector<1x2048x32xf32>
    %101 = vector.shape_cast %100 : vector<1x2048x32xf32> to vector<2048x32xf32>
    %cst_66 = arith.constant dense<0.000000e+00> : vector<16x32xf32>
    %102 = tpu.matmul %99, %101, %cst_66 {dimension_numbers = #tpu.dot_dimension_numbers<[1], [0], [0], [1], [0, 0, 1, 1], [], []>} : vector<16x2048xf32>, vector<2048x32xf32>, vector<16x32xf32> -> vector<16x32xf32>
    %c0_67 = arith.constant 0 : index
    %c0_68 = arith.constant 0 : index
    %c0_69 = arith.constant 0 : index
    %103 = vector.load %arg18[%c0_67, %c0_68, %c0_69] : memref<2x1x32xf32, #tpu.memory_space<vmem>>, vector<1x1x32xf32>
    %104 = vector.shape_cast %103 : vector<1x1x32xf32> to vector<1x32xf32>
    %105 = vector.broadcast %104 : vector<1x32xf32> to vector<16x32xf32>
    %106 = arith.addf %102, %105 : vector<16x32xf32>
    %107 = arith.addf %90, %106 : vector<16x32xf32>
    %cst_70 = arith.constant dense<0.000000e+00> : vector<16xf32>
    %108 = vector.multi_reduction <add>, %107, %cst_70 [1] : vector<16x32xf32> to vector<16xf32>
    %109 = vector.shape_cast %108 : vector<16xf32> to vector<16x1xf32>
    %cst_71 = arith.constant 3.200000e+01 : f32
    %110 = vector.broadcast %cst_71 : f32 to vector<16x1xf32>
    %111 = arith.divf %109, %110 : vector<16x1xf32>
    %112 = vector.broadcast %111 : vector<16x1xf32> to vector<16x32xf32>
    %113 = arith.subf %107, %112 : vector<16x32xf32>
    %114 = arith.mulf %113, %113 : vector<16x32xf32>
    %cst_72 = arith.constant dense<0.000000e+00> : vector<16xf32>
    %115 = vector.multi_reduction <add>, %114, %cst_72 [1] : vector<16x32xf32> to vector<16xf32>
    %116 = vector.shape_cast %115 : vector<16xf32> to vector<16x1xf32>
    %cst_73 = arith.constant 3.200000e+01 : f32
    %117 = vector.broadcast %cst_73 : f32 to vector<16x1xf32>
    %118 = arith.divf %116, %117 : vector<16x1xf32>
    %119 = vector.broadcast %111 : vector<16x1xf32> to vector<16x32xf32>
    %120 = arith.subf %107, %119 : vector<16x32xf32>
    %cst_74 = arith.constant 9.99999974E-6 : f32
    %121 = vector.broadcast %cst_74 : f32 to vector<16x1xf32>
    %122 = arith.addf %118, %121 : vector<16x1xf32>
    %123 = math.rsqrt %122 : vector<16x1xf32>
    %124 = vector.broadcast %123 : vector<16x1xf32> to vector<16x32xf32>
    %125 = arith.mulf %120, %124 : vector<16x32xf32>
    %c0_75 = arith.constant 0 : index
    %c0_76 = arith.constant 0 : index
    %c0_77 = arith.constant 0 : index
    %126 = vector.load %arg19[%c0_75, %c0_76, %c0_77] : memref<2x1x32xf32, #tpu.memory_space<vmem>>, vector<1x1x32xf32>
    %127 = vector.shape_cast %126 : vector<1x1x32xf32> to vector<1x32xf32>
    %128 = vector.broadcast %127 : vector<1x32xf32> to vector<16x32xf32>
    %129 = arith.mulf %125, %128 : vector<16x32xf32>
    %c0_78 = arith.constant 0 : index
    %c0_79 = arith.constant 0 : index
    %c0_80 = arith.constant 0 : index
    %130 = vector.load %arg20[%c0_78, %c0_79, %c0_80] : memref<2x1x32xf32, #tpu.memory_space<vmem>>, vector<1x1x32xf32>
    %131 = vector.shape_cast %130 : vector<1x1x32xf32> to vector<1x32xf32>
    %132 = vector.broadcast %131 : vector<1x32xf32> to vector<16x32xf32>
    %133 = arith.addf %129, %132 : vector<16x32xf32>
    %c1 = arith.constant 1 : index
    %c0_81 = arith.constant 0 : index
    %c0_82 = arith.constant 0 : index
    %134 = vector.load %arg5[%c1, %c0_81, %c0_82] : memref<2x32x32xf32, #tpu.memory_space<vmem>>, vector<1x32x32xf32>
    %135 = vector.shape_cast %134 : vector<1x32x32xf32> to vector<32x32xf32>
    %cst_83 = arith.constant dense<0.000000e+00> : vector<16x32xf32>
    %136 = tpu.matmul %133, %135, %cst_83 {dimension_numbers = #tpu.dot_dimension_numbers<[1], [0], [0], [1], [0, 0, 1, 1], [], []>} : vector<16x32xf32>, vector<32x32xf32>, vector<16x32xf32> -> vector<16x32xf32>
    %c1_84 = arith.constant 1 : index
    %c0_85 = arith.constant 0 : index
    %c0_86 = arith.constant 0 : index
    %137 = vector.load %arg8[%c1_84, %c0_85, %c0_86] : memref<2x1x32xf32, #tpu.memory_space<vmem>>, vector<1x1x32xf32>
    %138 = vector.shape_cast %137 : vector<1x1x32xf32> to vector<1x32xf32>
    %139 = vector.broadcast %138 : vector<1x32xf32> to vector<16x32xf32>
    %140 = arith.addf %136, %139 : vector<16x32xf32>
    %c1_87 = arith.constant 1 : index
    %c0_88 = arith.constant 0 : index
    %c0_89 = arith.constant 0 : index
    %141 = vector.load %arg6[%c1_87, %c0_88, %c0_89] : memref<2x32x32xf32, #tpu.memory_space<vmem>>, vector<1x32x32xf32>
    %142 = vector.shape_cast %141 : vector<1x32x32xf32> to vector<32x32xf32>
    %cst_90 = arith.constant dense<0.000000e+00> : vector<16x32xf32>
    %143 = tpu.matmul %133, %142, %cst_90 {dimension_numbers = #tpu.dot_dimension_numbers<[1], [0], [0], [1], [0, 0, 1, 1], [], []>} : vector<16x32xf32>, vector<32x32xf32>, vector<16x32xf32> -> vector<16x32xf32>
    %c1_91 = arith.constant 1 : index
    %c0_92 = arith.constant 0 : index
    %c0_93 = arith.constant 0 : index
    %144 = vector.load %arg9[%c1_91, %c0_92, %c0_93] : memref<2x1x32xf32, #tpu.memory_space<vmem>>, vector<1x1x32xf32>
    %145 = vector.shape_cast %144 : vector<1x1x32xf32> to vector<1x32xf32>
    %146 = vector.broadcast %145 : vector<1x32xf32> to vector<16x32xf32>
    %147 = arith.addf %143, %146 : vector<16x32xf32>
    %c1_94 = arith.constant 1 : index
    %c0_95 = arith.constant 0 : index
    %c0_96 = arith.constant 0 : index
    %148 = vector.load %arg7[%c1_94, %c0_95, %c0_96] : memref<2x32x32xf32, #tpu.memory_space<vmem>>, vector<1x32x32xf32>
    %149 = vector.shape_cast %148 : vector<1x32x32xf32> to vector<32x32xf32>
    %cst_97 = arith.constant dense<0.000000e+00> : vector<16x32xf32>
    %150 = tpu.matmul %133, %149, %cst_97 {dimension_numbers = #tpu.dot_dimension_numbers<[1], [0], [0], [1], [0, 0, 1, 1], [], []>} : vector<16x32xf32>, vector<32x32xf32>, vector<16x32xf32> -> vector<16x32xf32>
    %c1_98 = arith.constant 1 : index
    %c0_99 = arith.constant 0 : index
    %c0_100 = arith.constant 0 : index
    %151 = vector.load %arg10[%c1_98, %c0_99, %c0_100] : memref<2x1x32xf32, #tpu.memory_space<vmem>>, vector<1x1x32xf32>
    %152 = vector.shape_cast %151 : vector<1x1x32xf32> to vector<1x32xf32>
    %153 = vector.broadcast %152 : vector<1x32xf32> to vector<16x32xf32>
    %154 = arith.addf %150, %153 : vector<16x32xf32>
    %cst_101 = arith.constant 0.353553385 : f32
    %155 = vector.broadcast %cst_101 : f32 to vector<16x32xf32>
    %156 = arith.mulf %140, %155 : vector<16x32xf32>
    %157 = vector.shape_cast %156 : vector<16x32xf32> to vector<2x1x8x32xf32>
    %158 = vector.broadcast %157 : vector<2x1x8x32xf32> to vector<2x4x8x32xf32>
    %159 = vector.broadcast %10 : vector<1x4x1x32xf32> to vector<2x4x8x32xf32>
    %160 = arith.mulf %158, %159 : vector<2x4x8x32xf32>
    %161 = vector.shape_cast %160 : vector<2x4x8x32xf32> to vector<64x32xf32>
    "tpu.trace_start"() <{level = 10 : i32, message = "qe,ke->qk"}> : () -> ()
    %cst_102 = arith.constant dense<0.000000e+00> : vector<64x16xf32>
    %162 = tpu.matmul %161, %147, %cst_102 {dimension_numbers = #tpu.dot_dimension_numbers<[1], [1], [0], [0], [0, 0, 1, 0], [], []>} : vector<64x32xf32>, vector<16x32xf32>, vector<64x16xf32> -> vector<64x16xf32>
    "tpu.trace_stop"() : () -> ()
    %163 = arith.addf %162, %11 : vector<64x16xf32>
    %cst_103 = arith.constant dense<0xFF800000> : vector<64xf32>
    %164 = vector.multi_reduction <maximumf>, %163, %cst_103 [1] : vector<64x16xf32> to vector<64xf32>
    %165 = vector.shape_cast %164 : vector<64xf32> to vector<64x1xf32>
    %166 = vector.broadcast %165 : vector<64x1xf32> to vector<64x16xf32>
    %167 = arith.subf %163, %166 : vector<64x16xf32>
    %168 = math.exp %167 : vector<64x16xf32>
    %cst_104 = arith.constant dense<0.000000e+00> : vector<64xf32>
    %169 = vector.multi_reduction <add>, %168, %cst_104 [1] : vector<64x16xf32> to vector<64xf32>
    %170 = vector.shape_cast %169 : vector<64xf32> to vector<64x1xf32>
    %171 = vector.broadcast %170 : vector<64x1xf32> to vector<64x16xf32>
    %172 = arith.divf %168, %171 : vector<64x16xf32>
    %cst_105 = arith.constant dense<0.000000e+00> : vector<64x32xf32>
    %173 = tpu.matmul %172, %154, %cst_105 {dimension_numbers = #tpu.dot_dimension_numbers<[1], [0], [0], [1], [0, 0, 1, 1], [], []>} : vector<64x16xf32>, vector<16x32xf32>, vector<64x32xf32> -> vector<64x32xf32>
    %174 = vector.shape_cast %173 : vector<64x32xf32> to vector<2x4x8x32xf32>
    %175 = vector.broadcast %10 : vector<1x4x1x32xf32> to vector<2x4x8x32xf32>
    %176 = arith.mulf %174, %175 : vector<2x4x8x32xf32>
    %cst_106 = arith.constant dense<0.000000e+00> : vector<2x8x32xf32>
    %177 = vector.multi_reduction <add>, %176, %cst_106 [1] : vector<2x4x8x32xf32> to vector<2x8x32xf32>
    %178 = vector.shape_cast %177 : vector<2x8x32xf32> to vector<16x32xf32>
    %c1_107 = arith.constant 1 : index
    %c0_108 = arith.constant 0 : index
    %c0_109 = arith.constant 0 : index
    %179 = vector.load %arg11[%c1_107, %c0_108, %c0_109] : memref<2x32x32xf32, #tpu.memory_space<vmem>>, vector<1x32x32xf32>
    %180 = vector.shape_cast %179 : vector<1x32x32xf32> to vector<32x32xf32>
    %cst_110 = arith.constant dense<0.000000e+00> : vector<16x32xf32>
    %181 = tpu.matmul %178, %180, %cst_110 {dimension_numbers = #tpu.dot_dimension_numbers<[1], [0], [0], [1], [0, 0, 1, 1], [], []>} : vector<16x32xf32>, vector<32x32xf32>, vector<16x32xf32> -> vector<16x32xf32>
    %c1_111 = arith.constant 1 : index
    %c0_112 = arith.constant 0 : index
    %c0_113 = arith.constant 0 : index
    %182 = vector.load %arg12[%c1_111, %c0_112, %c0_113] : memref<2x1x32xf32, #tpu.memory_space<vmem>>, vector<1x1x32xf32>
    %183 = vector.shape_cast %182 : vector<1x1x32xf32> to vector<1x32xf32>
    %184 = vector.broadcast %183 : vector<1x32xf32> to vector<16x32xf32>
    %185 = arith.addf %181, %184 : vector<16x32xf32>
    %186 = arith.addf %133, %185 : vector<16x32xf32>
    %cst_114 = arith.constant dense<0.000000e+00> : vector<16xf32>
    %187 = vector.multi_reduction <add>, %186, %cst_114 [1] : vector<16x32xf32> to vector<16xf32>
    %188 = vector.shape_cast %187 : vector<16xf32> to vector<16x1xf32>
    %cst_115 = arith.constant 3.200000e+01 : f32
    %189 = vector.broadcast %cst_115 : f32 to vector<16x1xf32>
    %190 = arith.divf %188, %189 : vector<16x1xf32>
    %191 = vector.broadcast %190 : vector<16x1xf32> to vector<16x32xf32>
    %192 = arith.subf %186, %191 : vector<16x32xf32>
    %193 = arith.mulf %192, %192 : vector<16x32xf32>
    %cst_116 = arith.constant dense<0.000000e+00> : vector<16xf32>
    %194 = vector.multi_reduction <add>, %193, %cst_116 [1] : vector<16x32xf32> to vector<16xf32>
    %195 = vector.shape_cast %194 : vector<16xf32> to vector<16x1xf32>
    %cst_117 = arith.constant 3.200000e+01 : f32
    %196 = vector.broadcast %cst_117 : f32 to vector<16x1xf32>
    %197 = arith.divf %195, %196 : vector<16x1xf32>
    %198 = vector.broadcast %190 : vector<16x1xf32> to vector<16x32xf32>
    %199 = arith.subf %186, %198 : vector<16x32xf32>
    %cst_118 = arith.constant 9.99999974E-6 : f32
    %200 = vector.broadcast %cst_118 : f32 to vector<16x1xf32>
    %201 = arith.addf %197, %200 : vector<16x1xf32>
    %202 = math.rsqrt %201 : vector<16x1xf32>
    %203 = vector.broadcast %202 : vector<16x1xf32> to vector<16x32xf32>
    %204 = arith.mulf %199, %203 : vector<16x32xf32>
    %c1_119 = arith.constant 1 : index
    %c0_120 = arith.constant 0 : index
    %c0_121 = arith.constant 0 : index
    %205 = vector.load %arg13[%c1_119, %c0_120, %c0_121] : memref<2x1x32xf32, #tpu.memory_space<vmem>>, vector<1x1x32xf32>
    %206 = vector.shape_cast %205 : vector<1x1x32xf32> to vector<1x32xf32>
    %207 = vector.broadcast %206 : vector<1x32xf32> to vector<16x32xf32>
    %208 = arith.mulf %204, %207 : vector<16x32xf32>
    %c1_122 = arith.constant 1 : index
    %c0_123 = arith.constant 0 : index
    %c0_124 = arith.constant 0 : index
    %209 = vector.load %arg14[%c1_122, %c0_123, %c0_124] : memref<2x1x32xf32, #tpu.memory_space<vmem>>, vector<1x1x32xf32>
    %210 = vector.shape_cast %209 : vector<1x1x32xf32> to vector<1x32xf32>
    %211 = vector.broadcast %210 : vector<1x32xf32> to vector<16x32xf32>
    %212 = arith.addf %208, %211 : vector<16x32xf32>
    %c1_125 = arith.constant 1 : index
    %c0_126 = arith.constant 0 : index
    %c0_127 = arith.constant 0 : index
    %213 = vector.load %arg15[%c1_125, %c0_126, %c0_127] : memref<2x32x2048xf32, #tpu.memory_space<vmem>>, vector<1x32x2048xf32>
    %214 = vector.shape_cast %213 : vector<1x32x2048xf32> to vector<32x2048xf32>
    %cst_128 = arith.constant dense<0.000000e+00> : vector<16x2048xf32>
    %215 = tpu.matmul %212, %214, %cst_128 {dimension_numbers = #tpu.dot_dimension_numbers<[1], [0], [0], [1], [0, 0, 1, 1], [], []>} : vector<16x32xf32>, vector<32x2048xf32>, vector<16x2048xf32> -> vector<16x2048xf32>
    %c1_129 = arith.constant 1 : index
    %c0_130 = arith.constant 0 : index
    %c0_131 = arith.constant 0 : index
    %216 = vector.load %arg16[%c1_129, %c0_130, %c0_131] : memref<2x1x2048xf32, #tpu.memory_space<vmem>>, vector<1x1x2048xf32>
    %217 = vector.shape_cast %216 : vector<1x1x2048xf32> to vector<1x2048xf32>
    %218 = vector.broadcast %217 : vector<1x2048xf32> to vector<16x2048xf32>
    %219 = arith.addf %215, %218 : vector<16x2048xf32>
    %cst_132 = arith.constant 0.000000e+00 : f32
    %220 = vector.broadcast %cst_132 : f32 to vector<16x2048xf32>
    %221 = arith.maximumf %219, %220 : vector<16x2048xf32>
    %c1_133 = arith.constant 1 : index
    %c0_134 = arith.constant 0 : index
    %c0_135 = arith.constant 0 : index
    %222 = vector.load %arg17[%c1_133, %c0_134, %c0_135] : memref<2x2048x32xf32, #tpu.memory_space<vmem>>, vector<1x2048x32xf32>
    %223 = vector.shape_cast %222 : vector<1x2048x32xf32> to vector<2048x32xf32>
    %cst_136 = arith.constant dense<0.000000e+00> : vector<16x32xf32>
    %224 = tpu.matmul %221, %223, %cst_136 {dimension_numbers = #tpu.dot_dimension_numbers<[1], [0], [0], [1], [0, 0, 1, 1], [], []>} : vector<16x2048xf32>, vector<2048x32xf32>, vector<16x32xf32> -> vector<16x32xf32>
    %c1_137 = arith.constant 1 : index
    %c0_138 = arith.constant 0 : index
    %c0_139 = arith.constant 0 : index
    %225 = vector.load %arg18[%c1_137, %c0_138, %c0_139] : memref<2x1x32xf32, #tpu.memory_space<vmem>>, vector<1x1x32xf32>
    %226 = vector.shape_cast %225 : vector<1x1x32xf32> to vector<1x32xf32>
    %227 = vector.broadcast %226 : vector<1x32xf32> to vector<16x32xf32>
    %228 = arith.addf %224, %227 : vector<16x32xf32>
    %229 = arith.addf %212, %228 : vector<16x32xf32>
    %cst_140 = arith.constant dense<0.000000e+00> : vector<16xf32>
    %230 = vector.multi_reduction <add>, %229, %cst_140 [1] : vector<16x32xf32> to vector<16xf32>
    %231 = vector.shape_cast %230 : vector<16xf32> to vector<16x1xf32>
    %cst_141 = arith.constant 3.200000e+01 : f32
    %232 = vector.broadcast %cst_141 : f32 to vector<16x1xf32>
    %233 = arith.divf %231, %232 : vector<16x1xf32>
    %234 = vector.broadcast %233 : vector<16x1xf32> to vector<16x32xf32>
    %235 = arith.subf %229, %234 : vector<16x32xf32>
    %236 = arith.mulf %235, %235 : vector<16x32xf32>
    %cst_142 = arith.constant dense<0.000000e+00> : vector<16xf32>
    %237 = vector.multi_reduction <add>, %236, %cst_142 [1] : vector<16x32xf32> to vector<16xf32>
    %238 = vector.shape_cast %237 : vector<16xf32> to vector<16x1xf32>
    %cst_143 = arith.constant 3.200000e+01 : f32
    %239 = vector.broadcast %cst_143 : f32 to vector<16x1xf32>
    %240 = arith.divf %238, %239 : vector<16x1xf32>
    %241 = vector.broadcast %233 : vector<16x1xf32> to vector<16x32xf32>
    %242 = arith.subf %229, %241 : vector<16x32xf32>
    %cst_144 = arith.constant 9.99999974E-6 : f32
    %243 = vector.broadcast %cst_144 : f32 to vector<16x1xf32>
    %244 = arith.addf %240, %243 : vector<16x1xf32>
    %245 = math.rsqrt %244 : vector<16x1xf32>
    %246 = vector.broadcast %245 : vector<16x1xf32> to vector<16x32xf32>
    %247 = arith.mulf %242, %246 : vector<16x32xf32>
    %c1_145 = arith.constant 1 : index
    %c0_146 = arith.constant 0 : index
    %c0_147 = arith.constant 0 : index
    %248 = vector.load %arg19[%c1_145, %c0_146, %c0_147] : memref<2x1x32xf32, #tpu.memory_space<vmem>>, vector<1x1x32xf32>
    %249 = vector.shape_cast %248 : vector<1x1x32xf32> to vector<1x32xf32>
    %250 = vector.broadcast %249 : vector<1x32xf32> to vector<16x32xf32>
    %251 = arith.mulf %247, %250 : vector<16x32xf32>
    %c1_148 = arith.constant 1 : index
    %c0_149 = arith.constant 0 : index
    %c0_150 = arith.constant 0 : index
    %252 = vector.load %arg20[%c1_148, %c0_149, %c0_150] : memref<2x1x32xf32, #tpu.memory_space<vmem>>, vector<1x1x32xf32>
    %253 = vector.shape_cast %252 : vector<1x1x32xf32> to vector<1x32xf32>
    %254 = vector.broadcast %253 : vector<1x32xf32> to vector<16x32xf32>
    %255 = arith.addf %251, %254 : vector<16x32xf32>
    %256 = vector.shape_cast %255 : vector<16x32xf32> to vector<2x8x32xf32>
    %cst_151 = arith.constant dense<0xFF800000> : vector<2x32xf32>
    %257 = vector.multi_reduction <maximumf>, %256, %cst_151 [1] : vector<2x8x32xf32> to vector<2x32xf32>
    %c0_152 = arith.constant 0 : index
    %c0_153 = arith.constant 0 : index
    %258 = vector.load %arg21[%c0_152, %c0_153] : memref<32x4xf32, #tpu.memory_space<vmem>>, vector<32x4xf32>
    %cst_154 = arith.constant dense<0.000000e+00> : vector<2x4xf32>
    %259 = tpu.matmul %257, %258, %cst_154 {dimension_numbers = #tpu.dot_dimension_numbers<[1], [0], [0], [1], [0, 0, 1, 1], [], []>} : vector<2x32xf32>, vector<32x4xf32>, vector<2x4xf32> -> vector<2x4xf32>
    %c0_155 = arith.constant 0 : index
    %c0_156 = arith.constant 0 : index
    %260 = vector.load %arg22[%c0_155, %c0_156] : memref<1x4xf32, #tpu.memory_space<vmem>>, vector<1x4xf32>
    %261 = vector.broadcast %260 : vector<1x4xf32> to vector<2x4xf32>
    %262 = arith.addf %259, %261 : vector<2x4xf32>
    %c0_157 = arith.constant 0 : index
    %c0_158 = arith.constant 0 : index
    %263 = vector.load %arg23[%c0_157, %c0_158] : memref<2x4xf32, #tpu.memory_space<vmem>>, vector<2x4xf32>
    tpu.vector_store %arg23[%c0_157, %c0_158], %262 {strides = array<i32>} : memref<2x4xf32, #tpu.memory_space<vmem>>, vector<2x4xf32>,
    return
  }
}

</mosaic_0001>

<bundles_post_ra>
// kernel: tpu_custom_call.1
= control target key start
LH: loop header
LB: loop body
LE: loop exit
PB: predicated region body
PF: predicated region fallthrough
CT: control target
= control target key end

     0   :  { %s10490_s0 = inlined_call_operand.vmem [shape: f32[16,64], index: 0, kind: input, shape index: {}]   ;;  %s10491_s1 = inlined_call_operand.vmem [shape: f32[64,32], index: 1, kind: input, shape index: {}]   ;;  %s10492_s2 = inlined_call_operand.vmem [shape: f32[8,32], index: 2, kind: input, shape index: {}]   ;;  %s10493_s3 = inlined_call_operand.vmem [shape: f32[4,1,32], index: 3, kind: input, shape index: {}]   ;;  %s10494_s4 = inlined_call_operand.vmem [shape: f32[64,16], index: 4, kind: input, shape index: {}]   ;;  %s10495_s5 = inlined_call_operand.vmem [shape: f32[2,32,32], index: 5, kind: input, shape index: {}]   ;;  %s10496_s6 = inlined_call_operand.vmem [shape: f32[2,32,32], index: 6, kind: input, shape index: {}]   ;;  %s10497_s7 = inlined_call_operand.vmem [shape: f32[2,32,32], index: 7, kind: input, shape index: {}]   ;;  %s10498_s8 = inlined_call_operand.vmem [shape: f32[2,1,32], index: 8, kind: input, shape index: {}]   ;;  %s10499_s9 = inlined_call_operand.vmem [shape: f32[2,1,32], index: 9, kind: input, shape index: {}]   ;;  %s10500_s10 = inlined_call_operand.vmem [shape: f32[2,1,32], index: 10, kind: input, shape index: {}]   ;;  %s10501_s11 = inlined_call_operand.vmem [shape: f32[2,32,32], index: 11, kind: input, shape index: {}]   ;;  %s10502_s12 = inlined_call_operand.vmem [shape: f32[2,1,32], index: 12, kind: input, shape index: {}]   ;;  %s10503_s13 = inlined_call_operand.vmem [shape: f32[2,1,32], index: 13, kind: input, shape index: {}]   ;;  %s10504_s14 = inlined_call_operand.vmem [shape: f32[2,1,32], index: 14, kind: input, shape index: {}]   ;;  %s10505_s15 = inlined_call_operand.vmem [shape: f32[2,32,2048], index: 15, kind: input, shape index: {}]   ;;  %s10506_s16 = inlined_call_operand.vmem [shape: f32[2,1,2048], index: 16, kind: input, shape index: {}]   ;;  %s10507_s17 = inlined_call_operand.vmem [shape: f32[2,2048,32], index: 17, kind: input, shape index: {}]   ;;  %s10508_s18 = inlined_call_operand.vmem [shape: f32[2,1,32], index: 18, kind: input, shape index: {}]   ;;  %s10509_s19 = inlined_call_operand.vmem [shape: f32[2,1,32], index: 19, kind: input, shape index: {}]   ;;  %s10510_s20 = inlined_call_operand.vmem [shape: f32[2,1,32], index: 20, kind: input, shape index: {}]   ;;  %s10511_s21 = inlined_call_operand.vmem [shape: f32[32,4], index: 21, kind: input, shape index: {}]   ;;  %s10512_s22 = inlined_call_operand.vmem [shape: f32[1,4], index: 22, kind: input, shape index: {}]   ;;  %s10513_s23 = inlined_call_operand.hbm [shape: f32[2,4], index: 23, kind: output, shape index: {}]  }
   0x1   :  { %10522 = sst [smem:[#allocation5_spill]] %s10490_s0 }
   0x2   :  { %10523 = sst [smem:[#allocation6_spill]] %s10491_s1 }
   0x3   :  { %10524 = sst [smem:[#allocation7_spill]] %s10492_s2 }
   0x4   :  { %10525 = sst [smem:[#allocation8_spill]] %s10493_s3 }
   0x5   :  { %10526 = sst [smem:[#allocation9_spill]] %s10494_s4 }
   0x6   :  { %10527 = sst [smem:[#allocation10_spill]] %s10495_s5 }
   0x7   :  { %10528 = sst [smem:[#allocation11_spill]] %s10496_s6 }
   0x8   :  { %10529 = sst [smem:[#allocation12_spill]] %s10497_s7 }
   0x9   :  { %10530 = sst [smem:[#allocation13_spill]] %s10512_s22 }
   0xa   :  { %10531 = sst [smem:[#allocation14_spill]] %s10513_s23 }
   0xb   :  { %s10532_s24 = sld [smem:[#allocation6_spill]]  ;;  %vm85_vm0 = vcmask 523264   ;;  %s10533_s4 = sld [smem:[#allocation5_spill]] }
   0xc   :  { %s10534_s5 = sld [smem:[#allocation10_spill]] }
  0x11   :  { %v77_v0 = vld [vmem:[%s10532_s24] sm:$0xff]  ;;  %v78_v1 = vld [vmem:[%s10532_s24 + $0x8] sm:$0xff]  ;;  %v79_v2 = vld [vmem:[%s10532_s24 + $0x10] sm:$0xff] }
  0x12   :  { %v6686_v3 = vpack.c.bf16 %v78_v1, %v77_v0  ;;  %v80_v4 = vld [vmem:[%s10532_s24 + $0x18] sm:$0xff]  ;;  %v81_v6 = vld [vmem:[%s10532_s24 + $0x20] sm:$0xff]  ;;  %v82_v7 = vld [vmem:[%s10532_s24 + $0x28] sm:$0xff] }
  0x13   :  { %v6690_v5 = vpack.c.bf16 %v80_v4, %v79_v2  ;;  %v75_v8 = vld [vmem:[%s10533_s4] sm:$0xff]  ;;  %v183_v10 = vld [vmem:[%s10534_s5 + $0x8] sm:$0xff] }
  0x14   :  { %6687 = vmatprep.subr.bf16.mxu0 %v6686_v3  ;;  %6520 = vmatprep.mubr.msk.f32.mxu0 %vm85_vm0, %v75_v8  ;;  %v182_v9 = vld [vmem:[%s10534_s5] sm:$0xff] }
  0x15   :  { %6689 = vmatpush3.bf16.msra.mxu0 %v6686_v3  ;;  %v6702_v11 = vpack.c.bf16 %v183_v10, %v182_v9 }
  0x16   :  { %28 = vsyncpa [#allocation3], 0  ;;  %6691 = vmatprep.subr.bf16.mxu0 %v6690_v5  ;;  %v6694_v12 = vpack.c.bf16 %v82_v7, %v81_v6  ;;  %v83_v13 = vld [vmem:[%s10532_s24 + $0x30] sm:$0xff]  ;;  %v84_v14 = vld [vmem:[%s10532_s24 + $0x38] sm:$0xff]  ;;  %s10535_s3 = sld [smem:[#allocation12_spill]]  ;;  %s10536_s30 = sld [smem:[#allocation11_spill]] }
  0x17   :  { %6703 = vmatprep.subr.bf16.mxu1 %v6702_v11  ;;  %v6698_v15 = vpack.c.bf16 %v84_v14, %v83_v13  ;;  %v76_v19 = vld [vmem:[%s10533_s4 + $0x8] sm:$0xff]  ;;  %v184_v20 = vld [vmem:[%s10534_s5 + $0x10] sm:$0xff]  ;;  %v185_v21 = vld [vmem:[%s10534_s5 + $0x18] sm:$0xff]  ;;  %s10537_s2 = sld [smem:[#allocation7_spill]]  ;;  %vm193_vm1 = vcmask 261120   ;;  %s10538_s26 = sld [smem:[#allocation8_spill]] }
  0x18   :  { %6705 = vmatpush3.bf16.msra.mxu1 %v6702_v11  ;;  %v6706_v22 = vpack.c.bf16 %v185_v21, %v184_v20  ;;  %v5344_v37 = vld [vmem:[%s10500_s10] ss:$0 sm:$0xff]  ;;  %vm7781_vm2 = vmpackc.low %vm193_vm1, %vm193_vm1  ;;  %s10541_s24 = sld [smem:[#allocation9_spill]]  ;;  %vm616_vm3 = vcmask 130048   ;;  %vm7554_vm4 = vmmov 0   ;;  %vm5246_vm5 = vcmask 1041409  }
  0x19   :  { %6693 = vmatpush3.bf16.msra.mxu0 %v6690_v5  ;;  %v5338_v38 = vld [vmem:[%s10498_s8] ss:$0 sm:$0xff]  ;;  %vm5320_vm6 = vcmask 25600  }
  0x1a   :  { %6695 = vmatprep.subr.bf16.mxu0 %v6694_v12  ;;  %6707 = vmatprep.subr.bf16.mxu1 %v6706_v22  ;;  %v5341_v49 = vld [vmem:[%s10499_s9] ss:$0 sm:$0xff] }
  0x1c   :  { %v361_v16 = vld [vmem:[%s10535_s3] sm:$0xff]  ;;  %v362_v17 = vld [vmem:[%s10535_s3 + $0x8] sm:$0xff]  ;;  %v363_v23 = vld [vmem:[%s10535_s3 + $0x10] sm:$0xff]  ;;  %6709 = vmatpush3.bf16.msra.mxu1 %v6706_v22 }
  0x1d   :  { %6697 = vmatpush3.bf16.msra.mxu0 %v6694_v12  ;;  %v6718_v18 = vpack.c.bf16 %v362_v17, %v361_v16  ;;  %v364_v24 = vld [vmem:[%s10535_s3 + $0x18] sm:$0xff]  ;;  %v275_v26 = vld [vmem:[%s10536_s30] sm:$0xff]  ;;  %v276_v27 = vld [vmem:[%s10536_s30 + $0x8] sm:$0xff] }
  0x1e   :  { %6699 = vmatprep.subr.bf16.mxu0 %v6698_v15  ;;  %v6722_v25 = vpack.c.bf16 %v364_v24, %v363_v23  ;;  %v6710_v28 = vpack.c.bf16 %v276_v27, %v275_v26  ;;  %v167_v29 = vld [vmem:[%s10537_s2] sm:$0xff]  ;;  %v277_v31 = vld [vmem:[%s10536_s30 + $0x10] sm:$0xff]  ;;  %v278_v32 = vld [vmem:[%s10536_s30 + $0x18] sm:$0xff] }
  0x1f   :  { %v6714_v36 = vpack.c.bf16 %v278_v32, %v277_v31  ;;  %v7772_v46 = vld [vmem:[%s10538_s26] ss:$0 sm:$0xff]  ;;  %v7792_v58 = vld [vmem:[%s10538_s26 + $0x1] ss:$0 sm:$0xff]  ;;  %v7797_v59 = vld [vmem:[%s10538_s26 + $0x2] ss:$0 sm:$0xff] }
  0x20   :  { %6711 = vmatprep.subr.bf16.mxu1 %v6710_v28  ;;  %v7804_v63 = vld [vmem:[%s10538_s26 + $0x3] ss:$0 sm:$0xff]  ;;  %v175_v7 = vld [vmem:[%s10541_s24 + $0x8] sm:$0xff]  ;;  %v176_v10 = vld [vmem:[%s10541_s24 + $0x10] sm:$0xff] }
  0x21   :  { %6701 = vmatpush3.bf16.msra.mxu0 %v6698_v15  ;;  %v174_v5 = vld [vmem:[%s10541_s24] sm:$0xff]  ;;  %v177_v14 = vld [vmem:[%s10541_s24 + $0x18] sm:$0xff]  ;;  %v179_v22 = vld [vmem:[%s10541_s24 + $0x28] sm:$0xff] }
  0x22   :  { %6719 = vmatprep.subr.bf16.mxu0 %v6718_v18  ;;  %v178_v17 = vld [vmem:[%s10541_s24 + $0x20] sm:$0xff] }
  0x23   :  { %v9187_v55 = vld [vmem:[%s10538_s26 + $0x2] ss:$0 sm:$0xff] }
  0x24   :  { %6521 = vmatmul.mubr.msk.f32.vlgmr.msra.gmra.mrb[0].mxu0 %vm85_vm0, %v76_v19 }
  0x25   :  { %6721 = vmatpush3.bf16.msra.mxu0 %v6718_v18 }
  0x26   :  { %6723 = vmatprep.subr.bf16.mxu0 %v6722_v25 }
  0x29   :  { %6725 = vmatpush3.bf16.msra.mxu0 %v6722_v25  ;;  %v180_v25 = vld [vmem:[%s10541_s24 + $0x30] sm:$0xff] }
  0xf7   :  { %v6522_v30 = vpop.f32.mrb[0].mxu0 }
  0xf8   :  { %v158_v33 = vpop.f32.mrb[1].mxu0  ;;  %v7749_v35 = vadd.f32 %v6522_v30, %v167_v29  ;;  %v181_v30 = vld [vmem:[%s10541_s24 + $0x38] sm:$0xff] }
  0xf9   :  { %v7747_v34 = vadd.f32 %v167_v29, %v158_v33 }
  0xfb   :  { %6531 = vmatprep.mubr.msk.f32.mxu1 %vm193_vm1, %v7747_v34  ;;  %6553 = vmatprep.mubr.msk.f32.mxu0 %vm193_vm1, %v7747_v34 }
  0xfc   :  { %6532 = vmatmul.mubr.msk.f32.vlgmr.msra.gmra.mrb[0].mxu1 %vm193_vm1, %v7749_v35  ;;  %6554 = vmatmul.mubr.msk.f32.vlgmr.msra.gmra.mrb[2].mxu0 %vm193_vm1, %v7749_v35 }
  0xfd   :  { %6713 = vmatpush3.bf16.msra.mxu1 %v6710_v28  ;;  %6542 = vmatprep.mubr.msk.f32.mxu1 %vm193_vm1, %v7747_v34 }
  0xfe   :  { %6715 = vmatprep.subr.bf16.mxu1 %v6714_v36 }
 0x101   :  { %6717 = vmatpush3.bf16.msra.mxu1 %v6714_v36 }
 0x104   :  { %6543 = vmatmul.mubr.msk.f32.vlgmr.msra.gmra.mrb[2].mxu1 %vm193_vm1, %v7749_v35 }
 0x1cf   :  { %v6533_v39 = vpop.f32.mrb[0].mxu1  ;;  %v6555_v40 = vpop.f32.mrb[2].mxu0 }
 0x1d0   :  { %v444_v41 = vadd.f32 %v6555_v40, %v5344_v37  ;;  %v266_v42 = vpop.f32.mrb[1].mxu1  ;;  %v438_v43 = vpop.f32.mrb[3].mxu0  ;;  %v272_v57 = vadd.f32 %v6533_v39, %v5338_v38 }
 0x1d1   :  { %v267_v44 = vadd.f32 %v5338_v38, %v266_v42  ;;  %v439_v45 = vadd.f32 %v5344_v37, %v438_v43 }
 0x1d2   :  { %v448_v61 = vmul.f32 0.35355338, %v272_v57 }
 0x1d3   :  { %v447_v47 = vmul.f32 0.35355338, %v267_v44  ;;  %v6732_v48 = vpack.c.bf16 %v444_v41, %v439_v45 }
 0x1d4   :  { %v477_v1 = vmul.f32 %v7772_v46, %v448_v61  ;;  %v478_v2 = vmul.f32 %v7792_v58, %v448_v61  ;;  %v479_v3 = vmul.f32 %v7797_v59, %v448_v61  ;;  %v480_v4 = vmul.f32 %v7804_v63, %v448_v61 }
 0x1d5   :  { %6733 = vmatprep.subr.bf16.mxu0 %v6732_v48  ;;  %v473_v50 = vmul.f32 %v7772_v46, %v447_v47  ;;  %v474_v60 = vmul.f32 %v7792_v58, %v447_v47  ;;  %v475_v62 = vmul.f32 %v7797_v59, %v447_v47  ;;  %v476_v0 = vmul.f32 %v7804_v63, %v447_v47 }
 0x1d6   :  { %6735 = vmatpush3.bf16.msra.mxu0 %v6732_v48 }
 0x1d7   :  { %v6544_v51 = vpop.f32.mrb[2].mxu1  ;;  %6560 = vmatprep.mubr.msk.f32.mxu1 %vm193_vm1, %v473_v50 }
 0x1d8   :  { %v358_v52 = vadd.f32 %v6544_v51, %v5341_v49  ;;  %v352_v53 = vpop.f32.mrb[3].mxu1 }
 0x1d9   :  { %v353_v54 = vadd.f32 %v5341_v49, %v352_v53 }
 0x1db   :  { %v6726_v56 = vpack.c.bf16 %v358_v52, %v353_v54 }
 0x1dd   :  { %6728 = vmatprep.subr.msk.bf16.mxu1 %vm7781_vm2, %v6726_v56 }
 0x1de   :  { %6731 = vmatpush3.bf16.xpose.msk.msra.mxu1 %vm7781_vm2, %v6726_v56 }
 0x1e5   :  { %6561 = vmatmul.mubr.msk.f32.vlgmr.msra.gmra.mrb[4].mxu1 %vm193_vm1, %v474_v60 }
 0x1e6   :  { %6563 = vmatprep.mubr.msk.f32.mxu1 %vm193_vm1, %v475_v62 }
 0x1e9   :  { %6564 = vmatmul.mubr.msk.f32.gmra.mrb[6].mxu1 %vm193_vm1, %v476_v0 }
 0x1ea   :  { %6566 = vmatprep.mubr.msk.f32.mxu1 %vm193_vm1, %v477_v1 }
 0x1ed   :  { %6567 = vmatmul.mubr.msk.f32.gmra.mrb[8].mxu1 %vm193_vm1, %v478_v2 }
 0x1ee   :  { %6569 = vmatprep.mubr.msk.f32.mxu1 %vm193_vm1, %v479_v3 }
 0x1f1   :  { %6570 = vmatmul.mubr.msk.f32.gmra.mrb[10].mxu1 %vm193_vm1, %v480_v4 }
 0x2b8   :  { %v6562_v6 = vpop.f32.mrb[4].mxu1 }
 0x2b9   :  { %v577_v8 = vpop.f32.mrb[5].mxu1  ;;  %v583_v11 = vadd.f32 %v6562_v6, %v175_v7 }
 0x2ba   :  { %v578_v9 = vadd.f32 %v577_v8, %v174_v5 }
 0x2bb   :  { %v620_v21 = vsel %vm616_vm3, %v583_v11, -inf }
 0x2bc   :  { %v6565_v12 = vpop.f32.mrb[6].mxu1  ;;  %v617_v13 = vsel %vm616_vm3, %v578_v9, -inf }
 0x2bd   :  { %v587_v15 = vpop.f32.mrb[7].mxu1  ;;  %618 = vmax.xlane.f32.xlu0 %v617_v13  ;;  %v593_v18 = vadd.f32 %v6565_v12, %v177_v14 }
 0x2be   :  { %v588_v16 = vadd.f32 %v587_v15, %v176_v10 }
 0x2bf   :  { %v626_v28 = vsel %vm616_vm3, %v593_v18, -inf }
 0x2c0   :  { %v6568_v19 = vpop.f32.mrb[8].mxu1  ;;  %v623_v20 = vsel %vm616_vm3, %v588_v16, -inf }
 0x2c1   :  { %v597_v23 = vpop.f32.mrb[9].mxu1  ;;  %624 = vmax.xlane.f32.xlu1 %v623_v20  ;;  %621 = vmax.xlane.f32.xlu0 %v620_v21  ;;  %v603_v26 = vadd.f32 %v6568_v19, %v179_v22 }
 0x2c2   :  { %v598_v24 = vadd.f32 %v597_v23, %v178_v17 }
 0x2c3   :  { %v632_v36 = vsel %vm616_vm3, %v603_v26, -inf }
 0x2c4   :  { %v6571_v27 = vpop.f32.mrb[10].mxu1  ;;  %v629_v29 = vsel %vm616_vm3, %v598_v24, -inf }
 0x2c5   :  { %v607_v31 = vpop.f32.mrb[11].mxu1  ;;  %627 = vmax.xlane.f32.xlu1 %v626_v28  ;;  %630 = vmax.xlane.f32.xlu0 %v629_v29  ;;  %v613_v33 = vadd.f32 %v6571_v27, %v181_v30 }
 0x2c6   :  { %v608_v32 = vadd.f32 %v607_v31, %v180_v25 }
 0x2c7   :  { %v638_v38 = vsel %vm616_vm3, %v613_v33, -inf }
 0x2c8   :  { %v635_v37 = vsel %vm616_vm3, %v608_v32, -inf }
 0x2c9   :  { %633 = vmax.xlane.f32.xlu1 %v632_v36  ;;  %636 = vmax.xlane.f32.xlu0 %v635_v37 }
 0x2cd   :  { %639 = vmax.xlane.f32.xlu1 %v638_v38 }
 0x34a   :  { %v619_v39 = vpop.xlane.xlu0 %618 }
 0x34b   :  { %v641_v40 = vsub.f32 %v578_v9, %v619_v39 }
 0x34d   :  { %v649_v41 = vmul.f32 1.442695, %v641_v40 }
 0x34e   :  { %v625_v42 = vpop.xlane.xlu1 %624  ;;  %v622_v43 = vpop.xlane.xlu0 %621 }
 0x34f   :  { %7436 = vpow2.f32 %v649_v41  ;;  %v643_v44 = vsub.f32 %v588_v16, %v625_v42  ;;  %v642_v45 = vsub.f32 %v583_v11, %v622_v43 }
 0x351   :  { %v653_v47 = vmul.f32 1.442695, %v643_v44  ;;  %v651_v48 = vmul.f32 1.442695, %v642_v45 }
 0x352   :  { %v628_v49 = vpop.xlane.xlu1 %627  ;;  %v631_v50 = vpop.xlane.xlu0 %630 }
 0x353   :  { %7438 = vpow2.f32 %v653_v47  ;;  %v644_v51 = vsub.f32 %v593_v18, %v628_v49  ;;  %v645_v52 = vsub.f32 %v598_v24, %v631_v50  ;;  %v856_v47 = vld [vmem:[%s10501_s11] sm:$0xff]  ;;  %v858_v50 = vld [vmem:[%s10501_s11 + $0x10] sm:$0xff] }
 0x354   :  { %7440 = vpow2.f32 %v651_v48  ;;  %v857_v48 = vld [vmem:[%s10501_s11 + $0x8] sm:$0xff] }
 0x355   :  { %v655_v53 = vmul.f32 1.442695, %v644_v51  ;;  %v657_v54 = vmul.f32 1.442695, %v645_v52  ;;  %v6736_v49 = vpack.c.bf16 %v857_v48, %v856_v47  ;;  %v859_v51 = vld [vmem:[%s10501_s11 + $0x18] sm:$0xff]  ;;  %v997_v48 = vld [vmem:[%s10505_s15 + $0x10] sm:$0xff] }
 0x356   :  { %v634_v56 = vpop.xlane.xlu1 %633  ;;  %v637_v57 = vpop.xlane.xlu0 %636  ;;  %v6740_v52 = vpack.c.bf16 %v859_v51, %v858_v50  ;;  %v1028_v51 = vld [vmem:[%s10505_s15 + $0x108] sm:$0xff] }
 0x357   :  { %7442 = vpow2.f32 %v655_v53  ;;  %v646_v60 = vsub.f32 %v603_v26, %v634_v56  ;;  %v647_v61 = vsub.f32 %v608_v32, %v637_v57  ;;  %6737 = vmatprep.subr.bf16.mxu1 %v6736_v49 }
 0x358   :  { %7444 = vpow2.f32 %v657_v54  ;;  %6739 = vmatpush3.bf16.msra.mxu1 %v6736_v49  ;;  %v1013_v49 = vld [vmem:[%s10505_s15 + $0x90] sm:$0xff] }
 0x359   :  { %v7437_v62 = vpop.eup %7436  ;;  %v659_v0 = vmul.f32 1.442695, %v646_v60  ;;  %v661_v1 = vmul.f32 1.442695, %v647_v61  ;;  %6741 = vmatprep.subr.bf16.mxu1 %v6740_v52  ;;  %v6754_v50 = vpack.c.bf16 %v1013_v49, %v997_v48  ;;  %v1021_v48 = vld [vmem:[%s10505_s15 + $0xd0] sm:$0xff] }
 0x35a   :  { %v640_v2 = vpop.xlane.xlu1 %639  ;;  %v665_v3 = vsel %vm616_vm3, %v7437_v62, 0.0 }
 0x35b   :  { %7446 = vpow2.f32 %v659_v0  ;;  %v648_v4 = vsub.f32 %v613_v33, %v640_v2  ;;  %666 = vadd.xlane.f32.xlu0 %v665_v3 }
 0x35c   :  { %7448 = vpow2.f32 %v661_v1  ;;  %6743 = vmatpush3.bf16.msra.mxu1 %v6740_v52  ;;  %v1044_v52 = vld [vmem:[%s10505_s15 + $0x188] sm:$0xff] }
 0x35d   :  { %v7439_v5 = vpop.eup %7438  ;;  %v663_v6 = vmul.f32 1.442695, %v648_v4 }
 0x35e   :  { %v7441_v7 = vpop.eup %7440  ;;  %v671_v8 = vsel %vm616_vm3, %v7439_v5, 0.0 }
 0x35f   :  { %7450 = vpow2.f32 %v663_v6  ;;  %672 = vadd.xlane.f32.xlu0 %v671_v8  ;;  %v668_v9 = vsel %vm616_vm3, %v7441_v7, 0.0 }
 0x360   :  { %669 = vadd.xlane.f32.xlu1 %v668_v9 }
 0x361   :  { %v7443_v10 = vpop.eup %7442 }
 0x362   :  { %v7445_v11 = vpop.eup %7444  ;;  %v674_v12 = vsel %vm616_vm3, %v7443_v10, 0.0 }
 0x363   :  { %v677_v13 = vsel %vm616_vm3, %v7445_v11, 0.0 }
 0x364   :  { %675 = vadd.xlane.f32.xlu1 %v674_v12  ;;  %678 = vadd.xlane.f32.xlu0 %v677_v13 }
 0x365   :  { %v7447_v14 = vpop.eup %7446 }
 0x366   :  { %v7449_v15 = vpop.eup %7448  ;;  %v680_v16 = vsel %vm616_vm3, %v7447_v14, 0.0 }
 0x367   :  { %v683_v17 = vsel %vm616_vm3, %v7449_v15, 0.0 }
 0x368   :  { %681 = vadd.xlane.f32.xlu1 %v680_v16  ;;  %684 = vadd.xlane.f32.xlu0 %v683_v17 }
 0x369   :  { %v7451_v18 = vpop.eup %7450 }
 0x36a   :  { %v686_v19 = vsel %vm616_vm3, %v7451_v18, 0.0 }
 0x36c   :  { %687 = vadd.xlane.f32.xlu1 %v686_v19 }
 0x3e8   :  { %v667_v20 = vpop.xlane.xlu0 %666 }
 0x3e9   :  { %7452 = vrcp.f32 %v667_v20 }
 0x3ec   :  { %v673_v21 = vpop.xlane.xlu0 %672 }
 0x3ed   :  { %v670_v22 = vpop.xlane.xlu1 %669  ;;  %7454 = vrcp.f32 %v673_v21  ;;  %v5369_v21 = vld [vmem:[%s10502_s12] ss:$0 sm:$0xff] }
 0x3ee   :  { %7456 = vrcp.f32 %v670_v22 }
 0x3f1   :  { %v676_v23 = vpop.xlane.xlu1 %675  ;;  %v679_v24 = vpop.xlane.xlu0 %678 }
 0x3f2   :  { %7458 = vrcp.f32 %v676_v23 }
 0x3f3   :  { %v7453_v25 = vpop.eup %7452  ;;  %7460 = vrcp.f32 %v679_v24 }
 0x3f4   :  { %v690_v26 = vmul.f32 %v7453_v25, %v7437_v62 }
 0x3f5   :  { %v682_v27 = vpop.xlane.xlu1 %681  ;;  %v685_v28 = vpop.xlane.xlu0 %684 }
 0x3f6   :  { %7462 = vrcp.f32 %v682_v27  ;;  %6576 = vmatprep.mubr.msk.f32.mxu0 %vm616_vm3, %v690_v26 }
 0x3f7   :  { %v7455_v29 = vpop.eup %7454  ;;  %7464 = vrcp.f32 %v685_v28 }
 0x3f8   :  { %v7457_v30 = vpop.eup %7456  ;;  %v694_v31 = vmul.f32 %v7455_v29, %v7439_v5 }
 0x3f9   :  { %v692_v32 = vmul.f32 %v7457_v30, %v7441_v7  ;;  %v688_v33 = vpop.xlane.xlu1 %687 }
 0x3fa   :  { %7466 = vrcp.f32 %v688_v33 }
 0x3fb   :  { %6577 = vmatmul.mubr.msk.f32.vlgmr.msra.gmra.mrb[4].mxu0 %vm616_vm3, %v692_v32 }
 0x3fc   :  { %v7459_v36 = vpop.eup %7458  ;;  %6579 = vmatprep.mubr.msk.f32.mxu0 %vm616_vm3, %v694_v31 }
 0x3fd   :  { %v7461_v37 = vpop.eup %7460  ;;  %v696_v38 = vmul.f32 %v7459_v36, %v7443_v10 }
 0x3fe   :  { %v698_v39 = vmul.f32 %v7461_v37, %v7445_v11 }
 0x3ff   :  { %6580 = vmatmul.mubr.msk.f32.gmra.mrb[6].mxu0 %vm616_vm3, %v696_v38  ;;  %v996_v38 = vld [vmem:[%s10505_s15 + $0x8] sm:$0xff] }
 0x400   :  { %v7463_v40 = vpop.eup %7462  ;;  %6582 = vmatprep.mubr.msk.f32.mxu0 %vm616_vm3, %v698_v39  ;;  %v1012_v39 = vld [vmem:[%s10505_s15 + $0x88] sm:$0xff] }
 0x401   :  { %v7465_v41 = vpop.eup %7464  ;;  %v700_v42 = vmul.f32 %v7463_v40, %v7447_v14  ;;  %v998_v40 = vld [vmem:[%s10505_s15 + $0x18] sm:$0xff] }
 0x402   :  { %v702_v43 = vmul.f32 %v7465_v41, %v7449_v15  ;;  %v6744_v41 = vpack.c.bf16 %v1012_v39, %v996_v38  ;;  %v1020_v38 = vld [vmem:[%s10505_s15 + $0xc8] sm:$0xff]  ;;  %v1006_v39 = vld [vmem:[%s10505_s15 + $0x58] sm:$0xff] }
 0x403   :  { %6583 = vmatmul.mubr.msk.f32.gmra.mrb[8].mxu0 %vm616_vm3, %v700_v42  ;;  %v995_v42 = vld [vmem:[%s10505_s15] sm:$0xff] }
 0x404   :  { %v7467_v44 = vpop.eup %7466  ;;  %6585 = vmatprep.mubr.msk.f32.mxu0 %vm616_vm3, %v702_v43  ;;  %v1011_v43 = vld [vmem:[%s10505_s15 + $0x80] sm:$0xff]  ;;  %6745 = vmatprep.subr.bf16.mxu0 %v6744_v41 }
 0x405   :  { %v704_v45 = vmul.f32 %v7467_v44, %v7451_v18  ;;  %v1014_v44 = vld [vmem:[%s10505_s15 + $0x98] sm:$0xff] }
 0x406   :  { %v6752_v47 = vpack.c.bf16 %v1014_v44, %v998_v40  ;;  %v1022_v40 = vld [vmem:[%s10505_s15 + $0xd8] sm:$0xff] }
 0x407   :  { %6586 = vmatmul.mubr.msk.f32.gmra.mrb[10].mxu0 %vm616_vm3, %v704_v45  ;;  %v6746_v45 = vpack.c.bf16 %v1011_v43, %v995_v42  ;;  %v1003_v43 = vld [vmem:[%s10505_s15 + $0x40] sm:$0xff] }
 0x408   :  { %6753 = vmatprep.subr.bf16.mxu1 %v6752_v47  ;;  %v1005_v47 = vld [vmem:[%s10505_s15 + $0x50] sm:$0xff] }
 0x409   :  { %6747 = vmatpush1.bf16.msra.mxu0 %v6746_v45  ;;  %v1019_v45 = vld [vmem:[%s10505_s15 + $0xc0] sm:$0xff] }
 0x4ce   :  { %v6578_v53 = vpop.f32.mrb[4].mxu0 }
 0x4cf   :  { %v835_v54 = vmul.f32 %v6578_v53, %v7792_v58  ;;  %v795_v56 = vpop.f32.mrb[5].mxu0  ;;  %v1030_v53 = vld [vmem:[%s10505_s15 + $0x118] sm:$0xff] }
 0x4d0   :  { %v834_v57 = vmul.f32 %v7772_v46, %v795_v56  ;;  %v1027_v56 = vld [vmem:[%s10505_s15 + $0x100] sm:$0xff] }
 0x4d1   :  { %v843_v60 = vsel %vm193_vm1, %v835_v54, 0.0  ;;  %v6748_v54 = vpack.c.bf16 %v1044_v52, %v1028_v51  ;;  %v1036_v51 = vld [vmem:[%s10505_s15 + $0x148] sm:$0xff] }
 0x4d2   :  { %v842_v61 = vsel %vm193_vm1, %v834_v57, 0.0  ;;  %v6581_v62 = vpop.f32.mrb[6].mxu0  ;;  %v1043_v57 = vld [vmem:[%s10505_s15 + $0x180] sm:$0xff]  ;;  %v1052_v52 = vld [vmem:[%s10505_s15 + $0x1c8] sm:$0xff] }
 0x4d3   :  { %v844_v0 = vadd.f32 %v843_v60, %v842_v61  ;;  %v805_v1 = vpop.f32.mrb[7].mxu0  ;;  %v837_v2 = vmul.f32 %v6581_v62, %v7804_v63  ;;  %v1046_v60 = vld [vmem:[%s10505_s15 + $0x198] sm:$0xff]  ;;  %v6750_v61 = vpack.c.bf16 %v1043_v57, %v1027_v56  ;;  %6749 = vmatprep.subr.bf16.mxu0 %v6748_v54  ;;  %v6778_v56 = vpack.c.bf16 %v1019_v45, %v1003_v43  ;;  %v1799_v43 = vld [vmem:[%s10507_s17 + $0x10] sm:$0xff] }
 0x4d4   :  { %v836_v3 = vmul.f32 %v7797_v59, %v805_v1  ;;  %v6756_v62 = vpack.c.bf16 %v1046_v60, %v1030_v53  ;;  %v1045_v1 = vld [vmem:[%s10505_s15 + $0x190] sm:$0xff]  ;;  %v1038_v53 = vld [vmem:[%s10505_s15 + $0x158] sm:$0xff]  ;;  %v6786_v57 = vpack.c.bf16 %v1021_v48, %v1005_v47  ;;  %v1035_v60 = vld [vmem:[%s10505_s15 + $0x140] sm:$0xff] }
 0x4d5   :  { %v847_v9 = vsel %vm193_vm1, %v837_v2, 0.0  ;;  %6751 = vmatpush1.bf16.msra.mxu0 %v6750_v61  ;;  %v1054_v54 = vld [vmem:[%s10505_s15 + $0x1d8] sm:$0xff]  ;;  %v1051_v61 = vld [vmem:[%s10505_s15 + $0x1c0] sm:$0xff] }
 0x4d6   :  { %v845_v4 = vsel %vm193_vm1, %v836_v3, 0.0  ;;  %v6584_v5 = vpop.f32.mrb[8].mxu0  ;;  %v1000_v3 = vld [vmem:[%s10505_s15 + $0x28] sm:$0xff]  ;;  %v1800_v45 = vld [vmem:[%s10507_s17 + $0x18] sm:$0xff] }
 0x4d7   :  { %v846_v6 = vadd.f32 %v845_v4, %v844_v0  ;;  %v839_v7 = vmul.f32 %v6584_v5, %v7792_v58  ;;  %v815_v8 = vpop.f32.mrb[9].mxu0  ;;  %v1029_v0 = vld [vmem:[%s10505_s15 + $0x110] sm:$0xff]  ;;  %v1016_v4 = vld [vmem:[%s10505_s15 + $0xa8] sm:$0xff]  ;;  %v1002_v5 = vld [vmem:[%s10505_s15 + $0x38] sm:$0xff] }
 0x4d8   :  { %v838_v10 = vmul.f32 %v7772_v46, %v815_v8  ;;  %v6758_v2 = vpack.c.bf16 %v1045_v1, %v1029_v0  ;;  %v1018_v8 = vld [vmem:[%s10505_s15 + $0xb8] sm:$0xff]  ;;  %v1053_v0 = vld [vmem:[%s10505_s15 + $0x1d0] sm:$0xff]  ;;  %v6780_v1 = vpack.c.bf16 %v1052_v52, %v1036_v51  ;;  %v1817_v51 = vld [vmem:[%s10507_s17 + $0xa0] sm:$0xff] }
 0x4d9   :  { %v848_v11 = vadd.f32 %v847_v9, %v846_v6  ;;  %v850_v12 = vsel %vm193_vm1, %v839_v7, 0.0  ;;  %v7552_v6 = vmov 0.0   ;;  %v6760_v7 = vpack.c.bf16 %v1016_v4, %v1000_v3  ;;  %v1008_v3 = vld [vmem:[%s10505_s15 + $0x68] sm:$0xff] }
 0x4da   :  { %v849_v13 = vsel %vm193_vm1, %v838_v10, 0.0  ;;  %v6587_v14 = vpop.f32.mrb[10].mxu0  ;;  %1213 = vmatprep.mubr.f32.mxu0 %v7552_v6  ;;  %v6768_v9 = vpack.c.bf16 %v1018_v8, %v1002_v5  ;;  %v1024_v4 = vld [vmem:[%s10505_s15 + $0xe8] sm:$0xff]  ;;  %v1010_v5 = vld [vmem:[%s10505_s15 + $0x78] sm:$0xff]  ;;  %v6782_v8 = vpack.c.bf16 %v1051_v61, %v1035_v60  ;;  %v1801_v60 = vld [vmem:[%s10507_s17 + $0x20] sm:$0xff] }
 0x4db   :  { %v851_v15 = vadd.f32 %v850_v12, %v849_v13  ;;  %v825_v16 = vpop.f32.mrb[11].mxu0  ;;  %6596 = vmatprep.mubr.msk.f32.mxu1 %vm193_vm1, %v848_v11  ;;  %v841_v17 = vmul.f32 %v6587_v14, %v7804_v63  ;;  %6761 = vmatprep.subr.bf16.mxu0 %v6760_v7  ;;  %v1026_v7 = vld [vmem:[%s10505_s15 + $0xf8] sm:$0xff]  ;;  %v1818_v52 = vld [vmem:[%s10507_s17 + $0xa8] sm:$0xff] }
 0x4dc   :  { %v840_v18 = vmul.f32 %v7797_v59, %v825_v16  ;;  %v1802_v61 = vld [vmem:[%s10507_s17 + $0x28] sm:$0xff] }
 0x4dd   :  { %v854_v20 = vsel %vm193_vm1, %v841_v17, 0.0 }
 0x4de   :  { %v852_v58 = vsel %vm193_vm1, %v840_v18, 0.0  ;;  %v5372_v18 = vld [vmem:[%s10503_s13] ss:$0 sm:$0xff] }
 0x4df   :  { %v853_v19 = vadd.f32 %v852_v58, %v851_v15  ;;  %v999_v58 = vld [vmem:[%s10505_s15 + $0x20] sm:$0xff] }
 0x4e1   :  { %v855_v46 = vadd.f32 %v854_v20, %v853_v19 }
 0x4e3   :  { %6597 = vmatmul.mubr.msk.f32.vlgmr.msra.gmra.mrb[12].mxu1 %vm193_vm1, %v855_v46  ;;  %v1015_v46 = vld [vmem:[%s10505_s15 + $0xa0] sm:$0xff] }
 0x4e4   :  { %6755 = vmatpush1.bf16.msra.mxu1 %v6754_v50  ;;  %1290 = vmatprep.mubr.f32.mxu1 %v7552_v6  ;;  %v6784_v50 = vpack.c.bf16 %v1022_v40, %v1006_v39  ;;  %v1847_v39 = vld [vmem:[%s10507_s17 + $0x190] sm:$0xff]  ;;  %v1848_v40 = vld [vmem:[%s10507_s17 + $0x198] sm:$0xff] }
 0x4e5   :  { %6757 = vmatprep.subr.bf16.mxu1 %v6756_v62  ;;  %v1037_v62 = vld [vmem:[%s10505_s15 + $0x150] sm:$0xff]  ;;  %v6844_v48 = vpack.c.bf16 %v1848_v40, %v1847_v39  ;;  %v1857_v39 = vld [vmem:[%s10507_s17 + $0x1e0] sm:$0xff]  ;;  %v1858_v40 = vld [vmem:[%s10507_s17 + $0x1e8] sm:$0xff] }
 0x4e8   :  { %6759 = vmatpush1.bf16.msra.mxu1 %v6758_v2  ;;  %v6788_v2 = vpack.c.bf16 %v1054_v54, %v1038_v53  ;;  %v1849_v53 = vld [vmem:[%s10507_s17 + $0x1a0] sm:$0xff]  ;;  %v1850_v54 = vld [vmem:[%s10507_s17 + $0x1a8] sm:$0xff] }
 0x4e9   :  { %6769 = vmatprep.subr.bf16.mxu1 %v6768_v9  ;;  %v6790_v9 = vpack.c.bf16 %v1053_v0, %v1037_v62  ;;  %v6816_v62 = vpack.c.bf16 %v1818_v52, %v1817_v51  ;;  %v6848_v0 = vpack.c.bf16 %v1850_v54, %v1849_v53  ;;  %v1827_v53 = vld [vmem:[%s10507_s17 + $0xf0] sm:$0xff]  ;;  %v1828_v54 = vld [vmem:[%s10507_s17 + $0xf8] sm:$0xff] }
 0x5b6   :  { %v6598_v22 = vpop.f32.mrb[12].mxu1 }
 0x5b7   :  { %v945_v23 = vadd.f32 %v6598_v22, %v5369_v21  ;;  %v939_v24 = vpop.f32.mrb[13].mxu1  ;;  %v1017_v22 = vld [vmem:[%s10505_s15 + $0xb0] sm:$0xff] }
 0x5b8   :  { %v940_v25 = vadd.f32 %v5369_v21, %v939_v24  ;;  %v1001_v21 = vld [vmem:[%s10505_s15 + $0x30] sm:$0xff]  ;;  %v1032_v24 = vld [vmem:[%s10505_s15 + $0x128] sm:$0xff] }
 0x5b9   :  { %v949_v63 = vadd.f32 %v945_v23, %v7749_v35  ;;  %v5373_v23 = vld [vmem:[%s10504_s14] ss:$0 sm:$0xff] }
 0x5ba   :  { %v948_v59 = vadd.f32 %v940_v25, %v7747_v34 }
 0x5bb   :  { %v953_v26 = vsel %vm193_vm1, %v949_v63, 0.0 }
 0x5bc   :  { %954 = vadd.xlane.f32.xlu1 %v953_v26  ;;  %v950_v27 = vsel %vm193_vm1, %v948_v59, 0.0  ;;  %v1050_v26 = vld [vmem:[%s10505_s15 + $0x1b8] sm:$0xff] }
 0x5bd   :  { %951 = vadd.xlane.f32.xlu0 %v950_v27  ;;  %v6762_v27 = vpack.c.bf16 %v1015_v46, %v999_v58  ;;  %v1058_v58 = vld [vmem:[%s10505_s15 + $0x1f8] sm:$0xff]  ;;  %v1039_v46 = vld [vmem:[%s10505_s15 + $0x160] sm:$0xff] }
 0x649   :  { %v955_v28 = vpop.xlane.xlu1 %954 }
 0x64a   :  { %v958_v29 = vmul.f32 0.03125, %v955_v28  ;;  %v952_v30 = vpop.xlane.xlu0 %951  ;;  %v6770_v28 = vpack.c.bf16 %v1017_v22, %v1001_v21  ;;  %v1055_v21 = vld [vmem:[%s10505_s15 + $0x1e0] sm:$0xff]  ;;  %v1041_v22 = vld [vmem:[%s10505_s15 + $0x170] sm:$0xff] }
 0x64b   :  { %v957_v31 = vmul.f32 0.03125, %v952_v30 }
 0x64c   :  { %v7903_v32 = vsub.f32 %v949_v63, %v958_v29  ;;  %v1048_v63 = vld [vmem:[%s10505_s15 + $0x1a8] sm:$0xff]  ;;  %v1031_v29 = vld [vmem:[%s10505_s15 + $0x120] sm:$0xff] }
 0x64d   :  { %v7905_v33 = vsub.f32 %v948_v59, %v957_v31  ;;  %v1034_v59 = vld [vmem:[%s10505_s15 + $0x138] sm:$0xff] }
 0x64e   :  { %v962_v36 = vmul.f32 %v7903_v32, %v7903_v32 }
 0x64f   :  { %v961_v34 = vmul.f32 %v7905_v33, %v7905_v33 }
 0x650   :  { %v966_v35 = vsel %vm193_vm1, %v962_v36, 0.0  ;;  %v1049_v36 = vld [vmem:[%s10505_s15 + $0x1b0] sm:$0xff] }
 0x651   :  { %967 = vadd.xlane.f32.xlu1 %v966_v35  ;;  %v963_v37 = vsel %vm193_vm1, %v961_v34, 0.0  ;;  %v6764_v34 = vpack.c.bf16 %v1048_v63, %v1032_v24  ;;  %v6772_v35 = vpack.c.bf16 %v1050_v26, %v1034_v59  ;;  %v1813_v63 = vld [vmem:[%s10507_s17 + $0x80] sm:$0xff]  ;;  %v1814_v59 = vld [vmem:[%s10507_s17 + $0x88] sm:$0xff] }
 0x652   :  { %964 = vadd.xlane.f32.xlu0 %v963_v37  ;;  %v1004_v37 = vld [vmem:[%s10505_s15 + $0x48] sm:$0xff]  ;;  %v1845_v26 = vld [vmem:[%s10507_s17 + $0x180] sm:$0xff] }
 0x653   :  { %v6776_v49 = vpack.c.bf16 %v1020_v38, %v1004_v37  ;;  %v1815_v37 = vld [vmem:[%s10507_s17 + $0x90] sm:$0xff]  ;;  %v1816_v38 = vld [vmem:[%s10507_s17 + $0x98] sm:$0xff] }
 0x654   :  { %v6812_v47 = vpack.c.bf16 %v1816_v38, %v1815_v37  ;;  %v1825_v37 = vld [vmem:[%s10507_s17 + $0xe0] sm:$0xff]  ;;  %v1826_v38 = vld [vmem:[%s10507_s17 + $0xe8] sm:$0xff] }
 0x6de   :  { %v968_v10 = vpop.xlane.xlu1 %967 }
 0x6df   :  { %v970_v11 = vmul.f32 0.03125, %v968_v10  ;;  %v965_v12 = vpop.xlane.xlu0 %964  ;;  %v1007_v10 = vld [vmem:[%s10505_s15 + $0x60] sm:$0xff] }
 0x6e0   :  { %v969_v13 = vmul.f32 0.03125, %v965_v12  ;;  %v1009_v12 = vld [vmem:[%s10505_s15 + $0x70] sm:$0xff] }
 0x6e1   :  { %v972_v14 = vadd.f32 1e-05, %v970_v11  ;;  %v1023_v11 = vld [vmem:[%s10505_s15 + $0xe0] sm:$0xff] }
 0x6e2   :  { %v971_v15 = vadd.f32 1e-05, %v969_v13  ;;  %v1025_v13 = vld [vmem:[%s10505_s15 + $0xf0] sm:$0xff] }
 0x6e3   :  { %7468 = vrsqrt.f32 %v972_v14  ;;  %v6792_v14 = vpack.c.bf16 %v1024_v4, %v1008_v3  ;;  %v1819_v3 = vld [vmem:[%s10507_s17 + $0xb0] sm:$0xff]  ;;  %v1820_v4 = vld [vmem:[%s10507_s17 + $0xb8] sm:$0xff] }
 0x6e4   :  { %7470 = vrsqrt.f32 %v971_v15  ;;  %v6800_v15 = vpack.c.bf16 %v1026_v7, %v1010_v5  ;;  %v1851_v5 = vld [vmem:[%s10507_s17 + $0x1b0] sm:$0xff]  ;;  %v1852_v7 = vld [vmem:[%s10507_s17 + $0x1b8] sm:$0xff] }
 0x6ed   :  { %v7469_v16 = vpop.eup %7468 }
 0x6ee   :  { %v7471_v17 = vpop.eup %7470  ;;  %v976_v19 = vmul.f32 %v7469_v16, %v7903_v32  ;;  %v1047_v32 = vld [vmem:[%s10505_s15 + $0x1a0] sm:$0xff]  ;;  %v1040_v16 = vld [vmem:[%s10505_s15 + $0x168] sm:$0xff] }
 0x6ef   :  { %v975_v20 = vmul.f32 %v7471_v17, %v7905_v33  ;;  %v1033_v33 = vld [vmem:[%s10505_s15 + $0x130] sm:$0xff]  ;;  %v6766_v41 = vpack.c.bf16 %v1047_v32, %v1031_v29  ;;  %v1056_v17 = vld [vmem:[%s10505_s15 + $0x1e8] sm:$0xff] }
 0x6f0   :  { %v985_v30 = vmul.f32 %v5372_v18, %v976_v19  ;;  %v6774_v42 = vpack.c.bf16 %v1049_v36, %v1033_v33  ;;  %v6794_v19 = vpack.c.bf16 %v1023_v11, %v1007_v10  ;;  %v6796_v24 = vpack.c.bf16 %v1056_v17, %v1040_v16  ;;  %v1798_v32 = vld [vmem:[%s10507_s17 + $0x8] sm:$0xff]  ;;  %v1803_v10 = vld [vmem:[%s10507_s17 + $0x30] sm:$0xff]  ;;  %v1804_v11 = vld [vmem:[%s10507_s17 + $0x38] sm:$0xff] }
 0x6f1   :  { %v984_v25 = vmul.f32 %v5372_v18, %v975_v20  ;;  %v1042_v18 = vld [vmem:[%s10505_s15 + $0x178] sm:$0xff]  ;;  %v6802_v20 = vpack.c.bf16 %v1025_v13, %v1009_v12  ;;  %v6808_v33 = vpack.c.bf16 %v1814_v59, %v1813_v63  ;;  %v6820_v12 = vpack.c.bf16 %v1820_v4, %v1819_v3  ;;  %v1821_v16 = vld [vmem:[%s10507_s17 + $0xc0] sm:$0xff]  ;;  %v1822_v17 = vld [vmem:[%s10507_s17 + $0xc8] sm:$0xff] }
 0x6f2   :  { %v8040_v44 = vadd.f32 %v5373_v23, %v985_v30  ;;  %v1797_v30 = vld [vmem:[%s10507_s17] sm:$0xff]  ;;  %v6852_v13 = vpack.c.bf16 %v1852_v7, %v1851_v5  ;;  %v1823_v63 = vld [vmem:[%s10507_s17 + $0xd0] sm:$0xff]  ;;  %v1824_v59 = vld [vmem:[%s10507_s17 + $0xd8] sm:$0xff] }
 0x6f3   :  { %v8010_v31 = vadd.f32 %v5373_v23, %v984_v25  ;;  %v1057_v23 = vld [vmem:[%s10505_s15 + $0x1f0] sm:$0xff]  ;;  %v6804_v25 = vpack.c.bf16 %v1058_v58, %v1042_v18  ;;  %v1853_v18 = vld [vmem:[%s10507_s17 + $0x1c0] sm:$0xff]  ;;  %v1854_v58 = vld [vmem:[%s10507_s17 + $0x1c8] sm:$0xff] }
 0x6f4   :  { %v6806_v29 = vpack.c.bf16 %v1057_v23, %v1041_v22  ;;  %v6824_v22 = vpack.c.bf16 %v1822_v17, %v1821_v16  ;;  %v6856_v23 = vpack.c.bf16 %v1854_v58, %v1853_v18  ;;  %v1844_v3 = vld [vmem:[%s10507_s17 + $0x178] sm:$0xff]  ;;  %v1877_v5 = vld [vmem:[%s10507_s17 + $0x280] sm:$0xff]  ;;  %v1878_v7 = vld [vmem:[%s10507_s17 + $0x288] sm:$0xff] }
 0x6f5   :  { %5374 = vmatmul.mubr.msk.f32.vlgmr.msra.gmra.mrb[12].mxu0 %vm193_vm1, %v8010_v31  ;;  %5376 = vmatmul.mubr.msk.f32.vlgmr.msra.gmra.mrb[14].mxu1 %vm193_vm1, %v8010_v31  ;;  %v8380_v16 = vld [vmem:[%s10506_s16] sm:$0xff] }
 0x6f6   :  { %6763 = vmatpush1.bf16.msra.mxu0 %v6762_v27  ;;  %6771 = vmatpush1.bf16.msra.mxu1 %v6770_v28  ;;  %v1846_v27 = vld [vmem:[%s10507_s17 + $0x188] sm:$0xff]  ;;  %v6798_v28 = vpack.c.bf16 %v1055_v21, %v1039_v46  ;;  %v1805_v46 = vld [vmem:[%s10507_s17 + $0x40] sm:$0xff] }
 0x6f7   :  { %1219 = vmatprep.mubr.f32.mxu0 %v7552_v6  ;;  %1296 = vmatprep.mubr.f32.mxu1 %v7552_v6  ;;  %v6840_v36 = vpack.c.bf16 %v1846_v27, %v1845_v26  ;;  %v1806_v21 = vld [vmem:[%s10507_s17 + $0x48] sm:$0xff]  ;;  %v1855_v26 = vld [vmem:[%s10507_s17 + $0x1d0] sm:$0xff]  ;;  %v1856_v27 = vld [vmem:[%s10507_s17 + $0x1d8] sm:$0xff] }
 0x6f8   :  { %6765 = vmatprep.subr.bf16.mxu0 %v6764_v34  ;;  %6773 = vmatprep.subr.bf16.mxu1 %v6772_v35  ;;  %v1829_v34 = vld [vmem:[%s10507_s17 + $0x100] sm:$0xff]  ;;  %v1830_v35 = vld [vmem:[%s10507_s17 + $0x108] sm:$0xff] }
 0x6f9   :  { %5375 = vmatmul.mubr.msk.f32.gmra.mrb[14].mxu0 %vm193_vm1, %v8040_v44  ;;  %5377 = vmatmul.mubr.msk.f32.gmra.mrb[16].mxu1 %vm193_vm1, %v8040_v44 }
 0x6fa   :  { %6767 = vmatpush1.bf16.msra.mxu0 %v6766_v41  ;;  %6775 = vmatpush1.bf16.msra.mxu1 %v6774_v42  ;;  %v6810_v41 = vpack.c.bf16 %v1798_v32, %v1797_v30  ;;  %v6842_v42 = vpack.c.bf16 %v1830_v35, %v1829_v34  ;;  %v1807_v30 = vld [vmem:[%s10507_s17 + $0x50] sm:$0xff]  ;;  %v1808_v32 = vld [vmem:[%s10507_s17 + $0x58] sm:$0xff] }
 0x6fb   :  { %1367 = vmatprep.mubr.f32.mxu0 %v7552_v6  ;;  %1444 = vmatprep.mubr.f32.mxu1 %v7552_v6  ;;  %v1839_v34 = vld [vmem:[%s10507_s17 + $0x150] sm:$0xff]  ;;  %v1840_v35 = vld [vmem:[%s10507_s17 + $0x158] sm:$0xff] }
 0x6fc   :  { %6777 = vmatprep.subr.bf16.mxu0 %v6776_v49  ;;  %6785 = vmatprep.subr.bf16.mxu1 %v6784_v50  ;;  %v1831_v49 = vld [vmem:[%s10507_s17 + $0x110] sm:$0xff]  ;;  %v1832_v50 = vld [vmem:[%s10507_s17 + $0x118] sm:$0xff] }
 0x6fd   :  { %5378 = vmatmul.mubr.msk.f32.vlgmr.msra.gmra.mrb[16].mxu0 %vm193_vm1, %v8010_v31  ;;  %5380 = vmatmul.mubr.msk.f32.vlgmr.msra.gmra.mrb[18].mxu1 %vm193_vm1, %v8010_v31 }
 0x6fe   :  { %6779 = vmatpush1.bf16.msra.mxu0 %v6778_v56  ;;  %6787 = vmatpush1.bf16.msra.mxu1 %v6786_v57  ;;  %v6814_v56 = vpack.c.bf16 %v1800_v45, %v1799_v43  ;;  %v6846_v57 = vpack.c.bf16 %v1832_v50, %v1831_v49  ;;  %v1809_v43 = vld [vmem:[%s10507_s17 + $0x60] sm:$0xff]  ;;  %v6832_v45 = vpack.c.bf16 %v1826_v38, %v1825_v37  ;;  %v1842_v50 = vld [vmem:[%s10507_s17 + $0x168] sm:$0xff] }
 0x6ff   :  { %1373 = vmatprep.mubr.f32.mxu0 %v7552_v6  ;;  %1450 = vmatprep.mubr.f32.mxu1 %v7552_v6  ;;  %v1841_v49 = vld [vmem:[%s10507_s17 + $0x160] sm:$0xff] }
 0x700   :  { %6781 = vmatprep.subr.bf16.mxu0 %v6780_v1  ;;  %6789 = vmatprep.subr.bf16.mxu1 %v6788_v2  ;;  %v1833_v1 = vld [vmem:[%s10507_s17 + $0x120] sm:$0xff]  ;;  %v1834_v2 = vld [vmem:[%s10507_s17 + $0x128] sm:$0xff]  ;;  %v6866_v52 = vpack.c.bf16 %v1842_v50, %v1841_v49  ;;  %v1864_v50 = vld [vmem:[%s10507_s17 + $0x218] sm:$0xff] }
 0x701   :  { %5379 = vmatmul.mubr.msk.f32.gmra.mrb[18].mxu0 %vm193_vm1, %v8040_v44  ;;  %5381 = vmatmul.mubr.msk.f32.gmra.mrb[20].mxu1 %vm193_vm1, %v8040_v44 }
 0x702   :  { %6783 = vmatpush1.bf16.msra.mxu0 %v6782_v8  ;;  %6791 = vmatpush1.bf16.msra.mxu1 %v6790_v9  ;;  %v6818_v8 = vpack.c.bf16 %v1802_v61, %v1801_v60  ;;  %v6850_v9 = vpack.c.bf16 %v1834_v2, %v1833_v1  ;;  %v1860_v60 = vld [vmem:[%s10507_s17 + $0x1f8] sm:$0xff]  ;;  %v1811_v61 = vld [vmem:[%s10507_s17 + $0x70] sm:$0xff] }
 0x703   :  { %1521 = vmatprep.mubr.f32.mxu0 %v7552_v6  ;;  %1598 = vmatprep.mubr.f32.mxu1 %v7552_v6  ;;  %v1843_v2 = vld [vmem:[%s10507_s17 + $0x170] sm:$0xff] }
 0x704   :  { %6793 = vmatprep.subr.bf16.mxu0 %v6792_v14  ;;  %6801 = vmatprep.subr.bf16.mxu1 %v6800_v15  ;;  %v1835_v14 = vld [vmem:[%s10507_s17 + $0x130] sm:$0xff]  ;;  %v1836_v15 = vld [vmem:[%s10507_s17 + $0x138] sm:$0xff]  ;;  %v6870_v4 = vpack.c.bf16 %v1844_v3, %v1843_v2  ;;  %v1882_v3 = vld [vmem:[%s10507_s17 + $0x2a8] sm:$0xff] }
 0x705   :  { %5382 = vmatmul.mubr.msk.f32.vlgmr.msra.gmra.mrb[20].mxu0 %vm193_vm1, %v8010_v31  ;;  %5384 = vmatmul.mubr.msk.f32.vlgmr.msra.gmra.mrb[22].mxu1 %vm193_vm1, %v8010_v31 }
 0x706   :  { %6795 = vmatpush1.bf16.msra.mxu0 %v6794_v19  ;;  %6803 = vmatpush1.bf16.msra.mxu1 %v6802_v20  ;;  %v6822_v19 = vpack.c.bf16 %v1804_v11, %v1803_v10  ;;  %v6854_v20 = vpack.c.bf16 %v1836_v15, %v1835_v14  ;;  %v1910_v10 = vld [vmem:[%s10507_s17 + $0x388] sm:$0xff] }
 0x707   :  { %1527 = vmatprep.mubr.f32.mxu0 %v7552_v6  ;;  %1604 = vmatprep.mubr.f32.mxu1 %v7552_v6 }
 0x708   :  { %6797 = vmatprep.subr.bf16.mxu0 %v6796_v24  ;;  %6805 = vmatprep.subr.bf16.mxu1 %v6804_v25  ;;  %v1837_v24 = vld [vmem:[%s10507_s17 + $0x140] sm:$0xff]  ;;  %v1838_v25 = vld [vmem:[%s10507_s17 + $0x148] sm:$0xff] }
 0x709   :  { %5383 = vmatmul.mubr.msk.f32.gmra.mrb[22].mxu0 %vm193_vm1, %v8040_v44  ;;  %5385 = vmatmul.mubr.msk.f32.gmra.mrb[24].mxu1 %vm193_vm1, %v8040_v44 }
 0x70a   :  { %6799 = vmatpush1.bf16.msra.mxu0 %v6798_v28  ;;  %6807 = vmatpush1.bf16.msra.mxu1 %v6806_v29  ;;  %v6826_v28 = vpack.c.bf16 %v1806_v21, %v1805_v46  ;;  %v6858_v29 = vpack.c.bf16 %v1838_v25, %v1837_v24  ;;  %v1861_v21 = vld [vmem:[%s10507_s17 + $0x200] sm:$0xff] }
 0x70b   :  { %1675 = vmatprep.mubr.f32.mxu0 %v7552_v6  ;;  %1752 = vmatprep.mubr.f32.mxu1 %v7552_v6 }
 0x70c   :  { %6809 = vmatprep.subr.bf16.mxu0 %v6808_v33  ;;  %6841 = vmatprep.subr.bf16.mxu1 %v6840_v36  ;;  %v6828_v33 = vpack.c.bf16 %v1824_v59, %v1823_v63  ;;  %v6860_v36 = vpack.c.bf16 %v1856_v27, %v1855_v26  ;;  %v1893_v63 = vld [vmem:[%s10507_s17 + $0x300] sm:$0xff]  ;;  %v1894_v59 = vld [vmem:[%s10507_s17 + $0x308] sm:$0xff]  ;;  %v1879_v26 = vld [vmem:[%s10507_s17 + $0x290] sm:$0xff] }
 0x70d   :  { %5386 = vmatmul.mubr.msk.f32.vlgmr.msra.gmra.mrb[24].mxu0 %vm193_vm1, %v8010_v31  ;;  %5388 = vmatmul.mubr.msk.f32.vlgmr.msra.gmra.mrb[26].mxu1 %vm193_vm1, %v8010_v31 }
 0x70e   :  { %1681 = vmatprep.mubr.f32.mxu0 %v7552_v6  ;;  %1758 = vmatprep.mubr.f32.mxu1 %v7552_v6 }
 0x70f   :  { %6811 = vmatpush3.bf16.msra.mxu0 %v6810_v41  ;;  %6843 = vmatpush3.bf16.msra.mxu1 %v6842_v42  ;;  %v6830_v41 = vpack.c.bf16 %v1808_v32, %v1807_v30  ;;  %v6862_v42 = vpack.c.bf16 %v1840_v35, %v1839_v34  ;;  %v1880_v32 = vld [vmem:[%s10507_s17 + $0x298] sm:$0xff] }
 0x710   :  { %6813 = vmatprep.subr.bf16.mxu0 %v6812_v47  ;;  %6845 = vmatprep.subr.bf16.mxu1 %v6844_v48  ;;  %v6864_v47 = vpack.c.bf16 %v1858_v40, %v1857_v39  ;;  %v1810_v48 = vld [vmem:[%s10507_s17 + $0x68] sm:$0xff]  ;;  %v6906_v39 = vpack.c.bf16 %v1894_v59, %v1893_v63 }
 0x711   :  { %5387 = vmatmul.mubr.msk.f32.gmra.mrb[26].mxu0 %vm193_vm1, %v8040_v44  ;;  %5389 = vmatmul.mubr.msk.f32.gmra.mrb[28].mxu1 %vm193_vm1, %v8040_v44  ;;  %v6834_v51 = vpack.c.bf16 %v1810_v48, %v1809_v43  ;;  %v6876_v48 = vpack.c.bf16 %v1880_v32, %v1879_v26  ;;  %v1898_v59 = vld [vmem:[%s10507_s17 + $0x328] sm:$0xff]  ;;  %v1883_v26 = vld [vmem:[%s10507_s17 + $0x2b0] sm:$0xff]  ;;  %v1916_v32 = vld [vmem:[%s10507_s17 + $0x3b8] sm:$0xff] }
 0x713   :  { %6815 = vmatpush3.bf16.msra.mxu0 %v6814_v56  ;;  %6847 = vmatpush3.bf16.msra.mxu1 %v6846_v57  ;;  %v1859_v56 = vld [vmem:[%s10507_s17 + $0x1f0] sm:$0xff]  ;;  %v6836_v57 = vpack.c.bf16 %v1828_v54, %v1827_v53 }
 0x714   :  { %6817 = vmatprep.subr.bf16.mxu0 %v6816_v62  ;;  %6849 = vmatprep.subr.bf16.mxu1 %v6848_v0  ;;  %v1812_v62 = vld [vmem:[%s10507_s17 + $0x78] sm:$0xff]  ;;  %v6868_v0 = vpack.c.bf16 %v1860_v60, %v1859_v56 }
 0x715   :  { %v6838_v1 = vpack.c.bf16 %v1812_v62, %v1811_v61  ;;  %v1896_v61 = vld [vmem:[%s10507_s17 + $0x318] sm:$0xff]  ;;  %v1881_v62 = vld [vmem:[%s10507_s17 + $0x2a0] sm:$0xff] }
 0x717   :  { %6819 = vmatpush3.bf16.msra.mxu0 %v6818_v8  ;;  %6851 = vmatpush3.bf16.msra.mxu1 %v6850_v9  ;;  %v1909_v8 = vld [vmem:[%s10507_s17 + $0x380] sm:$0xff]  ;;  %v6872_v9 = vpack.c.bf16 %v1878_v7, %v1877_v5  ;;  %v1914_v5 = vld [vmem:[%s10507_s17 + $0x3a8] sm:$0xff] }
 0x718   :  { %6821 = vmatprep.subr.bf16.mxu0 %v6820_v12  ;;  %6853 = vmatprep.subr.bf16.mxu1 %v6852_v13  ;;  %v6904_v11 = vpack.c.bf16 %v1910_v10, %v1909_v8  ;;  %v1063_v12 = vlaneseq  ;;  %v1865_v7 = vld [vmem:[%s10507_s17 + $0x220] sm:$0xff] }
 0x71a   :  { %v8369_v13 = vshrl.u32 %v1063_v12, 7 }
 0x71b   :  { %6823 = vmatpush3.bf16.msra.mxu0 %v6822_v19  ;;  %6855 = vmatpush3.bf16.msra.mxu1 %v6854_v20 }
 0x71c   :  { %6825 = vmatprep.subr.bf16.mxu0 %v6824_v22  ;;  %6857 = vmatprep.subr.bf16.mxu1 %v6856_v23  ;;  %v8372_v14 = vsub.s32 0, %v8369_v13  ;;  %v8375_v15 = vsub.s32 2, %v8369_v13  ;;  %v8383_v17 = vsub.s32 1, %v8369_v13  ;;  %v8386_v18 = vsub.s32 3, %v8369_v13  ;;  %v1862_v22 = vld [vmem:[%s10507_s17 + $0x208] sm:$0xff] }
 0x71d   :  { %v8403_v23 = vsub.s32 5, %v8369_v13  ;;  %v8424_v37 = vsub.s32 7, %v8369_v13  ;;  %v6874_v38 = vpack.c.bf16 %v1862_v22, %v1861_v21 }
 0x71e   :  { %v1066_v58 = vrot.slane %v8380_v16, %v8372_v14  ;;  %v1074_v19 = vrot.slane %v8380_v16, %v8375_v15  ;;  %v1070_v20 = vrot.slane %v8380_v16, %v8383_v17  ;;  %v1078_v46 = vrot.slane %v8380_v16, %v8386_v18 }
 0x71f   :  { %6827 = vmatpush3.bf16.msra.mxu0 %v6826_v28  ;;  %6859 = vmatpush3.bf16.msra.mxu1 %v6858_v29  ;;  %v8428_v40 = vrot.slane %v8380_v16, %v8403_v23  ;;  %v8447_v2 = vrot.slane %v8380_v16, %v8424_v37 }
 0x720   :  { %6829 = vmatprep.subr.bf16.mxu0 %v6828_v33  ;;  %6861 = vmatprep.subr.bf16.mxu1 %v6860_v36  ;;  %v1911_v33 = vld [vmem:[%s10507_s17 + $0x390] sm:$0xff]  ;;  %v1912_v36 = vld [vmem:[%s10507_s17 + $0x398] sm:$0xff] }
 0x721   :  { %v6908_v49 = vpack.c.bf16 %v1912_v36, %v1911_v33 }
 0x723   :  { %6831 = vmatpush3.bf16.msra.mxu0 %v6830_v41  ;;  %6863 = vmatpush3.bf16.msra.mxu1 %v6862_v42  ;;  %v1863_v41 = vld [vmem:[%s10507_s17 + $0x210] sm:$0xff] }
 0x724   :  { %6833 = vmatprep.subr.bf16.mxu0 %v6832_v45  ;;  %6865 = vmatprep.subr.bf16.mxu1 %v6864_v47  ;;  %v6878_v12 = vpack.c.bf16 %v1864_v50, %v1863_v41  ;;  %v1867_v41 = vld [vmem:[%s10507_s17 + $0x230] sm:$0xff]  ;;  %v1900_v50 = vld [vmem:[%s10507_s17 + $0x338] sm:$0xff] }
 0x727   :  { %6835 = vmatpush3.bf16.msra.mxu0 %v6834_v51  ;;  %6867 = vmatpush3.bf16.msra.mxu1 %v6866_v52  ;;  %v1895_v51 = vld [vmem:[%s10507_s17 + $0x310] sm:$0xff] }
 0x728   :  { %6837 = vmatprep.subr.bf16.mxu0 %v6836_v57  ;;  %6869 = vmatprep.subr.bf16.mxu1 %v6868_v0 }
 0x72b   :  { %6839 = vmatpush3.bf16.msra.mxu0 %v6838_v1  ;;  %6871 = vmatpush3.bf16.msra.mxu1 %v6870_v4  ;;  %v1913_v4 = vld [vmem:[%s10507_s17 + $0x3a0] sm:$0xff] }
 0x72c   :  { %6873 = vmatprep.subr.bf16.mxu0 %v6872_v9  ;;  %6905 = vmatprep.subr.bf16.mxu1 %v6904_v11  ;;  %v6912_v63 = vpack.c.bf16 %v1914_v5, %v1913_v4 }
 0x7c8   :  { %v1215_v24 = vpop.f32.mrb[12].mxu0  ;;  %v1292_v25 = vpop.f32.mrb[14].mxu1 }
 0x7c9   :  { %v1216_v27 = vadd.f32 %v1215_v24, %v1066_v58  ;;  %v1293_v28 = vadd.f32 %v1292_v25, %v1074_v19  ;;  %v1217_v29 = vpop.f32.mrb[13].mxu0  ;;  %v1294_v30 = vpop.f32.mrb[15].mxu1  ;;  %v6880_v25 = vpack.c.bf16 %v1882_v3, %v1881_v62  ;;  %v1869_v62 = vld [vmem:[%s10507_s17 + $0x240] sm:$0xff] }
 0x7ca   :  { %v1218_v34 = vadd.f32 %v1217_v29, %v1070_v20  ;;  %v1295_v35 = vadd.f32 %v1294_v30, %v1078_v46  ;;  %v1884_v29 = vld [vmem:[%s10507_s17 + $0x2b8] sm:$0xff]  ;;  %v1915_v30 = vld [vmem:[%s10507_s17 + $0x3b0] sm:$0xff] }
 0x7cb   :  { %v1765_v52 = vmax.f32 %v1216_v27, 0.0  ;;  %v1767_v53 = vmax.f32 %v1293_v28, 0.0 }
 0x7cc   :  { %v1766_v42 = vmax.f32 %v1218_v34, 0.0  ;;  %v1768_v43 = vmax.f32 %v1295_v35, 0.0  ;;  %v1221_v45 = vpop.f32.mrb[14].mxu0  ;;  %v1298_v47 = vpop.f32.mrb[16].mxu1 }
 0x7cd   :  { %v1222_v54 = vadd.f32 %v1221_v45, %v1066_v58  ;;  %v1299_v56 = vadd.f32 %v1298_v47, %v1074_v19  ;;  %v1223_v57 = vpop.f32.mrb[15].mxu0  ;;  %v1300_v60 = vpop.f32.mrb[17].mxu1  ;;  %v6910_v58 = vpack.c.bf16 %v1896_v61, %v1895_v51  ;;  %v1866_v19 = vld [vmem:[%s10507_s17 + $0x228] sm:$0xff]  ;;  %v6884_v47 = vpack.c.bf16 %v1884_v29, %v1883_v26  ;;  %v1885_v51 = vld [vmem:[%s10507_s17 + $0x2c0] sm:$0xff]  ;;  %v1904_v29 = vld [vmem:[%s10507_s17 + $0x358] sm:$0xff] }
 0x7ce   :  { %v1224_v0 = vadd.f32 %v1223_v57, %v1070_v20  ;;  %v1301_v1 = vadd.f32 %v1300_v60, %v1078_v46  ;;  %2124 = vmatprep.mubr.f32.mxu0 %v1766_v42  ;;  %2199 = vmatprep.mubr.f32.mxu1 %v1768_v43  ;;  %v1897_v20 = vld [vmem:[%s10507_s17 + $0x320] sm:$0xff]  ;;  %v1868_v42 = vld [vmem:[%s10507_s17 + $0x238] sm:$0xff] }
 0x7cf   :  { %2125 = vmatmul.mubr.f32.vlgmr.msra.gmra.mrb[28].mxu0 %v1765_v52  ;;  %2200 = vmatmul.mubr.f32.vlgmr.msra.gmra.mrb[30].mxu1 %v1767_v53  ;;  %v1781_v46 = vmax.f32 %v1222_v54, 0.0  ;;  %v1783_v21 = vmax.f32 %v1299_v56, 0.0  ;;  %v1886_v52 = vld [vmem:[%s10507_s17 + $0x2c8] sm:$0xff]  ;;  %v1917_v53 = vld [vmem:[%s10507_s17 + $0x3c0] sm:$0xff]  ;;  %v6886_v60 = vpack.c.bf16 %v1868_v42, %v1867_v41 }
 0x7d0   :  { %v1782_v8 = vmax.f32 %v1224_v0, 0.0  ;;  %v1784_v9 = vmax.f32 %v1301_v1, 0.0  ;;  %6875 = vmatpush3.bf16.msra.mxu0 %v6874_v38  ;;  %6907 = vmatpush3.bf16.msra.mxu1 %v6906_v39  ;;  %v8461_v10 = vpop.f32.mrb[16].mxu0  ;;  %v8463_v11 = vpop.f32.mrb[18].mxu1  ;;  %v6882_v38 = vpack.c.bf16 %v1866_v19, %v1865_v7  ;;  %v6914_v39 = vpack.c.bf16 %v1898_v59, %v1897_v20  ;;  %v1918_v54 = vld [vmem:[%s10507_s17 + $0x3c8] sm:$0xff]  ;;  %v1901_v7 = vld [vmem:[%s10507_s17 + $0x340] sm:$0xff] }
 0x7d1   :  { %v1371_v22 = vpop.f32.mrb[17].mxu0  ;;  %v1448_v24 = vpop.f32.mrb[19].mxu1  ;;  %6877 = vmatprep.subr.bf16.mxu0 %v6876_v48  ;;  %6909 = vmatprep.subr.bf16.mxu1 %v6908_v49  ;;  %v6916_v48 = vpack.c.bf16 %v1916_v32, %v1915_v30  ;;  %v1899_v49 = vld [vmem:[%s10507_s17 + $0x330] sm:$0xff]  ;;  %v1870_v0 = vld [vmem:[%s10507_s17 + $0x248] sm:$0xff]  ;;  %v6888_v4 = vpack.c.bf16 %v1886_v52, %v1885_v51  ;;  %v6920_v5 = vpack.c.bf16 %v1918_v54, %v1917_v53  ;;  %v1920_v19 = vld [vmem:[%s10507_s17 + $0x3d8] sm:$0xff] }
 0x7d2   :  { %v1372_v27 = vadd.f32 %v1371_v22, %v8428_v40  ;;  %v1449_v28 = vadd.f32 %v1448_v24, %v8447_v2  ;;  %2129 = vmatprep.mubr.f32.mxu0 %v1782_v8  ;;  %2204 = vmatprep.mubr.f32.mxu1 %v1784_v9  ;;  %v6918_v61 = vpack.c.bf16 %v1900_v50, %v1899_v49  ;;  %v1902_v8 = vld [vmem:[%s10507_s17 + $0x348] sm:$0xff]  ;;  %v1887_v9 = vld [vmem:[%s10507_s17 + $0x2d0] sm:$0xff]  ;;  %v1889_v30 = vld [vmem:[%s10507_s17 + $0x2e0] sm:$0xff]  ;;  %v8598_v50 = vsub.s32 6, %v8369_v13 }
 0x7d3   :  { %2130 = vmatmul.mubr.f32.gmra.mrb[30].mxu0 %v1781_v46  ;;  %2205 = vmatmul.mubr.f32.gmra.mrb[32].mxu1 %v1783_v21  ;;  %v6890_v21 = vpack.c.bf16 %v1870_v0, %v1869_v62  ;;  %v6922_v22 = vpack.c.bf16 %v1902_v8, %v1901_v7  ;;  %v1871_v24 = vld [vmem:[%s10507_s17 + $0x250] sm:$0xff]  ;;  %v1890_v32 = vld [vmem:[%s10507_s17 + $0x2e8] sm:$0xff]  ;;  %v1892_v62 = vld [vmem:[%s10507_s17 + $0x2f8] sm:$0xff] }
 0x7d4   :  { %v1770_v33 = vmax.f32 %v1372_v27, 0.0  ;;  %v1772_v36 = vmax.f32 %v1449_v28, 0.0  ;;  %6879 = vmatpush3.bf16.msra.mxu0 %v6878_v12  ;;  %6911 = vmatpush3.bf16.msra.mxu1 %v6910_v58  ;;  %v8488_v34 = vpop.f32.mrb[18].mxu0  ;;  %v8490_v35 = vpop.f32.mrb[20].mxu1  ;;  %v1888_v12 = vld [vmem:[%s10507_s17 + $0x2d8] sm:$0xff]  ;;  %v1919_v58 = vld [vmem:[%s10507_s17 + $0x3d0] sm:$0xff]  ;;  %v6896_v53 = vpack.c.bf16 %v1890_v32, %v1889_v30 }
 0x7d5   :  { %v8498_v43 = vpop.f32.mrb[19].mxu0  ;;  %v8500_v45 = vpop.f32.mrb[21].mxu1  ;;  %6881 = vmatprep.subr.bf16.mxu0 %v6880_v25  ;;  %6913 = vmatprep.subr.bf16.mxu1 %v6912_v63  ;;  %v1872_v25 = vld [vmem:[%s10507_s17 + $0x258] sm:$0xff]  ;;  %v6892_v26 = vpack.c.bf16 %v1888_v12, %v1887_v9  ;;  %v6924_v27 = vpack.c.bf16 %v1920_v19, %v1919_v58  ;;  %v1903_v28 = vld [vmem:[%s10507_s17 + $0x350] sm:$0xff]  ;;  %v1874_v49 = vld [vmem:[%s10507_s17 + $0x268] sm:$0xff] }
 0x7d6   :  { %2274 = vmatprep.mubr.f32.mxu0 %v1770_v33  ;;  %2349 = vmatprep.mubr.f32.mxu1 %v1772_v36  ;;  %v1921_v33 = vld [vmem:[%s10507_s17 + $0x3e0] sm:$0xff]  ;;  %v1922_v36 = vld [vmem:[%s10507_s17 + $0x3e8] sm:$0xff]  ;;  %v6894_v42 = vpack.c.bf16 %v1872_v25, %v1871_v24  ;;  %v1923_v0 = vld [vmem:[%s10507_s17 + $0x3f0] sm:$0xff] }
 0x7d7   :  { %v6928_v54 = vpack.c.bf16 %v1922_v36, %v1921_v33  ;;  %v1875_v58 = vld [vmem:[%s10507_s17 + $0x270] sm:$0xff]  ;;  %v1876_v19 = vld [vmem:[%s10507_s17 + $0x278] sm:$0xff]  ;;  %v1973_v30 = vld [vmem:[%s10507_s17 + $0x580] sm:$0xff] }
 0x7d8   :  { %6883 = vmatpush3.bf16.msra.mxu0 %v6882_v38  ;;  %6915 = vmatpush3.bf16.msra.mxu1 %v6914_v39  ;;  %v8520_v56 = vpop.f32.mrb[20].mxu0  ;;  %v8522_v57 = vpop.f32.mrb[22].mxu1  ;;  %v8585_v38 = vsub.s32 4, %v8369_v13  ;;  %v1891_v13 = vld [vmem:[%s10507_s17 + $0x2f0] sm:$0xff]  ;;  %v1974_v32 = vld [vmem:[%s10507_s17 + $0x588] sm:$0xff]  ;;  %v1925_v36 = vld [vmem:[%s10507_s17 + $0x400] sm:$0xff] }
 0x7d9   :  { %v8530_v1 = vpop.f32.mrb[21].mxu0  ;;  %v8532_v3 = vpop.f32.mrb[23].mxu1  ;;  %6885 = vmatprep.subr.bf16.mxu0 %v6884_v47  ;;  %6917 = vmatprep.subr.bf16.mxu1 %v6916_v48  ;;  %v6926_v47 = vpack.c.bf16 %v1904_v29, %v1903_v28  ;;  %v1873_v48 = vld [vmem:[%s10507_s17 + $0x260] sm:$0xff]  ;;  %v1908_v28 = vld [vmem:[%s10507_s17 + $0x378] sm:$0xff]  ;;  %v8661_v33 = vld [vmem:[%s10506_s16 + $0x8] sm:$0xff] }
 0x7da   :  { %v6898_v9 = vpack.c.bf16 %v1874_v49, %v1873_v48  ;;  %v1941_v29 = vld [vmem:[%s10507_s17 + $0x480] sm:$0xff] }
 0x7dc   :  { %6887 = vmatpush3.bf16.msra.mxu0 %v6886_v60  ;;  %6919 = vmatpush3.bf16.msra.mxu1 %v6918_v61  ;;  %v8552_v20 = vpop.f32.mrb[22].mxu0  ;;  %v8554_v46 = vpop.f32.mrb[24].mxu1  ;;  %v1905_v60 = vld [vmem:[%s10507_s17 + $0x360] sm:$0xff]  ;;  %v1906_v61 = vld [vmem:[%s10507_s17 + $0x368] sm:$0xff] }
 0x7dd   :  { %v8562_v63 = vpop.f32.mrb[23].mxu0  ;;  %v8564_v59 = vpop.f32.mrb[25].mxu1  ;;  %6889 = vmatprep.subr.bf16.mxu0 %v6888_v4  ;;  %6921 = vmatprep.subr.bf16.mxu1 %v6920_v5  ;;  %v1924_v4 = vld [vmem:[%s10507_s17 + $0x3f8] sm:$0xff]  ;;  %v1082_v5 = vrot.slane %v8380_v16, %v8585_v38  ;;  %v6930_v12 = vpack.c.bf16 %v1906_v61, %v1905_v60  ;;  %v1943_v60 = vld [vmem:[%s10507_s17 + $0x490] sm:$0xff] }
 0x7df   :  { %v1370_v61 = vadd.f32 %v8461_v10, %v1082_v5  ;;  %v1378_v10 = vadd.f32 %v8498_v43, %v8428_v40  ;;  %v1376_v40 = vadd.f32 %v8488_v34, %v1082_v5  ;;  %v1927_v43 = vld [vmem:[%s10507_s17 + $0x410] sm:$0xff]  ;;  %v1960_v5 = vld [vmem:[%s10507_s17 + $0x518] sm:$0xff] }
 0x7e0   :  { %6891 = vmatpush3.bf16.msra.mxu0 %v6890_v21  ;;  %6923 = vmatpush3.bf16.msra.mxu1 %v6922_v22  ;;  %v8587_v39 = vpop.f32.mrb[24].mxu0  ;;  %v8589_v41 = vpop.f32.mrb[26].mxu1  ;;  %v1907_v21 = vld [vmem:[%s10507_s17 + $0x370] sm:$0xff]  ;;  %v1090_v22 = vrot.slane %v8380_v16, %v8598_v50  ;;  %v1942_v16 = vld [vmem:[%s10507_s17 + $0x488] sm:$0xff] }
 0x7e1   :  { %v8600_v51 = vpop.f32.mrb[25].mxu0  ;;  %v8602_v52 = vpop.f32.mrb[27].mxu1  ;;  %6893 = vmatprep.subr.bf16.mxu0 %v6892_v26  ;;  %6925 = vmatprep.subr.bf16.mxu1 %v6924_v27  ;;  %v6900_v26 = vpack.c.bf16 %v1892_v62, %v1891_v13  ;;  %v6932_v27 = vpack.c.bf16 %v1924_v4, %v1923_v0  ;;  %v6934_v48 = vpack.c.bf16 %v1908_v28, %v1907_v21  ;;  %v1944_v0 = vld [vmem:[%s10507_s17 + $0x498] sm:$0xff]  ;;  %v1975_v4 = vld [vmem:[%s10507_s17 + $0x590] sm:$0xff]  ;;  %v1769_v28 = vmax.f32 %v1370_v61, 0.0 }
 0x7e2   :  { %v6936_v49 = vpack.c.bf16 %v1942_v16, %v1941_v29  ;;  %v1447_v13 = vadd.f32 %v8463_v11, %v1090_v22  ;;  %v6968_v62 = vpack.c.bf16 %v1974_v32, %v1973_v30  ;;  %v1455_v11 = vadd.f32 %v8500_v45, %v8447_v2  ;;  %v1928_v45 = vld [vmem:[%s10507_s17 + $0x418] sm:$0xff] }
 0x7e3   :  { %v1453_v2 = vadd.f32 %v8490_v35, %v1090_v22  ;;  %v1786_v16 = vmax.f32 %v1378_v10, 0.0  ;;  %v1959_v35 = vld [vmem:[%s10507_s17 + $0x510] sm:$0xff]  ;;  %v1945_v22 = vld [vmem:[%s10507_s17 + $0x4a0] sm:$0xff]  ;;  %v1948_v10 = vld [vmem:[%s10507_s17 + $0x4b8] sm:$0xff] }
 0x7e4   :  { %6895 = vmatpush3.bf16.msra.mxu0 %v6894_v42  ;;  %6927 = vmatpush3.bf16.msra.mxu1 %v6926_v47  ;;  %v8624_v7 = vpop.f32.mrb[26].mxu0  ;;  %v8626_v8 = vpop.f32.mrb[28].mxu1  ;;  %v1926_v42 = vld [vmem:[%s10507_s17 + $0x408] sm:$0xff]  ;;  %v6902_v47 = vpack.c.bf16 %v1876_v19, %v1875_v58  ;;  %v8699_v58 = vrot.slane %v8661_v33, %v8386_v18  ;;  %v1771_v29 = vmax.f32 %v1447_v13, 0.0  ;;  %v1788_v30 = vmax.f32 %v1455_v11, 0.0  ;;  %v1979_v11 = vld [vmem:[%s10507_s17 + $0x5b0] sm:$0xff] }
 0x7e5   :  { %v8639_v24 = vpop.f32.mrb[27].mxu0  ;;  %v8641_v25 = vpop.f32.mrb[29].mxu1  ;;  %6897 = vmatprep.subr.bf16.mxu0 %v6896_v53  ;;  %6929 = vmatprep.subr.bf16.mxu1 %v6928_v54  ;;  %v1957_v53 = vld [vmem:[%s10507_s17 + $0x500] sm:$0xff]  ;;  %v1958_v54 = vld [vmem:[%s10507_s17 + $0x508] sm:$0xff]  ;;  %v6938_v19 = vpack.c.bf16 %v1926_v42, %v1925_v36  ;;  %v1785_v42 = vmax.f32 %v1376_v40, 0.0 }
 0x7e6   :  { %v6970_v21 = vpack.c.bf16 %v1958_v54, %v1957_v53  ;;  %v1603_v34 = vadd.f32 %v8532_v3, %v8699_v58  ;;  %v1977_v3 = vld [vmem:[%s10507_s17 + $0x5a0] sm:$0xff]  ;;  %v1978_v36 = vld [vmem:[%s10507_s17 + $0x5a8] sm:$0xff] }
 0x7e7   :  { %v1929_v53 = vld [vmem:[%s10507_s17 + $0x420] sm:$0xff]  ;;  %v1930_v54 = vld [vmem:[%s10507_s17 + $0x428] sm:$0xff] }
 0x7e8   :  { %6899 = vmatpush3.bf16.msra.mxu0 %v6898_v9  ;;  %6931 = vmatpush3.bf16.msra.mxu1 %v6930_v12  ;;  %v1976_v9 = vld [vmem:[%s10507_s17 + $0x598] sm:$0xff]  ;;  %v8695_v12 = vrot.slane %v8661_v33, %v8383_v17  ;;  %v1776_v61 = vmax.f32 %v1603_v34, 0.0 }
 0x7e9   :  { %6901 = vmatprep.subr.bf16.mxu0 %v6900_v26  ;;  %6933 = vmatprep.subr.bf16.mxu1 %v6932_v27  ;;  %v6940_v26 = vpack.c.bf16 %v1944_v0, %v1943_v60  ;;  %v6972_v27 = vpack.c.bf16 %v1976_v9, %v1975_v4  ;;  %v1961_v0 = vld [vmem:[%s10507_s17 + $0x520] sm:$0xff]  ;;  %v1962_v4 = vld [vmem:[%s10507_s17 + $0x528] sm:$0xff]  ;;  %v1947_v9 = vld [vmem:[%s10507_s17 + $0x4b0] sm:$0xff] }
 0x7ea   :  { %v1526_v32 = vadd.f32 %v8530_v1, %v8695_v12  ;;  %v1946_v1 = vld [vmem:[%s10507_s17 + $0x4a8] sm:$0xff] }
 0x7eb   :  { %v6944_v13 = vpack.c.bf16 %v1946_v1, %v1945_v22  ;;  %v1934_v22 = vld [vmem:[%s10507_s17 + $0x448] sm:$0xff] }
 0x7ec   :  { %6903 = vmatpush3.bf16.msra.mxu0 %v6902_v47  ;;  %6935 = vmatpush3.bf16.msra.mxu1 %v6934_v48  ;;  %v1787_v47 = vmax.f32 %v1453_v2, 0.0  ;;  %v6942_v48 = vpack.c.bf16 %v1928_v45, %v1927_v43  ;;  %v1774_v60 = vmax.f32 %v1526_v32, 0.0  ;;  %v1963_v2 = vld [vmem:[%s10507_s17 + $0x530] sm:$0xff]  ;;  %v1964_v43 = vld [vmem:[%s10507_s17 + $0x538] sm:$0xff]  ;;  %v1949_v45 = vld [vmem:[%s10507_s17 + $0x4c0] sm:$0xff] }
 0x7ed   :  { %6937 = vmatprep.subr.bf16.mxu0 %v6936_v49  ;;  %6969 = vmatprep.subr.bf16.mxu1 %v6968_v62  ;;  %v6974_v49 = vpack.c.bf16 %v1960_v5, %v1959_v35  ;;  %v6976_v62 = vpack.c.bf16 %v1978_v36, %v1977_v3  ;;  %v1982_v32 = vld [vmem:[%s10507_s17 + $0x5c8] sm:$0xff]  ;;  %v6982_v35 = vpack.c.bf16 %v1964_v43, %v1963_v2  ;;  %v1933_v5 = vld [vmem:[%s10507_s17 + $0x440] sm:$0xff] }
 0x7ee   :  { %v1965_v36 = vld [vmem:[%s10507_s17 + $0x540] sm:$0xff] }
 0x7ef   :  { %2275 = vmatmul.mubr.f32.vlgmr.msra.gmra.mrb[32].mxu0 %v1769_v28  ;;  %2350 = vmatmul.mubr.f32.vlgmr.msra.gmra.mrb[34].mxu1 %v1771_v29  ;;  %v1932_v28 = vld [vmem:[%s10507_s17 + $0x438] sm:$0xff]  ;;  %v6948_v29 = vpack.c.bf16 %v1948_v10, %v1947_v9  ;;  %v1953_v10 = vld [vmem:[%s10507_s17 + $0x4e0] sm:$0xff] }
 0x7f0   :  { %2279 = vmatprep.mubr.f32.mxu0 %v1786_v16  ;;  %2354 = vmatprep.mubr.f32.mxu1 %v1788_v30  ;;  %v1950_v16 = vld [vmem:[%s10507_s17 + $0x4c8] sm:$0xff]  ;;  %v1981_v30 = vld [vmem:[%s10507_s17 + $0x5c0] sm:$0xff]  ;;  %v1968_v9 = vld [vmem:[%s10507_s17 + $0x558] sm:$0xff] }
 0x7f1   :  { %6939 = vmatpush3.bf16.msra.mxu0 %v6938_v19  ;;  %6971 = vmatpush3.bf16.msra.mxu1 %v6970_v21  ;;  %v1980_v19 = vld [vmem:[%s10507_s17 + $0x5b8] sm:$0xff]  ;;  %v6946_v21 = vpack.c.bf16 %v1930_v54, %v1929_v53  ;;  %v6952_v1 = vpack.c.bf16 %v1950_v16, %v1949_v45  ;;  %v6984_v3 = vpack.c.bf16 %v1982_v32, %v1981_v30  ;;  %v1969_v43 = vld [vmem:[%s10507_s17 + $0x560] sm:$0xff]  ;;  %v1970_v45 = vld [vmem:[%s10507_s17 + $0x568] sm:$0xff] }
 0x7f2   :  { %6941 = vmatprep.subr.bf16.mxu0 %v6940_v26  ;;  %6973 = vmatprep.subr.bf16.mxu1 %v6972_v27  ;;  %v6978_v26 = vpack.c.bf16 %v1962_v4, %v1961_v0  ;;  %v1931_v27 = vld [vmem:[%s10507_s17 + $0x430] sm:$0xff]  ;;  %v6980_v40 = vpack.c.bf16 %v1980_v19, %v1979_v11  ;;  %v1984_v53 = vld [vmem:[%s10507_s17 + $0x5d8] sm:$0xff]  ;;  %v6954_v54 = vpack.c.bf16 %v1934_v22, %v1933_v5  ;;  %v1954_v11 = vld [vmem:[%s10507_s17 + $0x4e8] sm:$0xff] }
 0x7f3   :  { %2280 = vmatmul.mubr.f32.gmra.mrb[34].mxu0 %v1785_v42  ;;  %2355 = vmatmul.mubr.f32.gmra.mrb[36].mxu1 %v1787_v47  ;;  %v6950_v34 = vpack.c.bf16 %v1932_v28, %v1931_v27  ;;  %v1966_v42 = vld [vmem:[%s10507_s17 + $0x548] sm:$0xff]  ;;  %v1951_v47 = vld [vmem:[%s10507_s17 + $0x4d0] sm:$0xff]  ;;  %v1985_v19 = vld [vmem:[%s10507_s17 + $0x5e0] sm:$0xff]  ;;  %v6994_v22 = vpack.c.bf16 %v1970_v45, %v1969_v43  ;;  %v8915_v43 = vrot.slane %v8661_v33, %v8424_v37 }
 0x7f4   :  { %2424 = vmatprep.mubr.f32.mxu0 %v1774_v60  ;;  %2499 = vmatprep.mubr.f32.mxu1 %v1776_v61  ;;  %v6986_v60 = vpack.c.bf16 %v1966_v42, %v1965_v36  ;;  %v1935_v61 = vld [vmem:[%s10507_s17 + $0x450] sm:$0xff]  ;;  %v1937_v28 = vld [vmem:[%s10507_s17 + $0x460] sm:$0xff]  ;;  %v1956_v30 = vld [vmem:[%s10507_s17 + $0x4f8] sm:$0xff]  ;;  %v1106_v42 = vrot.slane %v8661_v33, %v8375_v15 }
 0x7f5   :  { %6943 = vmatpush3.bf16.msra.mxu0 %v6942_v48  ;;  %6975 = vmatpush3.bf16.msra.mxu1 %v6974_v49  ;;  %v1952_v48 = vld [vmem:[%s10507_s17 + $0x4d8] sm:$0xff]  ;;  %v1983_v49 = vld [vmem:[%s10507_s17 + $0x5d0] sm:$0xff] }
 0x7f6   :  { %6945 = vmatprep.subr.bf16.mxu0 %v6944_v13  ;;  %6977 = vmatprep.subr.bf16.mxu1 %v6976_v62  ;;  %v1936_v13 = vld [vmem:[%s10507_s17 + $0x458] sm:$0xff]  ;;  %v6956_v62 = vpack.c.bf16 %v1952_v48, %v1951_v47  ;;  %v6988_v0 = vpack.c.bf16 %v1984_v53, %v1983_v49  ;;  %v1967_v4 = vld [vmem:[%s10507_s17 + $0x550] sm:$0xff]  ;;  %v2005_v53 = vld [vmem:[%s10507_s17 + $0x680] sm:$0xff] }
 0x7f7   :  { %v6990_v27 = vpack.c.bf16 %v1968_v9, %v1967_v4  ;;  %v1955_v16 = vld [vmem:[%s10507_s17 + $0x4f0] sm:$0xff]  ;;  %v1972_v49 = vld [vmem:[%s10507_s17 + $0x578] sm:$0xff] }
 0x7f8   :  { %v1987_v32 = vld [vmem:[%s10507_s17 + $0x5f0] sm:$0xff]  ;;  %v6964_v47 = vpack.c.bf16 %v1956_v30, %v1955_v16 }
 0x7f9   :  { %6947 = vmatpush3.bf16.msra.mxu0 %v6946_v21  ;;  %6979 = vmatpush3.bf16.msra.mxu1 %v6978_v26  ;;  %v1986_v21 = vld [vmem:[%s10507_s17 + $0x5e8] sm:$0xff]  ;;  %v6958_v26 = vpack.c.bf16 %v1936_v13, %v1935_v61  ;;  %v1971_v36 = vld [vmem:[%s10507_s17 + $0x570] sm:$0xff]  ;;  %v1989_v13 = vld [vmem:[%s10507_s17 + $0x600] sm:$0xff] }
 0x7fa   :  { %6949 = vmatprep.subr.bf16.mxu0 %v6948_v29  ;;  %6981 = vmatprep.subr.bf16.mxu1 %v6980_v40  ;;  %v1938_v29 = vld [vmem:[%s10507_s17 + $0x468] sm:$0xff]  ;;  %v6960_v40 = vpack.c.bf16 %v1954_v11, %v1953_v10  ;;  %v6992_v2 = vpack.c.bf16 %v1986_v21, %v1985_v19  ;;  %v6998_v4 = vpack.c.bf16 %v1972_v49, %v1971_v36  ;;  %v2021_v10 = vld [vmem:[%s10507_s17 + $0x700] sm:$0xff]  ;;  %v2007_v19 = vld [vmem:[%s10507_s17 + $0x690] sm:$0xff] }
 0x7fb   :  { %v6962_v5 = vpack.c.bf16 %v1938_v29, %v1937_v28  ;;  %v2038_v61 = vld [vmem:[%s10507_s17 + $0x788] sm:$0xff]  ;;  %v2008_v28 = vld [vmem:[%s10507_s17 + $0x698] sm:$0xff]  ;;  %v2039_v29 = vld [vmem:[%s10507_s17 + $0x790] sm:$0xff] }
 0x7fc   :  { %v2022_v11 = vld [vmem:[%s10507_s17 + $0x708] sm:$0xff]  ;;  %v7004_v30 = vpack.c.bf16 %v2008_v28, %v2007_v19  ;;  %v2009_v36 = vld [vmem:[%s10507_s17 + $0x6a0] sm:$0xff]  ;;  %v2043_v19 = vld [vmem:[%s10507_s17 + $0x7b0] sm:$0xff] }
 0x7fd   :  { %6951 = vmatpush3.bf16.msra.mxu0 %v6950_v34  ;;  %6983 = vmatpush3.bf16.msra.mxu1 %v6982_v35  ;;  %v1988_v34 = vld [vmem:[%s10507_s17 + $0x5f8] sm:$0xff]  ;;  %v1098_v35 = vrot.slane %v8661_v33, %v8372_v14  ;;  %v7034_v16 = vpack.c.bf16 %v2022_v11, %v2021_v10  ;;  %v2011_v10 = vld [vmem:[%s10507_s17 + $0x6b0] sm:$0xff] }
 0x7fe   :  { %6953 = vmatprep.subr.bf16.mxu0 %v6952_v1  ;;  %6985 = vmatprep.subr.bf16.mxu1 %v6984_v3  ;;  %v1939_v1 = vld [vmem:[%s10507_s17 + $0x470] sm:$0xff]  ;;  %v1940_v3 = vld [vmem:[%s10507_s17 + $0x478] sm:$0xff]  ;;  %v6996_v48 = vpack.c.bf16 %v1988_v34, %v1987_v32 }
 0x7ff   :  { %v1524_v21 = vadd.f32 %v8520_v56, %v1098_v35  ;;  %v1532_v56 = vadd.f32 %v8562_v63, %v8695_v12  ;;  %v1530_v63 = vadd.f32 %v8552_v20, %v1098_v35  ;;  %v1991_v12 = vld [vmem:[%s10507_s17 + $0x610] sm:$0xff]  ;;  %v1757_v20 = vadd.f32 %v8602_v52, %v8915_v43  ;;  %v2024_v35 = vld [vmem:[%s10507_s17 + $0x718] sm:$0xff]  ;;  %v2041_v52 = vld [vmem:[%s10507_s17 + $0x7a0] sm:$0xff] }
 0x800   :  { %v2012_v11 = vld [vmem:[%s10507_s17 + $0x6b8] sm:$0xff]  ;;  %v1995_v28 = vld [vmem:[%s10507_s17 + $0x630] sm:$0xff] }
 0x801   :  { %6955 = vmatpush3.bf16.msra.mxu0 %v6954_v54  ;;  %6987 = vmatpush3.bf16.msra.mxu1 %v6986_v60  ;;  %v2006_v54 = vld [vmem:[%s10507_s17 + $0x688] sm:$0xff]  ;;  %v2037_v60 = vld [vmem:[%s10507_s17 + $0x780] sm:$0xff]  ;;  %v1773_v34 = vmax.f32 %v1524_v21, 0.0  ;;  %v2044_v21 = vld [vmem:[%s10507_s17 + $0x7b8] sm:$0xff] }
 0x802   :  { %6957 = vmatprep.subr.bf16.mxu0 %v6956_v62  ;;  %6989 = vmatprep.subr.bf16.mxu1 %v6988_v0  ;;  %v1990_v62 = vld [vmem:[%s10507_s17 + $0x608] sm:$0xff]  ;;  %v6966_v0 = vpack.c.bf16 %v1940_v3, %v1939_v1  ;;  %v7000_v9 = vpack.c.bf16 %v2006_v54, %v2005_v53  ;;  %v1993_v54 = vld [vmem:[%s10507_s17 + $0x620] sm:$0xff] }
 0x803   :  { %v7002_v45 = vpack.c.bf16 %v1990_v62, %v1989_v13  ;;  %v1780_v13 = vmax.f32 %v1757_v20, 0.0  ;;  %v2015_v20 = vld [vmem:[%s10507_s17 + $0x6d0] sm:$0xff] }
 0x805   :  { %6959 = vmatpush3.bf16.msra.mxu0 %v6958_v26  ;;  %6991 = vmatpush3.bf16.msra.mxu1 %v6990_v27  ;;  %v1601_v26 = vadd.f32 %v8522_v57, %v1106_v42  ;;  %v7032_v27 = vpack.c.bf16 %v2038_v61, %v2037_v60  ;;  %v1609_v57 = vadd.f32 %v8564_v59, %v8699_v58  ;;  %v1992_v58 = vld [vmem:[%s10507_s17 + $0x618] sm:$0xff]  ;;  %v1994_v60 = vld [vmem:[%s10507_s17 + $0x628] sm:$0xff] }
 0x806   :  { %6961 = vmatprep.subr.bf16.mxu0 %v6960_v40  ;;  %6993 = vmatprep.subr.bf16.mxu1 %v6992_v2  ;;  %v2040_v40 = vld [vmem:[%s10507_s17 + $0x798] sm:$0xff]  ;;  %v8911_v2 = vrot.slane %v8661_v33, %v8403_v23  ;;  %v1607_v59 = vadd.f32 %v8554_v46, %v1106_v42  ;;  %v2023_v46 = vld [vmem:[%s10507_s17 + $0x710] sm:$0xff]  ;;  %v2042_v42 = vld [vmem:[%s10507_s17 + $0x7a8] sm:$0xff]  ;;  %v7006_v49 = vpack.c.bf16 %v1992_v58, %v1991_v12 }
 0x807   :  { %v7036_v32 = vpack.c.bf16 %v2040_v40, %v2039_v29  ;;  %v1792_v1 = vmax.f32 %v1609_v57, 0.0  ;;  %v7038_v53 = vpack.c.bf16 %v2024_v35, %v2023_v46  ;;  %v1996_v29 = vld [vmem:[%s10507_s17 + $0x638] sm:$0xff]  ;;  %v7012_v40 = vpack.c.bf16 %v2012_v11, %v2011_v10  ;;  %v2027_v57 = vld [vmem:[%s10507_s17 + $0x730] sm:$0xff]  ;;  %v1998_v12 = vld [vmem:[%s10507_s17 + $0x648] sm:$0xff] }
 0x808   :  { %v1680_v3 = vadd.f32 %v8600_v51, %v8911_v2  ;;  %v2010_v51 = vld [vmem:[%s10507_s17 + $0x6a8] sm:$0xff]  ;;  %v2016_v46 = vld [vmem:[%s10507_s17 + $0x6d8] sm:$0xff]  ;;  %v2047_v35 = vld [vmem:[%s10507_s17 + $0x7d0] sm:$0xff] }
 0x809   :  { %6963 = vmatpush3.bf16.msra.mxu0 %v6962_v5  ;;  %6995 = vmatpush3.bf16.msra.mxu1 %v6994_v22  ;;  %v1775_v5 = vmax.f32 %v1601_v26, 0.0  ;;  %v1790_v22 = vmax.f32 %v1532_v56, 0.0  ;;  %v7008_v62 = vpack.c.bf16 %v2010_v51, %v2009_v36  ;;  %v7010_v26 = vpack.c.bf16 %v1994_v60, %v1993_v54  ;;  %v2048_v36 = vld [vmem:[%s10507_s17 + $0x7d8] sm:$0xff]  ;;  %v2017_v60 = vld [vmem:[%s10507_s17 + $0x6e0] sm:$0xff]  ;;  %v2002_v10 = vld [vmem:[%s10507_s17 + $0x668] sm:$0xff] }
 0x80a   :  { %6965 = vmatprep.subr.bf16.mxu0 %v6964_v47  ;;  %6997 = vmatprep.subr.bf16.mxu1 %v6996_v48  ;;  %v1789_v47 = vmax.f32 %v1530_v63, 0.0  ;;  %v1791_v48 = vmax.f32 %v1607_v59, 0.0  ;;  %v1778_v61 = vmax.f32 %v1680_v3, 0.0  ;;  %v7044_v56 = vpack.c.bf16 %v2044_v21, %v2043_v19  ;;  %v1997_v59 = vld [vmem:[%s10507_s17 + $0x640] sm:$0xff]  ;;  %v2030_v3 = vld [vmem:[%s10507_s17 + $0x748] sm:$0xff]  ;;  %v2032_v54 = vld [vmem:[%s10507_s17 + $0x758] sm:$0xff] }
 0x80b   :  { %v7018_v51 = vpack.c.bf16 %v1998_v12, %v1997_v59  ;;  %v2033_v21 = vld [vmem:[%s10507_s17 + $0x760] sm:$0xff]  ;;  %v2036_v59 = vld [vmem:[%s10507_s17 + $0x778] sm:$0xff] }
 0x80d   :  { %6967 = vmatpush3.bf16.msra.mxu0 %v6966_v0  ;;  %6999 = vmatpush3.bf16.msra.mxu1 %v6998_v4  ;;  %v7040_v0 = vpack.c.bf16 %v2042_v42, %v2041_v52  ;;  %v2025_v4 = vld [vmem:[%s10507_s17 + $0x720] sm:$0xff]  ;;  %v1999_v42 = vld [vmem:[%s10507_s17 + $0x650] sm:$0xff] }
 0x80e   :  { %7001 = vmatprep.subr.bf16.mxu0 %v7000_v9  ;;  %7033 = vmatprep.subr.bf16.mxu1 %v7032_v27  ;;  %v2026_v9 = vld [vmem:[%s10507_s17 + $0x728] sm:$0xff] }
 0x80f   :  { %v7042_v27 = vpack.c.bf16 %v2026_v9, %v2025_v4  ;;  %v2001_v9 = vld [vmem:[%s10507_s17 + $0x660] sm:$0xff] }
 0x810   :  { %2425 = vmatmul.mubr.f32.vlgmr.msra.gmra.mrb[36].mxu0 %v1773_v34  ;;  %2500 = vmatmul.mubr.f32.vlgmr.msra.gmra.mrb[38].mxu1 %v1775_v5  ;;  %v2046_v34 = vld [vmem:[%s10507_s17 + $0x7c8] sm:$0xff]  ;;  %v7014_v5 = vpack.c.bf16 %v1996_v29, %v1995_v28  ;;  %v2020_v28 = vld [vmem:[%s10507_s17 + $0x6f8] sm:$0xff]  ;;  %v2051_v29 = vld [vmem:[%s10507_s17 + $0x7f0] sm:$0xff] }
 0x811   :  { %2429 = vmatprep.mubr.f32.mxu0 %v1790_v22  ;;  %2504 = vmatprep.mubr.f32.mxu1 %v1792_v1  ;;  %v2029_v1 = vld [vmem:[%s10507_s17 + $0x740] sm:$0xff] }
 0x812   :  { %7003 = vmatpush3.bf16.msra.mxu0 %v7002_v45  ;;  %7035 = vmatpush3.bf16.msra.mxu1 %v7034_v16  ;;  %v2028_v45 = vld [vmem:[%s10507_s17 + $0x738] sm:$0xff]  ;;  %v2013_v16 = vld [vmem:[%s10507_s17 + $0x6c0] sm:$0xff]  ;;  %v7050_v52 = vpack.c.bf16 %v2030_v3, %v2029_v1  ;;  %v1686_v1 = vadd.f32 %v8639_v24, %v8911_v2  ;;  %v1763_v3 = vadd.f32 %v8641_v25, %v8915_v43 }
 0x813   :  { %7005 = vmatprep.subr.bf16.mxu0 %v7004_v30  ;;  %7037 = vmatprep.subr.bf16.mxu1 %v7036_v32  ;;  %v2014_v30 = vld [vmem:[%s10507_s17 + $0x6c8] sm:$0xff]  ;;  %v2045_v32 = vld [vmem:[%s10507_s17 + $0x7c0] sm:$0xff]  ;;  %v7046_v63 = vpack.c.bf16 %v2028_v45, %v2027_v57  ;;  %v7026_v57 = vpack.c.bf16 %v2002_v10, %v2001_v9 }
 0x814   :  { %2430 = vmatmul.mubr.f32.gmra.mrb[38].mxu0 %v1789_v47  ;;  %2505 = vmatmul.mubr.f32.gmra.mrb[40].mxu1 %v1791_v48  ;;  %v7016_v58 = vpack.c.bf16 %v2014_v30, %v2013_v16  ;;  %v7048_v22 = vpack.c.bf16 %v2046_v34, %v2045_v32  ;;  %v2000_v47 = vld [vmem:[%s10507_s17 + $0x658] sm:$0xff]  ;;  %v7020_v48 = vpack.c.bf16 %v2016_v46, %v2015_v20  ;;  %v2003_v16 = vld [vmem:[%s10507_s17 + $0x670] sm:$0xff]  ;;  %v5390_v2 = vld [vmem:[%s10508_s18] ss:$0 sm:$0xff] }
 0x815   :  { %2574 = vmatprep.mubr.f32.mxu0 %v1778_v61  ;;  %2649 = vmatprep.mubr.f32.mxu1 %v1780_v13  ;;  %v2018_v61 = vld [vmem:[%s10507_s17 + $0x6e8] sm:$0xff]  ;;  %v2049_v13 = vld [vmem:[%s10507_s17 + $0x7e0] sm:$0xff]  ;;  %v1122_v30 = vrot.slane %v8661_v33, %v8598_v50 }
 0x816   :  { %7007 = vmatpush3.bf16.msra.mxu0 %v7006_v49  ;;  %7039 = vmatpush3.bf16.msra.mxu1 %v7038_v53  ;;  %v7052_v49 = vpack.c.bf16 %v2048_v36, %v2047_v35  ;;  %v2031_v53 = vld [vmem:[%s10507_s17 + $0x750] sm:$0xff]  ;;  %v7024_v11 = vpack.c.bf16 %v2018_v61, %v2017_v60 }
 0x817   :  { %7009 = vmatprep.subr.bf16.mxu0 %v7008_v62  ;;  %7041 = vmatprep.subr.bf16.mxu1 %v7040_v0  ;;  %v2050_v62 = vld [vmem:[%s10507_s17 + $0x7e8] sm:$0xff]  ;;  %v7022_v0 = vpack.c.bf16 %v2000_v47, %v1999_v42  ;;  %v7054_v4 = vpack.c.bf16 %v2032_v54, %v2031_v53  ;;  %v1761_v36 = vadd.f32 %v8626_v8, %v1122_v30 }
 0x818   :  { %v7056_v19 = vpack.c.bf16 %v2050_v62, %v2049_v13 }
 0x81a   :  { %7011 = vmatpush3.bf16.msra.mxu0 %v7010_v26  ;;  %7043 = vmatpush3.bf16.msra.mxu1 %v7042_v27  ;;  %v2034_v26 = vld [vmem:[%s10507_s17 + $0x768] sm:$0xff]  ;;  %v2019_v27 = vld [vmem:[%s10507_s17 + $0x6f0] sm:$0xff] }
 0x81b   :  { %7013 = vmatprep.subr.bf16.mxu0 %v7012_v40  ;;  %7045 = vmatprep.subr.bf16.mxu1 %v7044_v56  ;;  %v2052_v40 = vld [vmem:[%s10507_s17 + $0x7f8] sm:$0xff]  ;;  %v1114_v56 = vrot.slane %v8661_v33, %v8585_v38  ;;  %v7058_v45 = vpack.c.bf16 %v2034_v26, %v2033_v21  ;;  %v7028_v32 = vpack.c.bf16 %v2020_v28, %v2019_v27 }
 0x81c   :  { %v7060_v34 = vpack.c.bf16 %v2052_v40, %v2051_v29 }
 0x81d   :  { %v1684_v35 = vadd.f32 %v8624_v7, %v1114_v56 }
 0x81e   :  { %7015 = vmatpush3.bf16.msra.mxu0 %v7014_v5  ;;  %7047 = vmatpush3.bf16.msra.mxu1 %v7046_v63  ;;  %v2004_v5 = vld [vmem:[%s10507_s17 + $0x678] sm:$0xff]  ;;  %v2035_v63 = vld [vmem:[%s10507_s17 + $0x770] sm:$0xff] }
 0x81f   :  { %7017 = vmatprep.subr.bf16.mxu0 %v7016_v58  ;;  %7049 = vmatprep.subr.bf16.mxu1 %v7048_v22  ;;  %v7030_v12 = vpack.c.bf16 %v2004_v5, %v2003_v16  ;;  %v7062_v33 = vpack.c.bf16 %v2036_v59, %v2035_v63  ;;  %v1678_v58 = vadd.f32 %v8587_v39, %v1114_v56  ;;  %v1796_v39 = vmax.f32 %v1763_v3, 0.0 }
 0x820   :  { %v1755_v22 = vadd.f32 %v8589_v41, %v1122_v30  ;;  %v1793_v41 = vmax.f32 %v1684_v35, 0.0 }
 0x821   :  { %v1777_v20 = vmax.f32 %v1678_v58, 0.0 }
 0x822   :  { %7019 = vmatpush3.bf16.msra.mxu0 %v7018_v51  ;;  %7051 = vmatpush3.bf16.msra.mxu1 %v7050_v52  ;;  %v1779_v46 = vmax.f32 %v1755_v22, 0.0  ;;  %v1794_v51 = vmax.f32 %v1686_v1, 0.0  ;;  %v1795_v52 = vmax.f32 %v1761_v36, 0.0 }
 0x823   :  { %7021 = vmatprep.subr.bf16.mxu0 %v7020_v48  ;;  %7053 = vmatprep.subr.bf16.mxu1 %v7052_v49 }
 0x826   :  { %7023 = vmatpush3.bf16.msra.mxu0 %v7022_v0  ;;  %7055 = vmatpush3.bf16.msra.mxu1 %v7054_v4 }
 0x827   :  { %7025 = vmatprep.subr.bf16.mxu0 %v7024_v11  ;;  %7057 = vmatprep.subr.bf16.mxu1 %v7056_v19 }
 0x82a   :  { %7027 = vmatpush3.bf16.msra.mxu0 %v7026_v57  ;;  %7059 = vmatpush3.bf16.msra.mxu1 %v7058_v45 }
 0x82b   :  { %7029 = vmatprep.subr.bf16.mxu0 %v7028_v32  ;;  %7061 = vmatprep.subr.bf16.mxu1 %v7060_v34 }
 0x82e   :  { %7031 = vmatpush3.bf16.msra.mxu0 %v7030_v12  ;;  %7063 = vmatpush3.bf16.msra.mxu1 %v7062_v33 }
 0x831   :  { %2575 = vmatmul.mubr.f32.vlgmr.msra.gmra.mrb[40].mxu0 %v1777_v20  ;;  %2650 = vmatmul.mubr.f32.vlgmr.msra.gmra.mrb[42].mxu1 %v1779_v46 }
 0x832   :  { %2579 = vmatprep.mubr.f32.mxu0 %v1794_v51  ;;  %2654 = vmatprep.mubr.f32.mxu1 %v1796_v39 }
 0x835   :  { %2580 = vmatmul.mubr.f32.gmra.mrb[42].mxu0 %v1793_v41  ;;  %2655 = vmatmul.mubr.f32.gmra.mrb[44].mxu1 %v1795_v52 }
 0x8a2   :  { %v5879_v24 = vpop.f32.mrb[28].mxu0  ;;  %v5917_v25 = vpop.f32.mrb[30].mxu1 }
 0x8a3   :  { %v5880_v43 = vpop.f32.mrb[29].mxu0  ;;  %v5918_v7 = vpop.f32.mrb[31].mxu1 }
 0x8a4   :  { %v5881_v42 = vadd.f32 %v5880_v43, %v5879_v24  ;;  %v5919_v8 = vadd.f32 %v5918_v7, %v5917_v25 }
 0x8a6   :  { %v2127_v47 = vadd.f32 %v5881_v42, %v5390_v2  ;;  %v5882_v48 = vpop.f32.mrb[30].mxu0  ;;  %v5920_v49 = vpop.f32.mrb[32].mxu1 }
 0x8a7   :  { %v5883_v53 = vpop.f32.mrb[31].mxu0  ;;  %v5921_v54 = vpop.f32.mrb[33].mxu1 }
 0x8a8   :  { %v2202_v60 = vadd.f32 %v5919_v8, %v2127_v47  ;;  %v5884_v61 = vadd.f32 %v5883_v53, %v5882_v48  ;;  %v5922_v13 = vadd.f32 %v5921_v54, %v5920_v49 }
 0x8aa   :  { %v2132_v62 = vadd.f32 %v5884_v61, %v5390_v2 }
 0x8ac   :  { %v2207_v0 = vadd.f32 %v5922_v13, %v2132_v62 }
 0x8c2   :  { %v5955_v4 = vpop.f32.mrb[32].mxu0  ;;  %v5993_v9 = vpop.f32.mrb[34].mxu1 }
 0x8c3   :  { %v5956_v10 = vpop.f32.mrb[33].mxu0  ;;  %v5994_v11 = vpop.f32.mrb[35].mxu1 }
 0x8c4   :  { %v5957_v19 = vadd.f32 %v5956_v10, %v5955_v4  ;;  %v5995_v21 = vadd.f32 %v5994_v11, %v5993_v9 }
 0x8c6   :  { %v2277_v26 = vadd.f32 %v5957_v19, %v2202_v60  ;;  %v5958_v27 = vpop.f32.mrb[34].mxu0  ;;  %v5996_v28 = vpop.f32.mrb[36].mxu1 }
 0x8c7   :  { %v5959_v29 = vpop.f32.mrb[35].mxu0  ;;  %v5997_v40 = vpop.f32.mrb[37].mxu1 }
 0x8c8   :  { %v2352_v56 = vadd.f32 %v5995_v21, %v2277_v26  ;;  %v5960_v57 = vadd.f32 %v5959_v29, %v5958_v27  ;;  %v5998_v45 = vadd.f32 %v5997_v40, %v5996_v28  ;;  %v5394_v29 = vld [vmem:[%s10534_s5 + $0x28] sm:$0xff] }
 0x8ca   :  { %v2282_v16 = vadd.f32 %v5960_v57, %v2207_v0  ;;  %v5402_v57 = vld [vmem:[%s10536_s30 + $0x28] sm:$0xff] }
 0x8cc   :  { %v2357_v30 = vadd.f32 %v5998_v45, %v2282_v16  ;;  %v5395_v16 = vld [vmem:[%s10534_s5 + $0x30] sm:$0xff] }
 0x8e3   :  { %v6031_v32 = vpop.f32.mrb[36].mxu0  ;;  %v6069_v34 = vpop.f32.mrb[38].mxu1 }
 0x8e4   :  { %v6032_v5 = vpop.f32.mrb[37].mxu0  ;;  %v6070_v63 = vpop.f32.mrb[39].mxu1 }
 0x8e5   :  { %v6033_v59 = vadd.f32 %v6032_v5, %v6031_v32  ;;  %v6071_v12 = vadd.f32 %v6070_v63, %v6069_v34  ;;  %v5403_v34 = vld [vmem:[%s10536_s30 + $0x30] sm:$0xff]  ;;  %v5404_v5 = vld [vmem:[%s10536_s30 + $0x38] sm:$0xff] }
 0x8e6   :  { %v7076_v63 = vpack.c.bf16 %v5404_v5, %v5403_v34 }
 0x8e7   :  { %v2427_v33 = vadd.f32 %v6033_v59, %v2352_v56  ;;  %v6034_v58 = vpop.f32.mrb[38].mxu0  ;;  %v6072_v22 = vpop.f32.mrb[40].mxu1  ;;  %v5401_v56 = vld [vmem:[%s10536_s30 + $0x20] sm:$0xff] }
 0x8e8   :  { %v6035_v1 = vpop.f32.mrb[39].mxu0  ;;  %v6073_v3 = vpop.f32.mrb[41].mxu1  ;;  %v7072_v45 = vpack.c.bf16 %v5402_v57, %v5401_v56  ;;  %v5409_v59 = vld [vmem:[%s10535_s3 + $0x20] sm:$0xff] }
 0x8e9   :  { %v2502_v20 = vadd.f32 %v6071_v12, %v2427_v33  ;;  %v6036_v46 = vadd.f32 %v6035_v1, %v6034_v58  ;;  %v6074_v35 = vadd.f32 %v6073_v3, %v6072_v22  ;;  %v5410_v12 = vld [vmem:[%s10535_s3 + $0x28] sm:$0xff]  ;;  %v9195_v57 = vld [vmem:[%s10538_s26 + $0x3] ss:$0 sm:$0xff] }
 0x8ea   :  { %7073 = vmatprep.subr.bf16.mxu1 %v7072_v45  ;;  %v7080_v33 = vpack.c.bf16 %v5410_v12, %v5409_v59 }
 0x8eb   :  { %v2432_v36 = vadd.f32 %v6036_v46, %v2357_v30  ;;  %v5396_v30 = vld [vmem:[%s10534_s5 + $0x38] sm:$0xff]  ;;  %7075 = vmatpush3.bf16.msra.mxu1 %v7072_v45 }
 0x8ec   :  { %v7068_v32 = vpack.c.bf16 %v5396_v30, %v5395_v16  ;;  %7077 = vmatprep.subr.bf16.mxu1 %v7076_v63 }
 0x8ed   :  { %v2507_v51 = vadd.f32 %v6074_v35, %v2432_v36  ;;  %v5391_v36 = vld [vmem:[%s10509_s19] ss:$0 sm:$0xff] }
 0x8ef   :  { %7079 = vmatpush3.bf16.msra.mxu1 %v7076_v63  ;;  %v7520_v63 = vld [vmem:[%s10541_s24 + $0x8] sm:$0xff] }
 0x904   :  { %v6107_v39 = vpop.f32.mrb[40].mxu0  ;;  %v6145_v41 = vpop.f32.mrb[42].mxu1 }
 0x905   :  { %v6108_v52 = vpop.f32.mrb[41].mxu0  ;;  %v6146_v24 = vpop.f32.mrb[43].mxu1 }
 0x906   :  { %v6109_v25 = vadd.f32 %v6108_v52, %v6107_v39  ;;  %v6147_v2 = vadd.f32 %v6146_v24, %v6145_v41  ;;  %v5392_v39 = vld [vmem:[%s10510_s20] ss:$0 sm:$0xff] }
 0x908   :  { %v2577_v43 = vadd.f32 %v6109_v25, %v2502_v20  ;;  %v6110_v7 = vpop.f32.mrb[42].mxu0  ;;  %v6148_v42 = vpop.f32.mrb[44].mxu1 }
 0x909   :  { %v6111_v8 = vpop.f32.mrb[43].mxu0  ;;  %v6149_v47 = vpop.f32.mrb[45].mxu1 }
 0x90a   :  { %v2652_v48 = vadd.f32 %v6147_v2, %v2577_v43  ;;  %v6112_v49 = vadd.f32 %v6111_v8, %v6110_v7  ;;  %v6150_v53 = vadd.f32 %v6149_v47, %v6148_v42  ;;  %v5411_v2 = vld [vmem:[%s10535_s3 + $0x30] sm:$0xff]  ;;  %v5412_v43 = vld [vmem:[%s10535_s3 + $0x38] sm:$0xff]  ;;  %v5406_v47 = vld [vmem:[%s10499_s9 + $0x1] ss:$0 sm:$0xff]  ;;  %s10542_s9 = sld [smem:[#allocation13_spill]] }
 0x90b   :  { %v7084_v8 = vpack.c.bf16 %v5412_v43, %v5411_v2 }
 0x90c   :  { %v2582_v54 = vadd.f32 %v6112_v49, %v2507_v51  ;;  %v2660_v60 = vadd.f32 %v2652_v48, %v8010_v31  ;;  %v5398_v48 = vld [vmem:[%s10498_s8 + $0x1] ss:$0 sm:$0xff] }
 0x90e   :  { %v2657_v61 = vadd.f32 %v6150_v53, %v2582_v54  ;;  %v2662_v13 = vsel %vm193_vm1, %v2660_v60, 0.0 }
 0x90f   :  { %2663 = vadd.xlane.f32.xlu0 %v2662_v13 }
 0x910   :  { %v2661_v62 = vadd.f32 %v2657_v61, %v8040_v44  ;;  %v5393_v44 = vld [vmem:[%s10534_s5 + $0x20] sm:$0xff]  ;;  %s7555_s5 = smov [#allocation2]  }
 0x911   :  { %v7064_v40 = vpack.c.bf16 %v5394_v29, %v5393_v44  ;;  %s5328_s8 = sshll.u32 %s7555_s5, 4  ;;  %s5329_s8 = int_to_ptr.vmem [resolvable:$true] %s5328_s8 }
 0x912   :  { %v2665_v0 = vsel %vm193_vm1, %v2661_v62, 0.0  ;;  %s7528_s30 = scalar_lea.vmem %s5329_s8, 32  ;;  %p7533_p1 = scmp.lt.s32.totalorder %s5329_s8, %s5329_s8 }
 0x913   :  { %2666 = vadd.xlane.f32.xlu1 %v2665_v0  ;;  %7065 = vmatprep.subr.bf16.mxu0 %v7064_v40  ;;  %p7529_p0 = scmp.ne.s32.totalorder %s5329_s8, %s7528_s30  ;;  %p7534_p2 = scmp.lt.s32.totalorder %s7528_s30, %s7528_s30 }
 0x914   :  { %7067 = vmatpush3.bf16.msra.mxu0 %v7064_v40 }
 0x915   :  { %7069 = vmatprep.subr.bf16.mxu0 %v7068_v32  ;;  %p7535_p3 = por %p7534_p2, %p7533_p1 }
 0x917   :  { %p7536_p4 = pnand %p7535_p3, %p7529_p0 }
 0x918   :  { %7071 = vmatpush3.bf16.msra.mxu0 %v7068_v32 }
 0x919   :  { %7081 = vmatprep.subr.bf16.mxu0 %v7080_v33 }
 0x99c   :  { %v2664_v4 = vpop.xlane.xlu0 %2663 }
 0x99d   :  { %v2668_v9 = vmul.f32 0.03125, %v2664_v4 }
 0x99f   :  { %v2670_v10 = vsub.f32 %v2660_v60, %v2668_v9  ;;  %v5414_v9 = vld [vmem:[%s10500_s10 + $0x1] ss:$0 sm:$0xff] }
 0x9a0   :  { %v2667_v11 = vpop.xlane.xlu1 %2666 }
 0x9a1   :  { %v2669_v19 = vmul.f32 0.03125, %v2667_v11  ;;  %v2672_v21 = vmul.f32 %v2670_v10, %v2670_v10 }
 0x9a3   :  { %v2671_v26 = vsub.f32 %v2661_v62, %v2669_v19  ;;  %v2674_v27 = vsel %vm193_vm1, %v2672_v21, 0.0 }
 0x9a4   :  { %2675 = vadd.xlane.f32.xlu0 %v2674_v27 }
 0x9a5   :  { %v2673_v31 = vmul.f32 %v2671_v26, %v2671_v26 }
 0x9a7   :  { %v2677_v28 = vsel %vm193_vm1, %v2673_v31, 0.0 }
 0x9a8   :  { %2678 = vadd.xlane.f32.xlu1 %v2677_v28  ;;  %v9181_v28 = vld [vmem:[%s10538_s26 + $0x1] ss:$0 sm:$0xff] }
 0xa31   :  { %v2676_v58 = vpop.xlane.xlu0 %2675 }
 0xa32   :  { %v2680_v22 = vmul.f32 0.03125, %v2676_v58 }
 0xa34   :  { %v2682_v1 = vadd.f32 1e-05, %v2680_v22 }
 0xa35   :  { %v2679_v3 = vpop.xlane.xlu1 %2678 }
 0xa36   :  { %7472 = vrsqrt.f32 %v2682_v1  ;;  %v2681_v20 = vmul.f32 0.03125, %v2679_v3 }
 0xa38   :  { %v2683_v46 = vadd.f32 1e-05, %v2681_v20  ;;  %v7522_v20 = vld [vmem:[%s10541_s24 + $0x18] sm:$0xff] }
 0xa3a   :  { %7474 = vrsqrt.f32 %v2683_v46 }
 0xa40   :  { %v7473_v35 = vpop.eup %7472 }
 0xa41   :  { %v2686_v51 = vmul.f32 %v7473_v35, %v2670_v10  ;;  %v9172_v10 = vld [vmem:[%s10538_s26] ss:$0 sm:$0xff] }
 0xa43   :  { %v2695_v41 = vmul.f32 %v5391_v36, %v2686_v51 }
 0xa44   :  { %v7475_v52 = vpop.eup %7474 }
 0xa45   :  { %v2687_v24 = vmul.f32 %v7475_v52, %v2671_v26  ;;  %v9136_v25 = vadd.f32 %v5392_v39, %v2695_v41 }
 0xa47   :  { %v2696_v7 = vmul.f32 %v5391_v36, %v2687_v24  ;;  %6607 = vmatprep.mubr.msk.f32.mxu0 %vm193_vm1, %v9136_v25  ;;  %6618 = vmatprep.mubr.msk.f32.mxu1 %vm193_vm1, %v9136_v25  ;;  %v7523_v36 = vld [vmem:[%s10541_s24 + $0x10] sm:$0xff]  ;;  %v7524_v24 = vld [vmem:[%s10541_s24 + $0x28] sm:$0xff] }
 0xa49   :  { %v9148_v42 = vadd.f32 %v5392_v39, %v2696_v7  ;;  %v7525_v7 = vld [vmem:[%s10541_s24 + $0x20] sm:$0xff] }
 0xa4b   :  { %6608 = vmatmul.mubr.msk.f32.vlgmr.msra.gmra.mrb[44].mxu0 %vm193_vm1, %v9148_v42  ;;  %6619 = vmatmul.mubr.msk.f32.vlgmr.msra.gmra.mrb[46].mxu1 %vm193_vm1, %v9148_v42 }
 0xa4c   :  { %7083 = vmatpush3.bf16.msra.mxu0 %v7080_v33  ;;  %6629 = vmatprep.mubr.msk.f32.mxu0 %vm193_vm1, %v9136_v25  ;;  %v7521_v33 = vld [vmem:[%s10541_s24] sm:$0xff] }
 0xa4d   :  { %7085 = vmatprep.subr.bf16.mxu0 %v7084_v8 }
 0xa50   :  { %7087 = vmatpush3.bf16.msra.mxu0 %v7084_v8 }
 0xa53   :  { %6630 = vmatmul.mubr.msk.f32.vlgmr.msra.gmra.mrb[46].mxu0 %vm193_vm1, %v9148_v42 }
 0xb1e   :  { %v6609_v49 = vpop.f32.mrb[44].mxu0  ;;  %v6620_v53 = vpop.f32.mrb[46].mxu1 }
 0xb1f   :  { %v2885_v54 = vadd.f32 %v6620_v53, %v5406_v47  ;;  %v2791_v60 = vpop.f32.mrb[45].mxu0  ;;  %v2879_v61 = vpop.f32.mrb[47].mxu1  ;;  %v2797_v21 = vadd.f32 %v6609_v49, %v5398_v48  ;;  %v7526_v53 = vld [vmem:[%s10541_s24 + $0x38] sm:$0xff] }
 0xb20   :  { %v2792_v13 = vadd.f32 %v5398_v48, %v2791_v60  ;;  %v2880_v62 = vadd.f32 %v5406_v47, %v2879_v61  ;;  %v7527_v61 = vld [vmem:[%s10541_s24 + $0x30] sm:$0xff] }
 0xb21   :  { %v2977_v40 = vmul.f32 0.35355338, %v2797_v21 }
 0xb22   :  { %v2976_v0 = vmul.f32 0.35355338, %v2792_v13  ;;  %v7088_v4 = vpack.c.bf16 %v2885_v54, %v2880_v62 }
 0xb23   :  { %v2982_v16 = vmul.f32 %v9172_v10, %v2977_v40  ;;  %v2983_v30 = vmul.f32 %v9181_v28, %v2977_v40  ;;  %v2984_v32 = vmul.f32 %v9187_v55, %v2977_v40  ;;  %v2985_v34 = vmul.f32 %v9195_v57, %v2977_v40 }
 0xb24   :  { %7090 = vmatprep.subr.msk.bf16.mxu1 %vm7781_vm2, %v7088_v4  ;;  %v2978_v11 = vmul.f32 %v9172_v10, %v2976_v0  ;;  %v2979_v44 = vmul.f32 %v9181_v28, %v2976_v0  ;;  %v2980_v56 = vmul.f32 %v9187_v55, %v2976_v0  ;;  %v2981_v45 = vmul.f32 %v9195_v57, %v2976_v0 }
 0xb25   :  { %7093 = vmatpush3.bf16.xpose.msk.msra.mxu1 %vm7781_vm2, %v7088_v4 }
 0xb26   :  { %v6631_v19 = vpop.f32.mrb[46].mxu0  ;;  %6636 = vmatprep.mubr.msk.f32.mxu1 %vm193_vm1, %v2978_v11 }
 0xb27   :  { %v2973_v26 = vadd.f32 %v6631_v19, %v5414_v9  ;;  %v2967_v27 = vpop.f32.mrb[47].mxu0 }
 0xb28   :  { %v2968_v31 = vadd.f32 %v5414_v9, %v2967_v27 }
 0xb2a   :  { %v7094_v29 = vpack.c.bf16 %v2973_v26, %v2968_v31 }
 0xb2c   :  { %7095 = vmatprep.subr.bf16.mxu0 %v7094_v29  ;;  %6637 = vmatmul.mubr.msk.f32.vlgmr.msra.gmra.mrb[48].mxu1 %vm193_vm1, %v2979_v44 }
 0xb2d   :  { %7097 = vmatpush3.bf16.msra.mxu0 %v7094_v29  ;;  %6639 = vmatprep.mubr.msk.f32.mxu1 %vm193_vm1, %v2980_v56 }
 0xb30   :  { %6640 = vmatmul.mubr.msk.f32.gmra.mrb[50].mxu1 %vm193_vm1, %v2981_v45 }
 0xb31   :  { %6642 = vmatprep.mubr.msk.f32.mxu1 %vm193_vm1, %v2982_v16 }
 0xb34   :  { %6643 = vmatmul.mubr.msk.f32.gmra.mrb[52].mxu1 %vm193_vm1, %v2983_v30 }
 0xb35   :  { %6645 = vmatprep.mubr.msk.f32.mxu1 %vm193_vm1, %v2984_v32 }
 0xb38   :  { %6646 = vmatmul.mubr.msk.f32.gmra.mrb[54].mxu1 %vm193_vm1, %v2985_v34 }
 0xb39   :  { %3722 = vmatprep.mubr.f32.mxu1 %v7552_v6 }
 0xbff   :  { %v6638_v5 = vpop.f32.mrb[48].mxu1 }
 0xc00   :  { %v3088_v59 = vadd.f32 %v7520_v63, %v6638_v5  ;;  %v3082_v12 = vpop.f32.mrb[49].mxu1 }
 0xc01   :  { %v3083_v58 = vadd.f32 %v7521_v33, %v3082_v12 }
 0xc02   :  { %v3124_v22 = vsel %vm616_vm3, %v3088_v59, -inf }
 0xc03   :  { %3125 = vmax.xlane.f32.xlu1 %v3124_v22  ;;  %v6641_v1 = vpop.f32.mrb[50].mxu1  ;;  %v3121_v3 = vsel %vm616_vm3, %v3083_v58, -inf }
 0xc04   :  { %v3098_v46 = vadd.f32 %v7522_v20, %v6641_v1  ;;  %v3092_v35 = vpop.f32.mrb[51].mxu1  ;;  %3122 = vmax.xlane.f32.xlu0 %v3121_v3 }
 0xc05   :  { %v3093_v51 = vadd.f32 %v7523_v36, %v3092_v35 }
 0xc06   :  { %v3130_v39 = vsel %vm616_vm3, %v3098_v46, -inf }
 0xc07   :  { %3131 = vmax.xlane.f32.xlu1 %v3130_v39  ;;  %v6644_v41 = vpop.f32.mrb[52].mxu1  ;;  %v3127_v52 = vsel %vm616_vm3, %v3093_v51, -inf }
 0xc08   :  { %v3108_v2 = vadd.f32 %v7524_v24, %v6644_v41  ;;  %v3102_v43 = vpop.f32.mrb[53].mxu1  ;;  %3128 = vmax.xlane.f32.xlu0 %v3127_v52 }
 0xc09   :  { %v3103_v8 = vadd.f32 %v7525_v7, %v3102_v43 }
 0xc0a   :  { %v3136_v47 = vsel %vm616_vm3, %v3108_v2, -inf }
 0xc0b   :  { %3137 = vmax.xlane.f32.xlu1 %v3136_v47  ;;  %v6647_v48 = vpop.f32.mrb[54].mxu1  ;;  %v3133_v49 = vsel %vm616_vm3, %v3103_v8, -inf }
 0xc0c   :  { %v3118_v54 = vadd.f32 %v7526_v53, %v6647_v48  ;;  %v3112_v60 = vpop.f32.mrb[55].mxu1  ;;  %3134 = vmax.xlane.f32.xlu0 %v3133_v49 }
 0xc0d   :  { %v3113_v13 = vadd.f32 %v7527_v61, %v3112_v60 }
 0xc0e   :  { %v3142_v62 = vsel %vm616_vm3, %v3118_v54, -inf }
 0xc0f   :  { %3143 = vmax.xlane.f32.xlu1 %v3142_v62  ;;  %v3139_v0 = vsel %vm616_vm3, %v3113_v13, -inf }
 0xc10   :  { %3140 = vmax.xlane.f32.xlu0 %v3139_v0 }
 0xc90   :  { %v3126_v4 = vpop.xlane.xlu1 %3125 }
 0xc91   :  { %v3146_v9 = vsub.f32 %v3088_v59, %v3126_v4  ;;  %v3123_v11 = vpop.xlane.xlu0 %3122 }
 0xc92   :  { %v3145_v19 = vsub.f32 %v3083_v58, %v3123_v11 }
 0xc93   :  { %v3155_v21 = vmul.f32 1.442695, %v3146_v9 }
 0xc94   :  { %v3153_v26 = vmul.f32 1.442695, %v3145_v19  ;;  %v3132_v27 = vpop.xlane.xlu1 %3131 }
 0xc95   :  { %7476 = vpow2.f32 %v3155_v21  ;;  %v3148_v31 = vsub.f32 %v3098_v46, %v3132_v27  ;;  %v3129_v44 = vpop.xlane.xlu0 %3128 }
 0xc96   :  { %7478 = vpow2.f32 %v3153_v26  ;;  %v3147_v29 = vsub.f32 %v3093_v51, %v3129_v44 }
 0xc97   :  { %v3159_v40 = vmul.f32 1.442695, %v3148_v31 }
 0xc98   :  { %v3157_v56 = vmul.f32 1.442695, %v3147_v29  ;;  %v3138_v45 = vpop.xlane.xlu1 %3137 }
 0xc99   :  { %7480 = vpow2.f32 %v3159_v40  ;;  %v3150_v16 = vsub.f32 %v3108_v2, %v3138_v45  ;;  %v3135_v30 = vpop.xlane.xlu0 %3134 }
 0xc9a   :  { %7482 = vpow2.f32 %v3157_v56  ;;  %v3149_v32 = vsub.f32 %v3103_v8, %v3135_v30 }
 0xc9b   :  { %v3163_v34 = vmul.f32 1.442695, %v3150_v16 }
 0xc9c   :  { %v3161_v5 = vmul.f32 1.442695, %v3149_v32  ;;  %v3144_v63 = vpop.xlane.xlu1 %3143  ;;  %v5435_v32 = vld [vmem:[%s10501_s11 + $0x20] sm:$0xff] }
 0xc9d   :  { %7484 = vpow2.f32 %v3163_v34  ;;  %v3152_v59 = vsub.f32 %v3118_v54, %v3144_v63  ;;  %v3141_v12 = vpop.xlane.xlu0 %3140  ;;  %v5436_v34 = vld [vmem:[%s10501_s11 + $0x28] sm:$0xff]  ;;  %v5437_v63 = vld [vmem:[%s10501_s11 + $0x30] sm:$0xff] }
 0xc9e   :  { %7486 = vpow2.f32 %v3161_v5  ;;  %v3151_v33 = vsub.f32 %v3113_v13, %v3141_v12  ;;  %v7098_v5 = vpack.c.bf16 %v5436_v34, %v5435_v32  ;;  %v5464_v34 = vld [vmem:[%s10505_s15 + $0x288] sm:$0xff] }
 0xc9f   :  { %v7477_v58 = vpop.eup %7476  ;;  %v3167_v22 = vmul.f32 1.442695, %v3152_v59  ;;  %v5438_v59 = vld [vmem:[%s10501_s11 + $0x38] sm:$0xff] }
 0xca0   :  { %v7479_v1 = vpop.eup %7478  ;;  %v3165_v3 = vmul.f32 1.442695, %v3151_v33  ;;  %v3172_v20 = vsel %vm616_vm3, %v7477_v58, 0.0  ;;  %7099 = vmatprep.subr.bf16.mxu0 %v7098_v5  ;;  %v7102_v12 = vpack.c.bf16 %v5438_v59, %v5437_v63  ;;  %v5447_v59 = vld [vmem:[%s10505_s15 + $0x200] sm:$0xff] }
 0xca1   :  { %7488 = vpow2.f32 %v3167_v22  ;;  %3173 = vadd.xlane.f32.xlu1 %v3172_v20  ;;  %v3169_v46 = vsel %vm616_vm3, %v7479_v1, 0.0 }
 0xca2   :  { %7490 = vpow2.f32 %v3165_v3  ;;  %3170 = vadd.xlane.f32.xlu0 %v3169_v46 }
 0xca3   :  { %v7481_v35 = vpop.eup %7480 }
 0xca4   :  { %v7483_v36 = vpop.eup %7482  ;;  %v3178_v51 = vsel %vm616_vm3, %v7481_v35, 0.0 }
 0xca5   :  { %3179 = vadd.xlane.f32.xlu1 %v3178_v51  ;;  %v3175_v39 = vsel %vm616_vm3, %v7483_v36, 0.0 }
 0xca6   :  { %3176 = vadd.xlane.f32.xlu0 %v3175_v39 }
 0xca7   :  { %v7485_v41 = vpop.eup %7484 }
 0xca8   :  { %v7487_v52 = vpop.eup %7486  ;;  %v3184_v24 = vsel %vm616_vm3, %v7485_v41, 0.0 }
 0xca9   :  { %3185 = vadd.xlane.f32.xlu1 %v3184_v24  ;;  %v3181_v2 = vsel %vm616_vm3, %v7487_v52, 0.0 }
 0xcaa   :  { %3182 = vadd.xlane.f32.xlu0 %v3181_v2 }
 0xcab   :  { %v7489_v43 = vpop.eup %7488 }
 0xcac   :  { %v7491_v7 = vpop.eup %7490  ;;  %v3190_v8 = vsel %vm616_vm3, %v7489_v43, 0.0 }
 0xcad   :  { %3191 = vadd.xlane.f32.xlu1 %v3190_v8  ;;  %v3187_v47 = vsel %vm616_vm3, %v7491_v7, 0.0 }
 0xcae   :  { %3188 = vadd.xlane.f32.xlu0 %v3187_v47 }
 0xd2e   :  { %v3174_v48 = vpop.xlane.xlu1 %3173 }
 0xd2f   :  { %7492 = vrcp.f32 %v3174_v48  ;;  %v3171_v49 = vpop.xlane.xlu0 %3170 }
 0xd30   :  { %7494 = vrcp.f32 %v3171_v49 }
 0xd32   :  { %v3180_v53 = vpop.xlane.xlu1 %3179 }
 0xd33   :  { %7496 = vrcp.f32 %v3180_v53  ;;  %v3177_v54 = vpop.xlane.xlu0 %3176 }
 0xd34   :  { %7498 = vrcp.f32 %v3177_v54 }
 0xd36   :  { %v3186_v60 = vpop.xlane.xlu1 %3185 }
 0xd37   :  { %7500 = vrcp.f32 %v3186_v60  ;;  %v3183_v61 = vpop.xlane.xlu0 %3182 }
 0xd38   :  { %7502 = vrcp.f32 %v3183_v61 }
 0xd39   :  { %v7493_v13 = vpop.eup %7492 }
 0xd3a   :  { %v7495_v62 = vpop.eup %7494  ;;  %v3192_v0 = vpop.xlane.xlu1 %3191  ;;  %v3196_v11 = vmul.f32 %v7493_v13, %v7477_v58 }
 0xd3b   :  { %7504 = vrcp.f32 %v3192_v0  ;;  %v3189_v4 = vpop.xlane.xlu0 %3188  ;;  %v3194_v9 = vmul.f32 %v7495_v62, %v7479_v1 }
 0xd3c   :  { %7506 = vrcp.f32 %v3189_v4  ;;  %v5440_v4 = vld [vmem:[%s10502_s12 + $0x1] ss:$0 sm:$0xff] }
 0xd3d   :  { %v7497_v19 = vpop.eup %7496  ;;  %6652 = vmatprep.mubr.msk.f32.mxu0 %vm616_vm3, %v3194_v9 }
 0xd3e   :  { %v7499_v21 = vpop.eup %7498  ;;  %6653 = vmatmul.mubr.msk.f32.vlgmr.msra.gmra.mrb[48].mxu0 %vm616_vm3, %v3196_v11  ;;  %v3200_v27 = vmul.f32 %v7497_v19, %v7481_v35 }
 0xd3f   :  { %v3198_v26 = vmul.f32 %v7499_v21, %v7483_v36  ;;  %7101 = vmatpush3.bf16.msra.mxu0 %v7098_v5  ;;  %v5450_v5 = vld [vmem:[%s10505_s15 + $0x218] sm:$0xff] }
 0xd40   :  { %7103 = vmatprep.subr.bf16.mxu0 %v7102_v12 }
 0xd41   :  { %v7501_v31 = vpop.eup %7500  ;;  %6655 = vmatprep.mubr.msk.f32.mxu0 %vm616_vm3, %v3198_v26 }
 0xd42   :  { %v7503_v44 = vpop.eup %7502  ;;  %6656 = vmatmul.mubr.msk.f32.gmra.mrb[50].mxu0 %vm616_vm3, %v3200_v27  ;;  %v3204_v40 = vmul.f32 %v7501_v31, %v7485_v41 }
 0xd43   :  { %v3202_v29 = vmul.f32 %v7503_v44, %v7487_v52  ;;  %7105 = vmatpush3.bf16.msra.mxu0 %v7102_v12  ;;  %v5463_v12 = vld [vmem:[%s10505_s15 + $0x280] sm:$0xff] }
 0xd45   :  { %v7505_v56 = vpop.eup %7504  ;;  %6658 = vmatprep.mubr.msk.f32.mxu0 %vm616_vm3, %v3202_v29 }
 0xd46   :  { %v7507_v45 = vpop.eup %7506  ;;  %6659 = vmatmul.mubr.msk.f32.gmra.mrb[52].mxu0 %vm616_vm3, %v3204_v40  ;;  %v3208_v30 = vmul.f32 %v7505_v56, %v7489_v43 }
 0xd47   :  { %v3206_v16 = vmul.f32 %v7507_v45, %v7491_v7 }
 0xd49   :  { %6661 = vmatprep.mubr.msk.f32.mxu0 %vm616_vm3, %v3206_v16 }
 0xd4a   :  { %6662 = vmatmul.mubr.msk.f32.gmra.mrb[54].mxu0 %vm616_vm3, %v3208_v30 }
 0xe11   :  { %v6654_v33 = vpop.f32.mrb[48].mxu0 }
 0xe12   :  { %v3339_v58 = vmul.f32 %v9181_v28, %v6654_v33  ;;  %v3299_v22 = vpop.f32.mrb[49].mxu0  ;;  %v5466_v33 = vld [vmem:[%s10505_s15 + $0x298] sm:$0xff] }
 0xe13   :  { %v3338_v1 = vmul.f32 %v9172_v10, %v3299_v22  ;;  %v7114_v22 = vpack.c.bf16 %v5466_v33, %v5450_v5  ;;  %v5485_v5 = vld [vmem:[%s10505_s15 + $0x330] sm:$0xff]  ;;  %v5456_v33 = vld [vmem:[%s10505_s15 + $0x248] sm:$0xff] }
 0xe14   :  { %v3347_v3 = vsel %vm193_vm1, %v3339_v58, 0.0  ;;  %v7108_v58 = vpack.c.bf16 %v5463_v12, %v5447_v59 }
 0xe15   :  { %v3346_v20 = vsel %vm193_vm1, %v3338_v1, 0.0  ;;  %v6657_v46 = vpop.f32.mrb[50].mxu0  ;;  %v5449_v1 = vld [vmem:[%s10505_s15 + $0x210] sm:$0xff]  ;;  %7115 = vmatprep.subr.bf16.mxu0 %v7114_v22  ;;  %v5458_v22 = vld [vmem:[%s10505_s15 + $0x258] sm:$0xff] }
 0xe16   :  { %v3348_v35 = vadd.f32 %v3347_v3, %v3346_v20  ;;  %v3309_v36 = vpop.f32.mrb[51].mxu0  ;;  %v3341_v51 = vmul.f32 %v9195_v57, %v6657_v46  ;;  %v5465_v3 = vld [vmem:[%s10505_s15 + $0x290] sm:$0xff]  ;;  %v5480_v46 = vld [vmem:[%s10505_s15 + $0x308] sm:$0xff] }
 0xe17   :  { %v3340_v39 = vmul.f32 %v9187_v55, %v3309_v36  ;;  %v7116_v20 = vpack.c.bf16 %v5465_v3, %v5449_v1  ;;  %v5482_v36 = vld [vmem:[%s10505_s15 + $0x318] sm:$0xff] }
 0xe18   :  { %v3351_v7 = vsel %vm193_vm1, %v3341_v51, 0.0  ;;  %v5474_v1 = vld [vmem:[%s10505_s15 + $0x2d8] sm:$0xff] }
 0xe19   :  { %v3349_v41 = vsel %vm193_vm1, %v3340_v39, 0.0  ;;  %v6660_v52 = vpop.f32.mrb[52].mxu0  ;;  %v5479_v39 = vld [vmem:[%s10505_s15 + $0x300] sm:$0xff] }
 0xe1a   :  { %v3350_v24 = vadd.f32 %v3349_v41, %v3348_v35  ;;  %v3343_v2 = vmul.f32 %v9181_v28, %v6660_v52  ;;  %v3319_v43 = vpop.f32.mrb[53].mxu0  ;;  %v5496_v35 = vld [vmem:[%s10505_s15 + $0x388] sm:$0xff]  ;;  %v5495_v41 = vld [vmem:[%s10505_s15 + $0x380] sm:$0xff]  ;;  %v5498_v52 = vld [vmem:[%s10505_s15 + $0x398] sm:$0xff] }
 0xe1b   :  { %v3342_v8 = vmul.f32 %v9172_v10, %v3319_v43  ;;  %v7110_v51 = vpack.c.bf16 %v5496_v35, %v5480_v46  ;;  %v5481_v43 = vld [vmem:[%s10505_s15 + $0x310] sm:$0xff]  ;;  %v5455_v46 = vld [vmem:[%s10505_s15 + $0x240] sm:$0xff] }
 0xe1c   :  { %v3352_v47 = vadd.f32 %v3351_v7, %v3350_v24  ;;  %v3354_v48 = vsel %vm193_vm1, %v3343_v2, 0.0  ;;  %v7112_v24 = vpack.c.bf16 %v5495_v41, %v5479_v39  ;;  %v7118_v2 = vpack.c.bf16 %v5498_v52, %v5482_v36  ;;  %v5497_v7 = vld [vmem:[%s10505_s15 + $0x390] sm:$0xff]  ;;  %v5471_v36 = vld [vmem:[%s10505_s15 + $0x2c0] sm:$0xff] }
 0xe1d   :  { %v3353_v49 = vsel %vm193_vm1, %v3342_v8, 0.0  ;;  %v6663_v53 = vpop.f32.mrb[54].mxu0  ;;  %v7120_v8 = vpack.c.bf16 %v5497_v7, %v5481_v43  ;;  %v5473_v39 = vld [vmem:[%s10505_s15 + $0x2d0] sm:$0xff]  ;;  %v7146_v52 = vpack.c.bf16 %v5474_v1, %v5458_v22  ;;  %v5490_v43 = vld [vmem:[%s10505_s15 + $0x358] sm:$0xff]  ;;  %v5530_v22 = vld [vmem:[%s10507_s17 + $0x808] sm:$0xff] }
 0xe1e   :  { %v3355_v54 = vadd.f32 %v3354_v48, %v3353_v49  ;;  %v3329_v60 = vpop.f32.mrb[55].mxu0  ;;  %6672 = vmatprep.mubr.msk.f32.mxu0 %vm193_vm1, %v3352_v47  ;;  %v3345_v61 = vmul.f32 %v9195_v57, %v6663_v53  ;;  %v5452_v47 = vld [vmem:[%s10505_s15 + $0x228] sm:$0xff]  ;;  %v5454_v49 = vld [vmem:[%s10505_s15 + $0x238] sm:$0xff] }
 0xe1f   :  { %v3344_v13 = vmul.f32 %v9187_v55, %v3329_v60  ;;  %v5468_v48 = vld [vmem:[%s10505_s15 + $0x2a8] sm:$0xff]  ;;  %v5506_v7 = vld [vmem:[%s10505_s15 + $0x3d8] sm:$0xff] }
 0xe20   :  { %v3358_v0 = vsel %vm193_vm1, %v3345_v61, 0.0  ;;  %v7122_v53 = vpack.c.bf16 %v5468_v48, %v5452_v47  ;;  %v5487_v48 = vld [vmem:[%s10505_s15 + $0x340] sm:$0xff] }
 0xe21   :  { %v3356_v28 = vsel %vm193_vm1, %v3344_v13, 0.0 }
 0xe22   :  { %v3357_v62 = vadd.f32 %v3356_v28, %v3355_v54  ;;  %v5470_v54 = vld [vmem:[%s10505_s15 + $0x2b8] sm:$0xff] }
 0xe23   :  { %v7130_v60 = vpack.c.bf16 %v5470_v54, %v5454_v49  ;;  %v5503_v49 = vld [vmem:[%s10505_s15 + $0x3c0] sm:$0xff]  ;;  %v5505_v54 = vld [vmem:[%s10505_s15 + $0x3d0] sm:$0xff] }
 0xe24   :  { %v3359_v10 = vadd.f32 %v3358_v0, %v3357_v62 }
 0xe26   :  { %6673 = vmatmul.mubr.msk.f32.vlgmr.msra.gmra.mrb[56].mxu0 %vm193_vm1, %v3359_v10 }
 0xe27   :  { %3799 = vmatprep.mubr.f32.mxu0 %v7552_v6  ;;  %7117 = vmatpush1.bf16.msra.mxu0 %v7116_v20 }
 0xe28   :  { %7119 = vmatprep.subr.bf16.mxu0 %v7118_v2  ;;  %v5504_v2 = vld [vmem:[%s10505_s15 + $0x3c8] sm:$0xff] }
 0xe2b   :  { %7121 = vmatpush1.bf16.msra.mxu0 %v7120_v8  ;;  %v7140_v8 = vpack.c.bf16 %v5471_v36, %v5455_v46  ;;  %v5562_v46 = vld [vmem:[%s10507_s17 + $0x908] sm:$0xff]  ;;  %v5547_v36 = vld [vmem:[%s10507_s17 + $0x890] sm:$0xff] }
 0xe2c   :  { %7131 = vmatprep.subr.bf16.mxu0 %v7130_v60 }
 0xef9   :  { %v6674_v9 = vpop.f32.mrb[56].mxu0 }
 0xefa   :  { %v3451_v11 = vadd.f32 %v6674_v9, %v5440_v4  ;;  %v3445_v19 = vpop.f32.mrb[57].mxu0 }
 0xefb   :  { %v3446_v57 = vadd.f32 %v5440_v4, %v3445_v19  ;;  %v5451_v19 = vld [vmem:[%s10505_s15 + $0x220] sm:$0xff] }
 0xefc   :  { %v3455_v55 = vadd.f32 %v3451_v11, %v9148_v42  ;;  %v5444_v11 = vld [vmem:[%s10503_s13 + $0x1] ss:$0 sm:$0xff] }
 0xefd   :  { %v3454_v21 = vadd.f32 %v3446_v57, %v9136_v25  ;;  %v5448_v25 = vld [vmem:[%s10505_s15 + $0x208] sm:$0xff] }
 0xefe   :  { %v3459_v26 = vsel %vm193_vm1, %v3455_v55, 0.0  ;;  %v7106_v63 = vpack.c.bf16 %v5464_v34, %v5448_v25  ;;  %v5499_v34 = vld [vmem:[%s10505_s15 + $0x3a0] sm:$0xff] }
 0xeff   :  { %3460 = vadd.xlane.f32.xlu1 %v3459_v26  ;;  %v3456_v27 = vsel %vm193_vm1, %v3454_v21, 0.0  ;;  %v5453_v26 = vld [vmem:[%s10505_s15 + $0x230] sm:$0xff] }
 0xf00   :  { %3457 = vadd.xlane.f32.xlu0 %v3456_v27  ;;  %7107 = vmatprep.subr.bf16.mxu1 %v7106_v63  ;;  %v5469_v27 = vld [vmem:[%s10505_s15 + $0x2b0] sm:$0xff] }
 0xf01   :  { %7109 = vmatpush1.bf16.msra.mxu1 %v7108_v58  ;;  %v5501_v63 = vld [vmem:[%s10505_s15 + $0x3b0] sm:$0xff]  ;;  %v5472_v58 = vld [vmem:[%s10505_s15 + $0x2c8] sm:$0xff] }
 0xf02   :  { %7111 = vmatprep.subr.bf16.mxu1 %v7110_v51  ;;  %v7136_v20 = vpack.c.bf16 %v5501_v63, %v5485_v5  ;;  %v5457_v51 = vld [vmem:[%s10505_s15 + $0x250] sm:$0xff]  ;;  %v7138_v41 = vpack.c.bf16 %v5472_v58, %v5456_v33  ;;  %v5546_v5 = vld [vmem:[%s10507_s17 + $0x888] sm:$0xff]  ;;  %v5577_v63 = vld [vmem:[%s10507_s17 + $0x980] sm:$0xff] }
 0xf03   :  { %v7148_v47 = vpack.c.bf16 %v5473_v39, %v5457_v51  ;;  %v5529_v58 = vld [vmem:[%s10507_s17 + $0x800] sm:$0xff]  ;;  %v5548_v51 = vld [vmem:[%s10507_s17 + $0x898] sm:$0xff]  ;;  %v5579_v39 = vld [vmem:[%s10507_s17 + $0x990] sm:$0xff] }
 0xf05   :  { %7113 = vmatpush1.bf16.msra.mxu1 %v7112_v24  ;;  %v5488_v24 = vld [vmem:[%s10505_s15 + $0x348] sm:$0xff] }
 0xf06   :  { %7123 = vmatprep.subr.bf16.mxu1 %v7122_v53  ;;  %v5489_v53 = vld [vmem:[%s10505_s15 + $0x350] sm:$0xff]  ;;  %v7142_v60 = vpack.c.bf16 %v5504_v2, %v5488_v24 }
 0xf07   :  { %v5531_v2 = vld [vmem:[%s10507_s17 + $0x810] sm:$0xff] }
 0xf8c   :  { %v3461_v31 = vpop.xlane.xlu1 %3460 }
 0xf8d   :  { %v3463_v44 = vmul.f32 0.03125, %v3461_v31  ;;  %v3458_v29 = vpop.xlane.xlu0 %3457  ;;  %v5446_v31 = vld [vmem:[%s10504_s14 + $0x1] ss:$0 sm:$0xff] }
 0xf8e   :  { %v3462_v40 = vmul.f32 0.03125, %v3458_v29 }
 0xf8f   :  { %v3465_v56 = vsub.f32 %v3455_v55, %v3463_v44  ;;  %v5484_v44 = vld [vmem:[%s10505_s15 + $0x328] sm:$0xff] }
 0xf90   :  { %v3464_v45 = vsub.f32 %v3454_v21, %v3462_v40  ;;  %v5467_v21 = vld [vmem:[%s10505_s15 + $0x2a0] sm:$0xff]  ;;  %v5500_v40 = vld [vmem:[%s10505_s15 + $0x3a8] sm:$0xff] }
 0xf91   :  { %v3467_v16 = vmul.f32 %v3465_v56, %v3465_v56  ;;  %v7126_v59 = vpack.c.bf16 %v5500_v40, %v5484_v44  ;;  %v5510_v44 = vld [vmem:[%s10505_s15 + $0x3f8] sm:$0xff] }
 0xf92   :  { %v3466_v30 = vmul.f32 %v3464_v45, %v3464_v45 }
 0xf93   :  { %v3471_v32 = vsel %vm193_vm1, %v3467_v16, 0.0  ;;  %v7124_v16 = vpack.c.bf16 %v5467_v21, %v5451_v19  ;;  %v5461_v19 = vld [vmem:[%s10505_s15 + $0x270] sm:$0xff] }
 0xf94   :  { %3472 = vadd.xlane.f32.xlu1 %v3471_v32  ;;  %v3468_v42 = vsel %vm193_vm1, %v3466_v30, 0.0  ;;  %v7132_v30 = vpack.c.bf16 %v5469_v27, %v5453_v26  ;;  %v5483_v32 = vld [vmem:[%s10505_s15 + $0x320] sm:$0xff]  ;;  %v5492_v26 = vld [vmem:[%s10505_s15 + $0x368] sm:$0xff] }
 0xf95   :  { %3469 = vadd.xlane.f32.xlu0 %v3468_v42  ;;  %v7128_v3 = vpack.c.bf16 %v5499_v34, %v5483_v32  ;;  %v5508_v27 = vld [vmem:[%s10505_s15 + $0x3e8] sm:$0xff]  ;;  %v5545_v34 = vld [vmem:[%s10507_s17 + $0x880] sm:$0xff] }
 0xf96   :  { %v7158_v32 = vpack.c.bf16 %v5508_v27, %v5492_v26  ;;  %v7170_v1 = vpack.c.bf16 %v5546_v5, %v5545_v34  ;;  %v5535_v27 = vld [vmem:[%s10507_s17 + $0x830] sm:$0xff]  ;;  %v5537_v5 = vld [vmem:[%s10507_s17 + $0x840] sm:$0xff] }
0x1021   :  { %v3473_v61 = vpop.xlane.xlu1 %3472 }
0x1022   :  { %v3475_v13 = vmul.f32 0.03125, %v3473_v61  ;;  %v3470_v28 = vpop.xlane.xlu0 %3469  ;;  %v7150_v61 = vpack.c.bf16 %v5506_v7, %v5490_v43  ;;  %v5532_v43 = vld [vmem:[%s10507_s17 + $0x818] sm:$0xff]  ;;  %v7174_v7 = vpack.c.bf16 %v5548_v51, %v5547_v36  ;;  %v5539_v51 = vld [vmem:[%s10507_s17 + $0x850] sm:$0xff] }
0x1023   :  { %v3474_v62 = vmul.f32 0.03125, %v3470_v28  ;;  %v5476_v28 = vld [vmem:[%s10505_s15 + $0x2e8] sm:$0xff] }
0x1024   :  { %v3477_v0 = vadd.f32 1e-05, %v3475_v13  ;;  %v5460_v13 = vld [vmem:[%s10505_s15 + $0x268] sm:$0xff] }
0x1025   :  { %v3476_v10 = vadd.f32 1e-05, %v3474_v62  ;;  %v5462_v62 = vld [vmem:[%s10505_s15 + $0x278] sm:$0xff] }
0x1026   :  { %7508 = vrsqrt.f32 %v3477_v0  ;;  %v5478_v0 = vld [vmem:[%s10505_s15 + $0x2f8] sm:$0xff] }
0x1027   :  { %7510 = vrsqrt.f32 %v3476_v10  ;;  %v7144_v10 = vpack.c.bf16 %v5503_v49, %v5487_v48  ;;  %v7162_v21 = vpack.c.bf16 %v5478_v0, %v5462_v62  ;;  %v5564_v48 = vld [vmem:[%s10507_s17 + $0x918] sm:$0xff]  ;;  %v5549_v49 = vld [vmem:[%s10507_s17 + $0x8a0] sm:$0xff]  ;;  %v5534_v62 = vld [vmem:[%s10507_s17 + $0x828] sm:$0xff] }
0x1030   :  { %v7509_v4 = vpop.eup %7508 }
0x1031   :  { %v7511_v9 = vpop.eup %7510  ;;  %v3481_v57 = vmul.f32 %v7509_v4, %v3465_v56  ;;  %v5486_v56 = vld [vmem:[%s10505_s15 + $0x338] sm:$0xff]  ;;  %v7152_v4 = vpack.c.bf16 %v5505_v54, %v5489_v53  ;;  %v5550_v53 = vld [vmem:[%s10507_s17 + $0x8a8] sm:$0xff]  ;;  %v5581_v54 = vld [vmem:[%s10507_s17 + $0x9a0] sm:$0xff] }
0x1032   :  { %v3480_v55 = vmul.f32 %v7511_v9, %v3464_v45  ;;  %v5502_v45 = vld [vmem:[%s10505_s15 + $0x3b8] sm:$0xff]  ;;  %v5459_v9 = vld [vmem:[%s10505_s15 + $0x260] sm:$0xff]  ;;  %v7178_v0 = vpack.c.bf16 %v5550_v53, %v5549_v49 }
0x1033   :  { %v3491_v42 = vmul.f32 %v5444_v11, %v3481_v57  ;;  %v7134_v12 = vpack.c.bf16 %v5502_v45, %v5486_v56  ;;  %v5477_v57 = vld [vmem:[%s10505_s15 + $0x2f0] sm:$0xff]  ;;  %v5491_v56 = vld [vmem:[%s10505_s15 + $0x360] sm:$0xff] }
0x1034   :  { %v3490_v29 = vmul.f32 %v5444_v11, %v3480_v55  ;;  %v5475_v11 = vld [vmem:[%s10505_s15 + $0x2e0] sm:$0xff]  ;;  %v7154_v55 = vpack.c.bf16 %v5476_v28, %v5460_v13  ;;  %v7164_v40 = vpack.c.bf16 %v5477_v57, %v5461_v19  ;;  %v5552_v19 = vld [vmem:[%s10507_s17 + $0x8b8] sm:$0xff]  ;;  %v5583_v57 = vld [vmem:[%s10507_s17 + $0x9b0] sm:$0xff] }
0x1035   :  { %v9419_v35 = vadd.f32 %v5446_v31, %v3491_v42  ;;  %v5507_v45 = vld [vmem:[%s10505_s15 + $0x3e0] sm:$0xff] }
0x1036   :  { %v9389_v25 = vadd.f32 %v5446_v31, %v3490_v29  ;;  %v5494_v31 = vld [vmem:[%s10505_s15 + $0x378] sm:$0xff]  ;;  %v7156_v29 = vpack.c.bf16 %v5475_v11, %v5459_v9  ;;  %v5533_v28 = vld [vmem:[%s10507_s17 + $0x820] sm:$0xff]  ;;  %v5566_v9 = vld [vmem:[%s10507_s17 + $0x928] sm:$0xff] }
0x1037   :  { %v7166_v42 = vpack.c.bf16 %v5510_v44, %v5494_v31  ;;  %v5551_v11 = vld [vmem:[%s10507_s17 + $0x8b0] sm:$0xff]  ;;  %v5536_v31 = vld [vmem:[%s10507_s17 + $0x838] sm:$0xff]  ;;  %v5541_v53 = vld [vmem:[%s10507_s17 + $0x860] sm:$0xff] }
0x1038   :  { %5513 = vmatmul.mubr.msk.f32.vlgmr.msra.gmra.mrb[56].mxu1 %vm193_vm1, %v9389_v25  ;;  %5515 = vmatmul.mubr.msk.f32.vlgmr.msra.gmra.mrb[58].mxu0 %vm193_vm1, %v9389_v25  ;;  %v7182_v44 = vpack.c.bf16 %v5552_v19, %v5551_v11  ;;  %v5592_v19 = vld [vmem:[%s10507_s17 + $0x9f8] sm:$0xff] }
0x1039   :  { %7125 = vmatpush1.bf16.msra.mxu1 %v7124_v16  ;;  %7133 = vmatpush1.bf16.msra.mxu0 %v7132_v30  ;;  %v5493_v16 = vld [vmem:[%s10505_s15 + $0x370] sm:$0xff] }
0x103a   :  { %3728 = vmatprep.mubr.f32.mxu1 %v7552_v6  ;;  %3805 = vmatprep.mubr.f32.mxu0 %v7552_v6  ;;  %v5509_v30 = vld [vmem:[%s10505_s15 + $0x3f0] sm:$0xff] }
0x103b   :  { %7127 = vmatprep.subr.bf16.mxu1 %v7126_v59  ;;  %7135 = vmatprep.subr.bf16.mxu0 %v7134_v12  ;;  %v5578_v59 = vld [vmem:[%s10507_s17 + $0x988] sm:$0xff]  ;;  %v7160_v12 = vpack.c.bf16 %v5507_v45, %v5491_v56  ;;  %v7168_v33 = vpack.c.bf16 %v5509_v30, %v5493_v16  ;;  %v5568_v56 = vld [vmem:[%s10507_s17 + $0x938] sm:$0xff]  ;;  %v5553_v45 = vld [vmem:[%s10507_s17 + $0x8c0] sm:$0xff] }
0x103c   :  { %5514 = vmatmul.mubr.msk.f32.gmra.mrb[58].mxu1 %vm193_vm1, %v9419_v35  ;;  %5516 = vmatmul.mubr.msk.f32.gmra.mrb[60].mxu0 %vm193_vm1, %v9419_v35  ;;  %v5554_v16 = vld [vmem:[%s10507_s17 + $0x8c8] sm:$0xff]  ;;  %v5585_v30 = vld [vmem:[%s10507_s17 + $0x9c0] sm:$0xff] }
0x103d   :  { %7129 = vmatpush1.bf16.msra.mxu1 %v7128_v3  ;;  %7137 = vmatpush1.bf16.msra.mxu0 %v7136_v20  ;;  %v7202_v3 = vpack.c.bf16 %v5578_v59, %v5577_v63  ;;  %v5561_v20 = vld [vmem:[%s10507_s17 + $0x900] sm:$0xff]  ;;  %v5538_v63 = vld [vmem:[%s10507_s17 + $0x848] sm:$0xff]  ;;  %v7186_v59 = vpack.c.bf16 %v5554_v16, %v5553_v45 }
0x103e   :  { %3876 = vmatprep.mubr.f32.mxu1 %v7552_v6  ;;  %3953 = vmatprep.mubr.f32.mxu0 %v7552_v6  ;;  %v7204_v24 = vpack.c.bf16 %v5562_v46, %v5561_v20  ;;  %v5588_v20 = vld [vmem:[%s10507_s17 + $0x9d8] sm:$0xff]  ;;  %v7188_v46 = vpack.c.bf16 %v5538_v63, %v5537_v5  ;;  %v5642_v16 = vld [vmem:[%s10507_s17 + $0xb88] sm:$0xff] }
0x103f   :  { %7139 = vmatprep.subr.bf16.mxu1 %v7138_v41  ;;  %7147 = vmatprep.subr.bf16.mxu0 %v7146_v52  ;;  %v5580_v41 = vld [vmem:[%s10507_s17 + $0x998] sm:$0xff]  ;;  %v7172_v52 = vpack.c.bf16 %v5530_v22, %v5529_v58  ;;  %v5570_v58 = vld [vmem:[%s10507_s17 + $0x948] sm:$0xff]  ;;  %v5555_v22 = vld [vmem:[%s10507_s17 + $0x8d0] sm:$0xff] }
0x1040   :  { %5517 = vmatmul.mubr.msk.f32.vlgmr.msra.gmra.mrb[60].mxu1 %vm193_vm1, %v9389_v25  ;;  %5519 = vmatmul.mubr.msk.f32.vlgmr.msra.gmra.mrb[62].mxu0 %vm193_vm1, %v9389_v25 }
0x1041   :  { %7141 = vmatpush1.bf16.msra.mxu1 %v7140_v8  ;;  %7149 = vmatpush1.bf16.msra.mxu0 %v7148_v47  ;;  %v7206_v8 = vpack.c.bf16 %v5580_v41, %v5579_v39  ;;  %v5563_v47 = vld [vmem:[%s10507_s17 + $0x910] sm:$0xff]  ;;  %v5540_v39 = vld [vmem:[%s10507_s17 + $0x858] sm:$0xff] }
0x1042   :  { %3882 = vmatprep.mubr.f32.mxu1 %v7552_v6  ;;  %3959 = vmatprep.mubr.f32.mxu0 %v7552_v6  ;;  %v7208_v13 = vpack.c.bf16 %v5564_v48, %v5563_v47  ;;  %v5590_v47 = vld [vmem:[%s10507_s17 + $0x9e8] sm:$0xff]  ;;  %v7192_v48 = vpack.c.bf16 %v5540_v39, %v5539_v51  ;;  %v5612_v39 = vld [vmem:[%s10507_s17 + $0xa98] sm:$0xff] }
0x1043   :  { %7143 = vmatprep.subr.bf16.mxu1 %v7142_v60  ;;  %7151 = vmatprep.subr.bf16.mxu0 %v7150_v61  ;;  %v5582_v60 = vld [vmem:[%s10507_s17 + $0x9a8] sm:$0xff]  ;;  %v7176_v61 = vpack.c.bf16 %v5532_v43, %v5531_v2  ;;  %v5572_v2 = vld [vmem:[%s10507_s17 + $0x958] sm:$0xff]  ;;  %v5557_v43 = vld [vmem:[%s10507_s17 + $0x8e0] sm:$0xff] }
0x1044   :  { %5518 = vmatmul.mubr.msk.f32.gmra.mrb[62].mxu1 %vm193_vm1, %v9419_v35  ;;  %5520 = vmatmul.mubr.msk.f32.gmra.mrb[64].mxu0 %vm193_vm1, %v9419_v35 }
0x1045   :  { %7145 = vmatpush1.bf16.msra.mxu1 %v7144_v10  ;;  %7153 = vmatpush1.bf16.msra.mxu0 %v7152_v4  ;;  %v7210_v10 = vpack.c.bf16 %v5582_v60, %v5581_v54  ;;  %v5565_v4 = vld [vmem:[%s10507_s17 + $0x920] sm:$0xff] }
0x1046   :  { %4030 = vmatprep.mubr.f32.mxu1 %v7552_v6  ;;  %4107 = vmatprep.mubr.f32.mxu0 %v7552_v6  ;;  %v7212_v26 = vpack.c.bf16 %v5566_v9, %v5565_v4  ;;  %v5560_v4 = vld [vmem:[%s10507_s17 + $0x8f8] sm:$0xff]  ;;  %v5591_v9 = vld [vmem:[%s10507_s17 + $0x9f0] sm:$0xff] }
0x1047   :  { %7155 = vmatprep.subr.bf16.mxu1 %v7154_v55  ;;  %7163 = vmatprep.subr.bf16.mxu0 %v7162_v21  ;;  %v5584_v55 = vld [vmem:[%s10507_s17 + $0x9b8] sm:$0xff]  ;;  %v7180_v21 = vpack.c.bf16 %v5534_v62, %v5533_v28  ;;  %v5574_v28 = vld [vmem:[%s10507_s17 + $0x968] sm:$0xff] }
0x1048   :  { %5521 = vmatmul.mubr.msk.f32.vlgmr.msra.gmra.mrb[64].mxu1 %vm193_vm1, %v9389_v25  ;;  %5523 = vmatmul.mubr.msk.f32.vlgmr.msra.gmra.mrb[66].mxu0 %vm193_vm1, %v9389_v25 }
0x1049   :  { %7157 = vmatpush1.bf16.msra.mxu1 %v7156_v29  ;;  %7165 = vmatpush1.bf16.msra.mxu0 %v7164_v40  ;;  %v7214_v29 = vpack.c.bf16 %v5584_v55, %v5583_v57  ;;  %v5567_v40 = vld [vmem:[%s10507_s17 + $0x930] sm:$0xff]  ;;  %v5544_v55 = vld [vmem:[%s10507_s17 + $0x878] sm:$0xff] }
0x104a   :  { %4036 = vmatprep.mubr.f32.mxu1 %v7552_v6  ;;  %4113 = vmatprep.mubr.f32.mxu0 %v7552_v6  ;;  %v7216_v34 = vpack.c.bf16 %v5568_v56, %v5567_v40  ;;  %v5543_v57 = vld [vmem:[%s10507_s17 + $0x870] sm:$0xff]  ;;  %v5610_v40 = vld [vmem:[%s10507_s17 + $0xa88] sm:$0xff]  ;;  %v5641_v56 = vld [vmem:[%s10507_s17 + $0xb80] sm:$0xff] }
0x104b   :  { %7159 = vmatprep.subr.bf16.mxu1 %v7158_v32  ;;  %7167 = vmatprep.subr.bf16.mxu0 %v7166_v42  ;;  %v5586_v32 = vld [vmem:[%s10507_s17 + $0x9c8] sm:$0xff]  ;;  %v7184_v42 = vpack.c.bf16 %v5536_v31, %v5535_v27  ;;  %v5575_v27 = vld [vmem:[%s10507_s17 + $0x970] sm:$0xff]  ;;  %v5576_v31 = vld [vmem:[%s10507_s17 + $0x978] sm:$0xff] }
0x104c   :  { %5522 = vmatmul.mubr.msk.f32.gmra.mrb[66].mxu1 %vm193_vm1, %v9419_v35  ;;  %5524 = vmatmul.mubr.msk.f32.gmra.mrb[68].mxu0 %vm193_vm1, %v9419_v35 }
0x104d   :  { %7161 = vmatpush1.bf16.msra.mxu1 %v7160_v12  ;;  %7169 = vmatpush1.bf16.msra.mxu0 %v7168_v33  ;;  %v7218_v12 = vpack.c.bf16 %v5586_v32, %v5585_v30  ;;  %v5569_v33 = vld [vmem:[%s10507_s17 + $0x940] sm:$0xff]  ;;  %v7266_v30 = vpack.c.bf16 %v5642_v16, %v5641_v56  ;;  %v9751_v32 = vld [vmem:[%s10506_s16 + $0x10] sm:$0xff] }
0x104e   :  { %4184 = vmatprep.mubr.f32.mxu1 %v7552_v6  ;;  %4261 = vmatprep.mubr.f32.mxu0 %v7552_v6  ;;  %v7220_v36 = vpack.c.bf16 %v5570_v58, %v5569_v33  ;;  %v3579_v5 = vrot.slane %v9751_v32, %v8383_v17  ;;  %v3587_v63 = vrot.slane %v9751_v32, %v8386_v18 }
0x104f   :  { %7171 = vmatprep.subr.bf16.mxu1 %v7170_v1  ;;  %7203 = vmatprep.subr.bf16.mxu0 %v7202_v3  ;;  %v5556_v1 = vld [vmem:[%s10507_s17 + $0x8d8] sm:$0xff]  ;;  %v5587_v3 = vld [vmem:[%s10507_s17 + $0x9d0] sm:$0xff] }
0x1050   :  { %5525 = vmatmul.mubr.msk.f32.vlgmr.msra.gmra.mrb[68].mxu1 %vm193_vm1, %v9389_v25  ;;  %5527 = vmatmul.mubr.msk.f32.vlgmr.msra.gmra.mrb[70].mxu0 %vm193_vm1, %v9389_v25  ;;  %v7190_v41 = vpack.c.bf16 %v5556_v1, %v5555_v22  ;;  %v5625_v22 = vld [vmem:[%s10507_s17 + $0xb00] sm:$0xff]  ;;  %v5626_v1 = vld [vmem:[%s10507_s17 + $0xb08] sm:$0xff] }
0x1051   :  { %4190 = vmatprep.mubr.f32.mxu1 %v7552_v6  ;;  %4267 = vmatprep.mubr.f32.mxu0 %v7552_v6 }
0x1052   :  { %7173 = vmatpush3.bf16.msra.mxu1 %v7172_v52  ;;  %7205 = vmatpush3.bf16.msra.mxu0 %v7204_v24  ;;  %v7222_v52 = vpack.c.bf16 %v5588_v20, %v5587_v3  ;;  %v5571_v24 = vld [vmem:[%s10507_s17 + $0x950] sm:$0xff] }
0x1053   :  { %7175 = vmatprep.subr.bf16.mxu1 %v7174_v7  ;;  %7207 = vmatprep.subr.bf16.mxu0 %v7206_v8  ;;  %v5558_v7 = vld [vmem:[%s10507_s17 + $0x8e8] sm:$0xff]  ;;  %v5589_v8 = vld [vmem:[%s10507_s17 + $0x9e0] sm:$0xff]  ;;  %v7224_v49 = vpack.c.bf16 %v5572_v2, %v5571_v24  ;;  %v5611_v3 = vld [vmem:[%s10507_s17 + $0xa90] sm:$0xff] }
0x1054   :  { %5526 = vmatmul.mubr.msk.f32.gmra.mrb[70].mxu1 %vm193_vm1, %v9419_v35  ;;  %5528 = vmatmul.mubr.msk.f32.gmra.mrb[72].mxu0 %vm193_vm1, %v9419_v35  ;;  %v7194_v54 = vpack.c.bf16 %v5558_v7, %v5557_v43  ;;  %v7226_v60 = vpack.c.bf16 %v5590_v47, %v5589_v8  ;;  %v7268_v7 = vpack.c.bf16 %v5626_v1, %v5625_v22  ;;  %v5595_v47 = vld [vmem:[%s10507_s17 + $0xa10] sm:$0xff]  ;;  %v5630_v1 = vld [vmem:[%s10507_s17 + $0xb28] sm:$0xff] }
0x1055   :  { %v9787_v8 = vrot.slane %v9751_v32, %v8403_v23 }
0x1056   :  { %7177 = vmatpush3.bf16.msra.mxu1 %v7176_v61  ;;  %7209 = vmatpush3.bf16.msra.mxu0 %v7208_v13  ;;  %v5542_v61 = vld [vmem:[%s10507_s17 + $0x868] sm:$0xff]  ;;  %v5573_v13 = vld [vmem:[%s10507_s17 + $0x960] sm:$0xff] }
0x1057   :  { %7179 = vmatprep.subr.bf16.mxu1 %v7178_v0  ;;  %7211 = vmatprep.subr.bf16.mxu0 %v7210_v10  ;;  %v7196_v62 = vpack.c.bf16 %v5542_v61, %v5541_v53  ;;  %v7228_v0 = vpack.c.bf16 %v5574_v28, %v5573_v13  ;;  %v5559_v10 = vld [vmem:[%s10507_s17 + $0x8f0] sm:$0xff]  ;;  %v5596_v13 = vld [vmem:[%s10507_s17 + $0xa18] sm:$0xff] }
0x1058   :  { %v7198_v11 = vpack.c.bf16 %v5560_v4, %v5559_v10  ;;  %v5627_v28 = vld [vmem:[%s10507_s17 + $0xb10] sm:$0xff] }
0x105a   :  { %7181 = vmatpush3.bf16.msra.mxu1 %v7180_v21  ;;  %7213 = vmatpush3.bf16.msra.mxu0 %v7212_v26  ;;  %v7230_v21 = vpack.c.bf16 %v5592_v19, %v5591_v9  ;;  %v7200_v26 = vpack.c.bf16 %v5544_v55, %v5543_v57  ;;  %v5628_v19 = vld [vmem:[%s10507_s17 + $0xb18] sm:$0xff]  ;;  %v5613_v57 = vld [vmem:[%s10507_s17 + $0xaa0] sm:$0xff] }
0x105b   :  { %7183 = vmatprep.subr.bf16.mxu1 %v7182_v44  ;;  %7215 = vmatprep.subr.bf16.mxu0 %v7214_v29  ;;  %v7232_v44 = vpack.c.bf16 %v5576_v31, %v5575_v27  ;;  %v5609_v29 = vld [vmem:[%s10507_s17 + $0xa80] sm:$0xff]  ;;  %v5614_v27 = vld [vmem:[%s10507_s17 + $0xaa8] sm:$0xff] }
0x105c   :  { %v7234_v45 = vpack.c.bf16 %v5610_v40, %v5609_v29  ;;  %v5645_v31 = vld [vmem:[%s10507_s17 + $0xba0] sm:$0xff] }
0x105d   :  { %v5597_v29 = vld [vmem:[%s10507_s17 + $0xa20] sm:$0xff] }
0x105e   :  { %7185 = vmatpush3.bf16.msra.mxu1 %v7184_v42  ;;  %7217 = vmatpush3.bf16.msra.mxu0 %v7216_v34  ;;  %v3575_v42 = vrot.slane %v9751_v32, %v8372_v14  ;;  %v3583_v34 = vrot.slane %v9751_v32, %v8375_v15 }
0x105f   :  { %7187 = vmatprep.subr.bf16.mxu1 %v7186_v59  ;;  %7219 = vmatprep.subr.bf16.mxu0 %v7218_v12  ;;  %v5593_v59 = vld [vmem:[%s10507_s17 + $0xa00] sm:$0xff]  ;;  %v5594_v12 = vld [vmem:[%s10507_s17 + $0xa08] sm:$0xff] }
0x1060   :  { %v7236_v43 = vpack.c.bf16 %v5594_v12, %v5593_v59 }
0x1062   :  { %7189 = vmatpush3.bf16.msra.mxu1 %v7188_v46  ;;  %7221 = vmatpush3.bf16.msra.mxu0 %v7220_v36 }
0x1063   :  { %7191 = vmatprep.subr.bf16.mxu1 %v7190_v41  ;;  %7223 = vmatprep.subr.bf16.mxu0 %v7222_v52  ;;  %v5643_v41 = vld [vmem:[%s10507_s17 + $0xb90] sm:$0xff]  ;;  %v5644_v52 = vld [vmem:[%s10507_s17 + $0xb98] sm:$0xff] }
0x1064   :  { %v7270_v61 = vpack.c.bf16 %v5644_v52, %v5643_v41 }
0x1066   :  { %7193 = vmatpush3.bf16.msra.mxu1 %v7192_v48  ;;  %7225 = vmatpush3.bf16.msra.mxu0 %v7224_v49 }
0x1067   :  { %7195 = vmatprep.subr.bf16.mxu1 %v7194_v54  ;;  %7227 = vmatprep.subr.bf16.mxu0 %v7226_v60  ;;  %v7238_v60 = vpack.c.bf16 %v5612_v39, %v5611_v3  ;;  %v5615_v3 = vld [vmem:[%s10507_s17 + $0xab0] sm:$0xff]  ;;  %v5648_v39 = vld [vmem:[%s10507_s17 + $0xbb8] sm:$0xff] }
0x106a   :  { %7197 = vmatpush3.bf16.msra.mxu1 %v7196_v62  ;;  %7229 = vmatpush3.bf16.msra.mxu0 %v7228_v0 }
0x106b   :  { %7199 = vmatprep.subr.bf16.mxu1 %v7198_v11  ;;  %7231 = vmatprep.subr.bf16.mxu0 %v7230_v21 }
0x106e   :  { %7201 = vmatpush3.bf16.msra.mxu1 %v7200_v26  ;;  %7233 = vmatpush3.bf16.msra.mxu0 %v7232_v44  ;;  %v9806_v26 = vrot.slane %v9751_v32, %v8424_v37  ;;  %v5646_v44 = vld [vmem:[%s10507_s17 + $0xba8] sm:$0xff] }
0x106f   :  { %7235 = vmatprep.subr.bf16.mxu1 %v7234_v45  ;;  %7267 = vmatprep.subr.bf16.mxu0 %v7266_v30  ;;  %v7240_v30 = vpack.c.bf16 %v5596_v13, %v5595_v47  ;;  %v7274_v22 = vpack.c.bf16 %v5646_v44, %v5645_v31  ;;  %v5599_v47 = vld [vmem:[%s10507_s17 + $0xa30] sm:$0xff]  ;;  %v5632_v13 = vld [vmem:[%s10507_s17 + $0xb38] sm:$0xff] }
0x110b   :  { %v3724_v33 = vpop.f32.mrb[56].mxu1  ;;  %v3801_v58 = vpop.f32.mrb[58].mxu0 }
0x110c   :  { %v3725_v20 = vadd.f32 %v3724_v33, %v3575_v42  ;;  %v3802_v46 = vadd.f32 %v3801_v58, %v3583_v34  ;;  %v3726_v36 = vpop.f32.mrb[57].mxu1  ;;  %v3803_v51 = vpop.f32.mrb[59].mxu0  ;;  %v7242_v58 = vpack.c.bf16 %v5614_v27, %v5613_v57  ;;  %v5601_v57 = vld [vmem:[%s10507_s17 + $0xa40] sm:$0xff] }
0x110d   :  { %v3727_v24 = vadd.f32 %v3726_v36, %v3579_v5  ;;  %v3804_v2 = vadd.f32 %v3803_v51, %v3587_v63  ;;  %v5616_v36 = vld [vmem:[%s10507_s17 + $0xab8] sm:$0xff]  ;;  %v5647_v51 = vld [vmem:[%s10507_s17 + $0xbb0] sm:$0xff] }
0x110e   :  { %v4274_v62 = vmax.f32 %v3725_v20, 0.0  ;;  %v4276_v0 = vmax.f32 %v3802_v46, 0.0 }
0x110f   :  { %v4275_v48 = vmax.f32 %v3727_v24, 0.0  ;;  %v4277_v49 = vmax.f32 %v3804_v2, 0.0  ;;  %v3730_v53 = vpop.f32.mrb[58].mxu1  ;;  %v3807_v54 = vpop.f32.mrb[60].mxu0 }
0x1110   :  { %v3731_v10 = vadd.f32 %v3730_v53, %v3575_v42  ;;  %v3808_v4 = vadd.f32 %v3807_v54, %v3583_v34  ;;  %v3732_v9 = vpop.f32.mrb[59].mxu1  ;;  %v3809_v11 = vpop.f32.mrb[61].mxu0  ;;  %v7272_v42 = vpack.c.bf16 %v5628_v19, %v5627_v28  ;;  %v5598_v34 = vld [vmem:[%s10507_s17 + $0xa28] sm:$0xff]  ;;  %v7246_v54 = vpack.c.bf16 %v5616_v36, %v5615_v3  ;;  %v5617_v28 = vld [vmem:[%s10507_s17 + $0xac0] sm:$0xff]  ;;  %v5636_v36 = vld [vmem:[%s10507_s17 + $0xb58] sm:$0xff] }
0x1111   :  { %v3733_v55 = vadd.f32 %v3732_v9, %v3579_v5  ;;  %v3810_v21 = vadd.f32 %v3809_v11, %v3587_v63  ;;  %4635 = vmatprep.mubr.f32.mxu1 %v4275_v48  ;;  %4710 = vmatprep.mubr.f32.mxu0 %v4277_v49  ;;  %v5629_v5 = vld [vmem:[%s10507_s17 + $0xb20] sm:$0xff]  ;;  %v5600_v48 = vld [vmem:[%s10507_s17 + $0xa38] sm:$0xff] }
0x1112   :  { %4636 = vmatmul.mubr.f32.vlgmr.msra.gmra.mrb[72].mxu1 %v4274_v62  ;;  %4711 = vmatmul.mubr.f32.vlgmr.msra.gmra.mrb[74].mxu0 %v4276_v0  ;;  %v4290_v63 = vmax.f32 %v3731_v10, 0.0  ;;  %v4292_v59 = vmax.f32 %v3808_v4, 0.0  ;;  %v5618_v62 = vld [vmem:[%s10507_s17 + $0xac8] sm:$0xff]  ;;  %v5649_v0 = vld [vmem:[%s10507_s17 + $0xbc0] sm:$0xff]  ;;  %v7248_v11 = vpack.c.bf16 %v5600_v48, %v5599_v47 }
0x1113   :  { %v4291_v40 = vmax.f32 %v3733_v55, 0.0  ;;  %v4293_v56 = vmax.f32 %v3810_v21, 0.0  ;;  %7237 = vmatpush3.bf16.msra.mxu1 %v7236_v43  ;;  %7269 = vmatpush3.bf16.msra.mxu0 %v7268_v7  ;;  %v9820_v45 = vpop.f32.mrb[60].mxu1  ;;  %v9822_v16 = vpop.f32.mrb[62].mxu0  ;;  %v7244_v43 = vpack.c.bf16 %v5598_v34, %v5597_v29  ;;  %v7276_v7 = vpack.c.bf16 %v5630_v1, %v5629_v5  ;;  %v5650_v10 = vld [vmem:[%s10507_s17 + $0xbc8] sm:$0xff]  ;;  %v5633_v29 = vld [vmem:[%s10507_s17 + $0xb40] sm:$0xff] }
0x1114   :  { %v3880_v12 = vpop.f32.mrb[61].mxu1  ;;  %v3957_v33 = vpop.f32.mrb[63].mxu0  ;;  %7239 = vmatprep.subr.bf16.mxu1 %v7238_v60  ;;  %7271 = vmatprep.subr.bf16.mxu0 %v7270_v61  ;;  %v7278_v60 = vpack.c.bf16 %v5648_v39, %v5647_v51  ;;  %v5631_v61 = vld [vmem:[%s10507_s17 + $0xb30] sm:$0xff]  ;;  %v5602_v55 = vld [vmem:[%s10507_s17 + $0xa48] sm:$0xff]  ;;  %v7250_v31 = vpack.c.bf16 %v5618_v62, %v5617_v28  ;;  %v7282_v44 = vpack.c.bf16 %v5650_v10, %v5649_v0  ;;  %v5652_v34 = vld [vmem:[%s10507_s17 + $0xbd8] sm:$0xff] }
0x1115   :  { %v3881_v20 = vadd.f32 %v3880_v12, %v9787_v8  ;;  %v3958_v46 = vadd.f32 %v3957_v33, %v9806_v26  ;;  %4640 = vmatprep.mubr.f32.mxu1 %v4291_v40  ;;  %4715 = vmatprep.mubr.f32.mxu0 %v4293_v56  ;;  %v7280_v19 = vpack.c.bf16 %v5632_v13, %v5631_v61  ;;  %v5634_v40 = vld [vmem:[%s10507_s17 + $0xb48] sm:$0xff]  ;;  %v5619_v56 = vld [vmem:[%s10507_s17 + $0xad0] sm:$0xff]  ;;  %v5621_v51 = vld [vmem:[%s10507_s17 + $0xae0] sm:$0xff] }
0x1116   :  { %4641 = vmatmul.mubr.f32.gmra.mrb[74].mxu1 %v4290_v63  ;;  %4716 = vmatmul.mubr.f32.gmra.mrb[76].mxu0 %v4292_v59  ;;  %v7252_v59 = vpack.c.bf16 %v5602_v55, %v5601_v57  ;;  %v7284_v12 = vpack.c.bf16 %v5634_v40, %v5633_v29  ;;  %v5603_v33 = vld [vmem:[%s10507_s17 + $0xa50] sm:$0xff]  ;;  %v5622_v39 = vld [vmem:[%s10507_s17 + $0xae8] sm:$0xff]  ;;  %v5637_v0 = vld [vmem:[%s10507_s17 + $0xb60] sm:$0xff] }
0x1117   :  { %v4279_v41 = vmax.f32 %v3881_v20, 0.0  ;;  %v4281_v52 = vmax.f32 %v3958_v46, 0.0  ;;  %7241 = vmatpush3.bf16.msra.mxu1 %v7240_v30  ;;  %7273 = vmatpush3.bf16.msra.mxu0 %v7272_v42  ;;  %v9847_v24 = vpop.f32.mrb[62].mxu1  ;;  %v9849_v2 = vpop.f32.mrb[64].mxu0  ;;  %v5620_v30 = vld [vmem:[%s10507_s17 + $0xad8] sm:$0xff]  ;;  %v5651_v42 = vld [vmem:[%s10507_s17 + $0xbd0] sm:$0xff]  ;;  %v7258_v28 = vpack.c.bf16 %v5622_v39, %v5621_v51 }
0x1118   :  { %v9857_v49 = vpop.f32.mrb[63].mxu1  ;;  %v9859_v53 = vpop.f32.mrb[65].mxu0  ;;  %7243 = vmatprep.subr.bf16.mxu1 %v7242_v58  ;;  %7275 = vmatprep.subr.bf16.mxu0 %v7274_v22  ;;  %v5604_v58 = vld [vmem:[%s10507_s17 + $0xa58] sm:$0xff]  ;;  %v7254_v3 = vpack.c.bf16 %v5620_v30, %v5619_v56  ;;  %v7286_v20 = vpack.c.bf16 %v5652_v34, %v5651_v42  ;;  %v5635_v46 = vld [vmem:[%s10507_s17 + $0xb50] sm:$0xff]  ;;  %v5638_v10 = vld [vmem:[%s10507_s17 + $0xb68] sm:$0xff] }
0x1119   :  { %4785 = vmatprep.mubr.f32.mxu1 %v4279_v41  ;;  %4860 = vmatprep.mubr.f32.mxu0 %v4281_v52  ;;  %v5653_v41 = vld [vmem:[%s10507_s17 + $0xbe0] sm:$0xff]  ;;  %v5654_v52 = vld [vmem:[%s10507_s17 + $0xbe8] sm:$0xff]  ;;  %v7256_v47 = vpack.c.bf16 %v5604_v58, %v5603_v33  ;;  %v7288_v48 = vpack.c.bf16 %v5636_v36, %v5635_v46  ;;  %v5655_v57 = vld [vmem:[%s10507_s17 + $0xbf0] sm:$0xff]  ;;  %v7292_v56 = vpack.c.bf16 %v5638_v10, %v5637_v0 }
0x111a   :  { %v7290_v62 = vpack.c.bf16 %v5654_v52, %v5653_v41  ;;  %v5656_v55 = vld [vmem:[%s10507_s17 + $0xbf8] sm:$0xff]  ;;  %v5607_v30 = vld [vmem:[%s10507_s17 + $0xa70] sm:$0xff]  ;;  %v5673_v46 = vld [vmem:[%s10507_s17 + $0xc80] sm:$0xff] }
0x111b   :  { %7245 = vmatpush3.bf16.msra.mxu1 %v7244_v43  ;;  %7277 = vmatpush3.bf16.msra.mxu0 %v7276_v7  ;;  %v9879_v4 = vpop.f32.mrb[64].mxu1  ;;  %v9881_v9 = vpop.f32.mrb[66].mxu0  ;;  %v5608_v42 = vld [vmem:[%s10507_s17 + $0xa78] sm:$0xff]  ;;  %v5639_v34 = vld [vmem:[%s10507_s17 + $0xb70] sm:$0xff]  ;;  %v5705_v36 = vld [vmem:[%s10507_s17 + $0xd80] sm:$0xff] }
0x111c   :  { %v9889_v21 = vpop.f32.mrb[65].mxu1  ;;  %v9891_v27 = vpop.f32.mrb[67].mxu0  ;;  %7247 = vmatprep.subr.bf16.mxu1 %v7246_v54  ;;  %7279 = vmatprep.subr.bf16.mxu0 %v7278_v60  ;;  %v5605_v54 = vld [vmem:[%s10507_s17 + $0xa60] sm:$0xff]  ;;  %v5606_v60 = vld [vmem:[%s10507_s17 + $0xa68] sm:$0xff]  ;;  %v10014_v39 = vld [vmem:[%s10506_s16 + $0x18] sm:$0xff] }
0x111d   :  { %v7260_v40 = vpack.c.bf16 %v5606_v60, %v5605_v54  ;;  %v5706_v51 = vld [vmem:[%s10507_s17 + $0xd88] sm:$0xff]  ;;  %v5657_v41 = vld [vmem:[%s10507_s17 + $0xc00] sm:$0xff] }
0x111e   :  { %v5658_v52 = vld [vmem:[%s10507_s17 + $0xc08] sm:$0xff]  ;;  %v5689_v60 = vld [vmem:[%s10507_s17 + $0xd00] sm:$0xff] }
0x111f   :  { %7249 = vmatpush3.bf16.msra.mxu1 %v7248_v11  ;;  %7281 = vmatpush3.bf16.msra.mxu0 %v7280_v19  ;;  %v9911_v5 = vpop.f32.mrb[66].mxu1  ;;  %v9913_v63 = vpop.f32.mrb[68].mxu0  ;;  %v5623_v11 = vld [vmem:[%s10507_s17 + $0xaf0] sm:$0xff]  ;;  %v5624_v19 = vld [vmem:[%s10507_s17 + $0xaf8] sm:$0xff] }
0x1120   :  { %v9921_v22 = vpop.f32.mrb[67].mxu1  ;;  %v9923_v1 = vpop.f32.mrb[69].mxu0  ;;  %7251 = vmatprep.subr.bf16.mxu1 %v7250_v31  ;;  %7283 = vmatprep.subr.bf16.mxu0 %v7282_v44  ;;  %v3591_v31 = vrot.slane %v9751_v32, %v8585_v38  ;;  %v7262_v58 = vpack.c.bf16 %v5624_v19, %v5623_v11  ;;  %v7330_v11 = vpack.c.bf16 %v5706_v51, %v5705_v36  ;;  %v5676_v19 = vld [vmem:[%s10507_s17 + $0xc98] sm:$0xff] }
0x1122   :  { %v3879_v0 = vadd.f32 %v9820_v45, %v3591_v31  ;;  %v3887_v45 = vadd.f32 %v9857_v49, %v9787_v8  ;;  %v3885_v8 = vadd.f32 %v9847_v24, %v3591_v31  ;;  %v5692_v31 = vld [vmem:[%s10507_s17 + $0xd18] sm:$0xff] }
0x1123   :  { %7253 = vmatpush3.bf16.msra.mxu1 %v7252_v59  ;;  %7285 = vmatpush3.bf16.msra.mxu0 %v7284_v12  ;;  %v9943_v43 = vpop.f32.mrb[68].mxu1  ;;  %v9945_v7 = vpop.f32.mrb[70].mxu0  ;;  %v3599_v59 = vrot.slane %v9751_v32, %v8598_v50  ;;  %v5674_v32 = vld [vmem:[%s10507_s17 + $0xc88] sm:$0xff] }
0x1124   :  { %v9953_v61 = vpop.f32.mrb[69].mxu1  ;;  %v9955_v13 = vpop.f32.mrb[71].mxu0  ;;  %7255 = vmatprep.subr.bf16.mxu1 %v7254_v3  ;;  %7287 = vmatprep.subr.bf16.mxu0 %v7286_v20  ;;  %v7294_v3 = vpack.c.bf16 %v5656_v55, %v5655_v57  ;;  %v5640_v20 = vld [vmem:[%s10507_s17 + $0xb78] sm:$0xff]  ;;  %v7298_v54 = vpack.c.bf16 %v5674_v32, %v5673_v46  ;;  %v5707_v57 = vld [vmem:[%s10507_s17 + $0xd90] sm:$0xff]  ;;  %v4295_v49 = vmax.f32 %v3887_v45, 0.0  ;;  %v5710_v32 = vld [vmem:[%s10507_s17 + $0xda8] sm:$0xff] }
0x1125   :  { %v3956_v10 = vadd.f32 %v9822_v16, %v3599_v59  ;;  %v5708_v55 = vld [vmem:[%s10507_s17 + $0xd98] sm:$0xff]  ;;  %v3964_v16 = vadd.f32 %v9859_v53, %v9806_v26  ;;  %v3962_v26 = vadd.f32 %v9849_v2, %v3599_v59  ;;  %v5691_v2 = vld [vmem:[%s10507_s17 + $0xd10] sm:$0xff]  ;;  %v5677_v59 = vld [vmem:[%s10507_s17 + $0xca0] sm:$0xff]  ;;  %v4294_v36 = vmax.f32 %v3885_v8, 0.0 }
0x1126   :  { %v5681_v8 = vld [vmem:[%s10507_s17 + $0xcc0] sm:$0xff] }
0x1127   :  { %7257 = vmatpush3.bf16.msra.mxu1 %v7256_v47  ;;  %7289 = vmatpush3.bf16.msra.mxu0 %v7288_v48  ;;  %v9977_v44 = vpop.f32.mrb[70].mxu1  ;;  %v9979_v29 = vpop.f32.mrb[72].mxu0  ;;  %v7264_v47 = vpack.c.bf16 %v5608_v42, %v5607_v30  ;;  %v7296_v48 = vpack.c.bf16 %v5640_v20, %v5639_v34  ;;  %v7300_v30 = vpack.c.bf16 %v5658_v52, %v5657_v41  ;;  %v4280_v20 = vmax.f32 %v3956_v10, 0.0  ;;  %v5694_v10 = vld [vmem:[%s10507_s17 + $0xd28] sm:$0xff] }
0x1128   :  { %v9992_v12 = vpop.f32.mrb[71].mxu1  ;;  %v9994_v33 = vpop.f32.mrb[73].mxu0  ;;  %7259 = vmatprep.subr.bf16.mxu1 %v7258_v28  ;;  %7291 = vmatprep.subr.bf16.mxu0 %v7290_v62  ;;  %v5690_v28 = vld [vmem:[%s10507_s17 + $0xd08] sm:$0xff]  ;;  %v5675_v62 = vld [vmem:[%s10507_s17 + $0xc90] sm:$0xff]  ;;  %v4297_v53 = vmax.f32 %v3964_v16, 0.0  ;;  %v4296_v51 = vmax.f32 %v3962_v26, 0.0  ;;  %v7336_v52 = vpack.c.bf16 %v5692_v31, %v5691_v2 }
0x1129   :  { %v7332_v42 = vpack.c.bf16 %v5690_v28, %v5689_v60  ;;  %v7302_v34 = vpack.c.bf16 %v5676_v19, %v5675_v62  ;;  %v5680_v19 = vld [vmem:[%s10507_s17 + $0xcb8] sm:$0xff]  ;;  %v5682_v26 = vld [vmem:[%s10507_s17 + $0xcc8] sm:$0xff] }
0x112a   :  { %v7314_v2 = vpack.c.bf16 %v5682_v26, %v5681_v8  ;;  %v5719_v8 = vld [vmem:[%s10507_s17 + $0xdf0] sm:$0xff]  ;;  %v5720_v26 = vld [vmem:[%s10507_s17 + $0xdf8] sm:$0xff] }
0x112b   :  { %7261 = vmatpush3.bf16.msra.mxu1 %v7260_v40  ;;  %7293 = vmatpush3.bf16.msra.mxu0 %v7292_v56  ;;  %v10048_v40 = vrot.slane %v10014_v39, %v8383_v17  ;;  %v10052_v56 = vrot.slane %v10014_v39, %v8386_v18  ;;  %v5659_v17 = vld [vmem:[%s10507_s17 + $0xc10] sm:$0xff]  ;;  %v5660_v18 = vld [vmem:[%s10507_s17 + $0xc18] sm:$0xff] }
0x112c   :  { %7263 = vmatprep.subr.bf16.mxu1 %v7262_v58  ;;  %7295 = vmatprep.subr.bf16.mxu0 %v7294_v3  ;;  %v7334_v58 = vpack.c.bf16 %v5708_v55, %v5707_v57  ;;  %v4278_v3 = vmax.f32 %v3879_v0, 0.0  ;;  %v7304_v41 = vpack.c.bf16 %v5660_v18, %v5659_v17  ;;  %v5693_v0 = vld [vmem:[%s10507_s17 + $0xd20] sm:$0xff]  ;;  %v5711_v57 = vld [vmem:[%s10507_s17 + $0xdb0] sm:$0xff]  ;;  %v5712_v55 = vld [vmem:[%s10507_s17 + $0xdb8] sm:$0xff] }
0x112d   :  { %v4035_v46 = vadd.f32 %v9889_v21, %v10048_v40  ;;  %v4112_v24 = vadd.f32 %v9891_v27, %v10052_v56  ;;  %v5678_v21 = vld [vmem:[%s10507_s17 + $0xca8] sm:$0xff]  ;;  %v5709_v27 = vld [vmem:[%s10507_s17 + $0xda0] sm:$0xff]  ;;  %v7340_v16 = vpack.c.bf16 %v5694_v10, %v5693_v0 }
0x112e   :  { %v7306_v28 = vpack.c.bf16 %v5678_v21, %v5677_v59  ;;  %v7338_v62 = vpack.c.bf16 %v5710_v32, %v5709_v27  ;;  %v5713_v17 = vld [vmem:[%s10507_s17 + $0xdc0] sm:$0xff]  ;;  %v5714_v18 = vld [vmem:[%s10507_s17 + $0xdc8] sm:$0xff]  ;;  %v5683_v27 = vld [vmem:[%s10507_s17 + $0xcd0] sm:$0xff] }
0x112f   :  { %7265 = vmatpush3.bf16.msra.mxu1 %v7264_v47  ;;  %7297 = vmatpush3.bf16.msra.mxu0 %v7296_v48  ;;  %v5661_v47 = vld [vmem:[%s10507_s17 + $0xc20] sm:$0xff]  ;;  %v5662_v48 = vld [vmem:[%s10507_s17 + $0xc28] sm:$0xff]  ;;  %v4285_v60 = vmax.f32 %v4112_v24, 0.0  ;;  %v7346_v31 = vpack.c.bf16 %v5714_v18, %v5713_v17  ;;  %v5684_v32 = vld [vmem:[%s10507_s17 + $0xcd8] sm:$0xff]  ;;  %v3607_v17 = vrot.slane %v10014_v39, %v8372_v14 }
0x1130   :  { %7299 = vmatprep.subr.bf16.mxu1 %v7298_v54  ;;  %7331 = vmatprep.subr.bf16.mxu0 %v7330_v11  ;;  %v4283_v54 = vmax.f32 %v4035_v46, 0.0  ;;  %v5679_v11 = vld [vmem:[%s10507_s17 + $0xcb0] sm:$0xff]  ;;  %v7308_v45 = vpack.c.bf16 %v5662_v48, %v5661_v47  ;;  %v5665_v46 = vld [vmem:[%s10507_s17 + $0xc40] sm:$0xff]  ;;  %v5666_v24 = vld [vmem:[%s10507_s17 + $0xc48] sm:$0xff] }
0x1131   :  { %v5697_v59 = vld [vmem:[%s10507_s17 + $0xd40] sm:$0xff]  ;;  %v5698_v21 = vld [vmem:[%s10507_s17 + $0xd48] sm:$0xff]  ;;  %v5667_v47 = vld [vmem:[%s10507_s17 + $0xc50] sm:$0xff] }
0x1132   :  { %4786 = vmatmul.mubr.f32.vlgmr.msra.gmra.mrb[76].mxu1 %v4278_v3  ;;  %4861 = vmatmul.mubr.f32.vlgmr.msra.gmra.mrb[78].mxu0 %v4280_v20  ;;  %v5695_v3 = vld [vmem:[%s10507_s17 + $0xd30] sm:$0xff]  ;;  %v5696_v20 = vld [vmem:[%s10507_s17 + $0xd38] sm:$0xff]  ;;  %v5685_v0 = vld [vmem:[%s10507_s17 + $0xce0] sm:$0xff] }
0x1133   :  { %4790 = vmatprep.mubr.f32.mxu1 %v4295_v49  ;;  %4865 = vmatprep.mubr.f32.mxu0 %v4297_v53  ;;  %v7344_v53 = vpack.c.bf16 %v5696_v20, %v5695_v3  ;;  %v5668_v48 = vld [vmem:[%s10507_s17 + $0xc58] sm:$0xff]  ;;  %v5686_v10 = vld [vmem:[%s10507_s17 + $0xce8] sm:$0xff]  ;;  %v5687_v3 = vld [vmem:[%s10507_s17 + $0xcf0] sm:$0xff] }
0x1134   :  { %7301 = vmatpush3.bf16.msra.mxu1 %v7300_v30  ;;  %7333 = vmatpush3.bf16.msra.mxu0 %v7332_v42  ;;  %v5663_v30 = vld [vmem:[%s10507_s17 + $0xc30] sm:$0xff]  ;;  %v5664_v42 = vld [vmem:[%s10507_s17 + $0xc38] sm:$0xff] }
0x1135   :  { %7303 = vmatprep.subr.bf16.mxu1 %v7302_v34  ;;  %7335 = vmatprep.subr.bf16.mxu0 %v7334_v58  ;;  %v7310_v34 = vpack.c.bf16 %v5680_v19, %v5679_v11  ;;  %v7342_v58 = vpack.c.bf16 %v5712_v55, %v5711_v57  ;;  %v7312_v49 = vpack.c.bf16 %v5664_v42, %v5663_v30  ;;  %v5717_v11 = vld [vmem:[%s10507_s17 + $0xde0] sm:$0xff]  ;;  %v5718_v19 = vld [vmem:[%s10507_s17 + $0xde8] sm:$0xff]  ;;  %v5688_v20 = vld [vmem:[%s10507_s17 + $0xcf8] sm:$0xff] }
0x1136   :  { %4791 = vmatmul.mubr.f32.gmra.mrb[78].mxu1 %v4294_v36  ;;  %4866 = vmatmul.mubr.f32.gmra.mrb[80].mxu0 %v4296_v51  ;;  %v5715_v36 = vld [vmem:[%s10507_s17 + $0xdd0] sm:$0xff]  ;;  %v5716_v51 = vld [vmem:[%s10507_s17 + $0xdd8] sm:$0xff]  ;;  %v7320_v57 = vpack.c.bf16 %v5668_v48, %v5667_v47  ;;  %v7322_v30 = vpack.c.bf16 %v5686_v10, %v5685_v0  ;;  %v7354_v42 = vpack.c.bf16 %v5718_v19, %v5717_v11  ;;  %v5753_v48 = vld [vmem:[%s10507_s17 + $0xf00] sm:$0xff] }
0x1137   :  { %4935 = vmatprep.mubr.f32.mxu1 %v4283_v54  ;;  %5010 = vmatprep.mubr.f32.mxu0 %v4285_v60  ;;  %v7318_v54 = vpack.c.bf16 %v5684_v32, %v5683_v27  ;;  %v7350_v60 = vpack.c.bf16 %v5716_v51, %v5715_v36  ;;  %v7326_v14 = vpack.c.bf16 %v5688_v20, %v5687_v3  ;;  %v5738_v27 = vld [vmem:[%s10507_s17 + $0xe88] sm:$0xff]  ;;  %v5721_v36 = vld [vmem:[%s10507_s17 + $0xe00] sm:$0xff]  ;;  %v5740_v10 = vld [vmem:[%s10507_s17 + $0xe98] sm:$0xff] }
0x1138   :  { %7305 = vmatpush3.bf16.msra.mxu1 %v7304_v41  ;;  %7337 = vmatpush3.bf16.msra.mxu0 %v7336_v52  ;;  %v7316_v41 = vpack.c.bf16 %v5666_v24, %v5665_v46  ;;  %v7348_v52 = vpack.c.bf16 %v5698_v21, %v5697_v59  ;;  %v5672_v46 = vld [vmem:[%s10507_s17 + $0xc78] sm:$0xff]  ;;  %v5703_v24 = vld [vmem:[%s10507_s17 + $0xd70] sm:$0xff]  ;;  %v5737_v21 = vld [vmem:[%s10507_s17 + $0xe80] sm:$0xff] }
0x1139   :  { %7307 = vmatprep.subr.bf16.mxu1 %v7306_v28  ;;  %7339 = vmatprep.subr.bf16.mxu0 %v7338_v62  ;;  %v5699_v28 = vld [vmem:[%s10507_s17 + $0xd50] sm:$0xff]  ;;  %v5700_v62 = vld [vmem:[%s10507_s17 + $0xd58] sm:$0xff]  ;;  %v5770_v32 = vld [vmem:[%s10507_s17 + $0xf88] sm:$0xff]  ;;  %v7362_v47 = vpack.c.bf16 %v5738_v27, %v5737_v21 }
0x113a   :  { %v7352_v55 = vpack.c.bf16 %v5700_v62, %v5699_v28  ;;  %v5704_v59 = vld [vmem:[%s10507_s17 + $0xd78] sm:$0xff]  ;;  %v5722_v51 = vld [vmem:[%s10507_s17 + $0xe08] sm:$0xff]  ;;  %v4033_v28 = vadd.f32 %v9879_v4, %v3607_v17  ;;  %v5771_v11 = vld [vmem:[%s10507_s17 + $0xf90] sm:$0xff]  ;;  %v4041_v4 = vadd.f32 %v9921_v22, %v10048_v40  ;;  %v4039_v22 = vadd.f32 %v9911_v5, %v3607_v17 }
0x113b   :  { %v5772_v19 = vld [vmem:[%s10507_s17 + $0xf98] sm:$0xff]  ;;  %v5757_v21 = vld [vmem:[%s10507_s17 + $0xf20] sm:$0xff]  ;;  %v5758_v27 = vld [vmem:[%s10507_s17 + $0xf28] sm:$0xff] }
0x113c   :  { %7309 = vmatpush3.bf16.msra.mxu1 %v7308_v45  ;;  %7341 = vmatpush3.bf16.msra.mxu0 %v7340_v16  ;;  %v5669_v45 = vld [vmem:[%s10507_s17 + $0xc60] sm:$0xff]  ;;  %v5670_v16 = vld [vmem:[%s10507_s17 + $0xc68] sm:$0xff]  ;;  %v4299_v40 = vmax.f32 %v4041_v4, 0.0  ;;  %v5756_v20 = vld [vmem:[%s10507_s17 + $0xf18] sm:$0xff]  ;;  %v4298_v17 = vmax.f32 %v4039_v22, 0.0 }
0x113d   :  { %7311 = vmatprep.subr.bf16.mxu1 %v7310_v34  ;;  %7343 = vmatprep.subr.bf16.mxu0 %v7342_v58  ;;  %v5701_v34 = vld [vmem:[%s10507_s17 + $0xd60] sm:$0xff]  ;;  %v5702_v58 = vld [vmem:[%s10507_s17 + $0xd68] sm:$0xff]  ;;  %v7324_v18 = vpack.c.bf16 %v5670_v16, %v5669_v45  ;;  %v7364_v45 = vpack.c.bf16 %v5722_v51, %v5721_v36  ;;  %v5775_v36 = vld [vmem:[%s10507_s17 + $0xfb0] sm:$0xff] }
0x113e   :  { %v5776_v51 = vld [vmem:[%s10507_s17 + $0xfb8] sm:$0xff]  ;;  %v5747_v22 = vld [vmem:[%s10507_s17 + $0xed0] sm:$0xff] }
0x1140   :  { %7313 = vmatpush3.bf16.msra.mxu1 %v7312_v49  ;;  %7345 = vmatpush3.bf16.msra.mxu0 %v7344_v53  ;;  %v7356_v49 = vpack.c.bf16 %v5702_v58, %v5701_v34  ;;  %v5671_v53 = vld [vmem:[%s10507_s17 + $0xc70] sm:$0xff]  ;;  %v4282_v34 = vmax.f32 %v4033_v28, 0.0 }
0x1141   :  { %7315 = vmatprep.subr.bf16.mxu1 %v7314_v2  ;;  %7347 = vmatprep.subr.bf16.mxu0 %v7346_v31  ;;  %v3615_v2 = vrot.slane %v10014_v39, %v8375_v15  ;;  %v7358_v31 = vpack.c.bf16 %v5720_v26, %v5719_v8  ;;  %v5769_v15 = vld [vmem:[%s10507_s17 + $0xf80] sm:$0xff]  ;;  %v5774_v26 = vld [vmem:[%s10507_s17 + $0xfa8] sm:$0xff]  ;;  %v5759_v28 = vld [vmem:[%s10507_s17 + $0xf30] sm:$0xff] }
0x1142   :  { %v7394_v0 = vpack.c.bf16 %v5770_v32, %v5769_v15  ;;  %v5741_v8 = vld [vmem:[%s10507_s17 + $0xea0] sm:$0xff]  ;;  %v5743_v15 = vld [vmem:[%s10507_s17 + $0xeb0] sm:$0xff]  ;;  %v5744_v32 = vld [vmem:[%s10507_s17 + $0xeb8] sm:$0xff] }
0x1143   :  { %v4110_v62 = vadd.f32 %v9881_v9, %v3615_v2  ;;  %v4118_v9 = vadd.f32 %v9923_v1, %v10052_v56  ;;  %v4116_v1 = vadd.f32 %v9913_v63, %v3615_v2  ;;  %v5755_v63 = vld [vmem:[%s10507_s17 + $0xf10] sm:$0xff] }
0x1144   :  { %7317 = vmatpush3.bf16.msra.mxu1 %v7316_v41  ;;  %7349 = vmatpush3.bf16.msra.mxu0 %v7348_v52  ;;  %v7328_v41 = vpack.c.bf16 %v5672_v46, %v5671_v53  ;;  %v7360_v52 = vpack.c.bf16 %v5704_v59, %v5703_v24  ;;  %v7400_v53 = vpack.c.bf16 %v5756_v20, %v5755_v63  ;;  %v5725_v46 = vld [vmem:[%s10507_s17 + $0xe20] sm:$0xff]  ;;  %v5726_v24 = vld [vmem:[%s10507_s17 + $0xe28] sm:$0xff] }
0x1145   :  { %7319 = vmatprep.subr.bf16.mxu1 %v7318_v54  ;;  %7351 = vmatprep.subr.bf16.mxu0 %v7350_v60  ;;  %v5754_v54 = vld [vmem:[%s10507_s17 + $0xf08] sm:$0xff]  ;;  %v5739_v60 = vld [vmem:[%s10507_s17 + $0xe90] sm:$0xff]  ;;  %v4284_v58 = vmax.f32 %v4110_v62, 0.0  ;;  %v4301_v56 = vmax.f32 %v4118_v9, 0.0  ;;  %v5760_v62 = vld [vmem:[%s10507_s17 + $0xf38] sm:$0xff] }
0x1146   :  { %v7396_v16 = vpack.c.bf16 %v5754_v54, %v5753_v48  ;;  %v5728_v48 = vld [vmem:[%s10507_s17 + $0xe38] sm:$0xff]  ;;  %v7374_v54 = vpack.c.bf16 %v5744_v32, %v5743_v15  ;;  %v7408_v9 = vpack.c.bf16 %v5760_v62, %v5759_v28  ;;  %v5783_v15 = vld [vmem:[%s10507_s17 + $0xff0] sm:$0xff] }
0x1147   :  { %v5784_v32 = vld [vmem:[%s10507_s17 + $0xff8] sm:$0xff] }
0x1148   :  { %7321 = vmatpush3.bf16.msra.mxu1 %v7320_v57  ;;  %7353 = vmatpush3.bf16.msra.mxu0 %v7352_v55  ;;  %v10264_v57 = vrot.slane %v10014_v39, %v8403_v23  ;;  %v10268_v55 = vrot.slane %v10014_v39, %v8424_v37  ;;  %v5723_v23 = vld [vmem:[%s10507_s17 + $0xe10] sm:$0xff]  ;;  %v5724_v37 = vld [vmem:[%s10507_s17 + $0xe18] sm:$0xff] }
0x1149   :  { %7323 = vmatprep.subr.bf16.mxu1 %v7322_v30  ;;  %7355 = vmatprep.subr.bf16.mxu0 %v7354_v42  ;;  %v7366_v30 = vpack.c.bf16 %v5740_v10, %v5739_v60  ;;  %v7398_v42 = vpack.c.bf16 %v5772_v19, %v5771_v11  ;;  %v7406_v60 = vpack.c.bf16 %v5776_v51, %v5775_v36  ;;  %v5746_v10 = vld [vmem:[%s10507_s17 + $0xec8] sm:$0xff]  ;;  %v5777_v11 = vld [vmem:[%s10507_s17 + $0xfc0] sm:$0xff]  ;;  %v5768_v28 = vld [vmem:[%s10507_s17 + $0xf78] sm:$0xff] }
0x114a   :  { %v4189_v3 = vadd.f32 %v9953_v61, %v10264_v57  ;;  %v4266_v5 = vadd.f32 %v9955_v13, %v10268_v55  ;;  %v5742_v61 = vld [vmem:[%s10507_s17 + $0xea8] sm:$0xff]  ;;  %v5773_v13 = vld [vmem:[%s10507_s17 + $0xfa0] sm:$0xff]  ;;  %v3623_v36 = vrot.slane %v10014_v39, %v8585_v38  ;;  %v5767_v38 = vld [vmem:[%s10507_s17 + $0xf70] sm:$0xff] }
0x114b   :  { %v7402_v59 = vpack.c.bf16 %v5774_v26, %v5773_v13  ;;  %v5778_v19 = vld [vmem:[%s10507_s17 + $0xfc8] sm:$0xff]  ;;  %v5749_v13 = vld [vmem:[%s10507_s17 + $0xee0] sm:$0xff] }
0x114c   :  { %7325 = vmatpush3.bf16.msra.mxu1 %v7324_v18  ;;  %7357 = vmatpush3.bf16.msra.mxu0 %v7356_v49  ;;  %v4300_v18 = vmax.f32 %v4116_v1, 0.0  ;;  %v7368_v49 = vpack.c.bf16 %v5724_v37, %v5723_v23  ;;  %v4287_v2 = vmax.f32 %v4189_v3, 0.0  ;;  %v5748_v1 = vld [vmem:[%s10507_s17 + $0xed8] sm:$0xff]  ;;  %v5779_v23 = vld [vmem:[%s10507_s17 + $0xfd0] sm:$0xff]  ;;  %v5750_v26 = vld [vmem:[%s10507_s17 + $0xee8] sm:$0xff] }
0x114d   :  { %7327 = vmatprep.subr.bf16.mxu1 %v7326_v14  ;;  %7359 = vmatprep.subr.bf16.mxu0 %v7358_v31  ;;  %v4289_v14 = vmax.f32 %v4266_v5, 0.0  ;;  %v7370_v31 = vpack.c.bf16 %v5742_v61, %v5741_v8  ;;  %v5780_v37 = vld [vmem:[%s10507_s17 + $0xfd8] sm:$0xff]  ;;  %v5731_v3 = vld [vmem:[%s10507_s17 + $0xe50] sm:$0xff]  ;;  %v7382_v63 = vpack.c.bf16 %v5748_v1, %v5747_v22 }
0x114e   :  { %v5732_v5 = vld [vmem:[%s10507_s17 + $0xe58] sm:$0xff]  ;;  %v7414_v20 = vpack.c.bf16 %v5780_v37, %v5779_v23  ;;  %v5763_v8 = vld [vmem:[%s10507_s17 + $0xf50] sm:$0xff] }
0x114f   :  { %v5764_v61 = vld [vmem:[%s10507_s17 + $0xf58] sm:$0xff] }
0x1150   :  { %7329 = vmatpush3.bf16.msra.mxu1 %v7328_v41  ;;  %7361 = vmatpush3.bf16.msra.mxu0 %v7360_v52  ;;  %v7372_v41 = vpack.c.bf16 %v5726_v24, %v5725_v46  ;;  %v7404_v52 = vpack.c.bf16 %v5758_v27, %v5757_v21  ;;  %v5733_v46 = vld [vmem:[%s10507_s17 + $0xe60] sm:$0xff]  ;;  %v5734_v24 = vld [vmem:[%s10507_s17 + $0xe68] sm:$0xff]  ;;  %v5751_v21 = vld [vmem:[%s10507_s17 + $0xef0] sm:$0xff] }
0x1151   :  { %7363 = vmatprep.subr.bf16.mxu1 %v7362_v47  ;;  %7395 = vmatprep.subr.bf16.mxu0 %v7394_v0  ;;  %v5727_v47 = vld [vmem:[%s10507_s17 + $0xe30] sm:$0xff]  ;;  %v5745_v0 = vld [vmem:[%s10507_s17 + $0xec0] sm:$0xff]  ;;  %v5752_v27 = vld [vmem:[%s10507_s17 + $0xef8] sm:$0xff]  ;;  %v7388_v51 = vpack.c.bf16 %v5734_v24, %v5733_v46 }
0x1152   :  { %v7376_v4 = vpack.c.bf16 %v5728_v48, %v5727_v47  ;;  %v3631_v47 = vrot.slane %v10014_v39, %v8598_v50  ;;  %v7390_v48 = vpack.c.bf16 %v5752_v27, %v5751_v21  ;;  %v7424_v50 = vpack.c.bf16 %v5768_v28, %v5767_v38 }
0x1153   :  { %4936 = vmatmul.mubr.f32.vlgmr.msra.gmra.mrb[80].mxu1 %v4282_v34  ;;  %5011 = vmatmul.mubr.f32.vlgmr.msra.gmra.mrb[82].mxu0 %v4284_v58  ;;  %v5761_v34 = vld [vmem:[%s10507_s17 + $0xf40] sm:$0xff]  ;;  %v5762_v58 = vld [vmem:[%s10507_s17 + $0xf48] sm:$0xff]  ;;  %v4187_v39 = vadd.f32 %v9943_v43, %v3623_v36 }
0x1154   :  { %4940 = vmatprep.mubr.f32.mxu1 %v4299_v40  ;;  %5015 = vmatprep.mubr.f32.mxu0 %v4301_v56  ;;  %v7412_v56 = vpack.c.bf16 %v5762_v58, %v5761_v34 }
0x1155   :  { %7365 = vmatpush3.bf16.msra.mxu1 %v7364_v45  ;;  %7397 = vmatpush3.bf16.msra.mxu0 %v7396_v16  ;;  %v5729_v45 = vld [vmem:[%s10507_s17 + $0xe40] sm:$0xff]  ;;  %v5730_v16 = vld [vmem:[%s10507_s17 + $0xe48] sm:$0xff] }
0x1156   :  { %7367 = vmatprep.subr.bf16.mxu1 %v7366_v30  ;;  %7399 = vmatprep.subr.bf16.mxu0 %v7398_v42  ;;  %v7378_v30 = vpack.c.bf16 %v5746_v10, %v5745_v0  ;;  %v7410_v42 = vpack.c.bf16 %v5778_v19, %v5777_v11  ;;  %v7380_v40 = vpack.c.bf16 %v5730_v16, %v5729_v45  ;;  %v4286_v19 = vmax.f32 %v4187_v39, 0.0 }
0x1157   :  { %4941 = vmatmul.mubr.f32.gmra.mrb[82].mxu1 %v4298_v17  ;;  %5016 = vmatmul.mubr.f32.gmra.mrb[84].mxu0 %v4300_v18  ;;  %v5781_v17 = vld [vmem:[%s10507_s17 + $0xfe0] sm:$0xff]  ;;  %v5782_v18 = vld [vmem:[%s10507_s17 + $0xfe8] sm:$0xff]  ;;  %v4264_v0 = vadd.f32 %v9945_v7, %v3631_v47  ;;  %v4195_v10 = vadd.f32 %v9992_v12, %v10264_v57  ;;  %v4272_v11 = vadd.f32 %v9994_v33, %v10268_v55 }
0x1158   :  { %5085 = vmatprep.mubr.f32.mxu1 %v4287_v2  ;;  %5160 = vmatprep.mubr.f32.mxu0 %v4289_v14  ;;  %v7386_v2 = vpack.c.bf16 %v5750_v26, %v5749_v13  ;;  %v7418_v14 = vpack.c.bf16 %v5782_v18, %v5781_v17  ;;  %v4270_v45 = vadd.f32 %v9979_v29, %v3631_v47  ;;  %v5786_v57 = vld [vmem:[%s10508_s18 + $0x1] ss:$0 sm:$0xff] }
0x1159   :  { %7369 = vmatpush3.bf16.msra.mxu1 %v7368_v49  ;;  %7401 = vmatpush3.bf16.msra.mxu0 %v7400_v53  ;;  %v7384_v49 = vpack.c.bf16 %v5732_v5, %v5731_v3  ;;  %v7416_v53 = vpack.c.bf16 %v5764_v61, %v5763_v8  ;;  %v4303_v16 = vmax.f32 %v4195_v10, 0.0  ;;  %v4305_v43 = vmax.f32 %v4272_v11, 0.0 }
0x115a   :  { %7371 = vmatprep.subr.bf16.mxu1 %v7370_v31  ;;  %7403 = vmatprep.subr.bf16.mxu0 %v7402_v59  ;;  %v5765_v31 = vld [vmem:[%s10507_s17 + $0xf60] sm:$0xff]  ;;  %v5766_v59 = vld [vmem:[%s10507_s17 + $0xf68] sm:$0xff] }
0x115d   :  { %7373 = vmatpush3.bf16.msra.mxu1 %v7372_v41  ;;  %7405 = vmatpush3.bf16.msra.mxu0 %v7404_v52  ;;  %v7420_v41 = vpack.c.bf16 %v5766_v59, %v5765_v31  ;;  %v5735_v52 = vld [vmem:[%s10507_s17 + $0xe70] sm:$0xff] }
0x115e   :  { %7375 = vmatprep.subr.bf16.mxu1 %v7374_v54  ;;  %7407 = vmatprep.subr.bf16.mxu0 %v7406_v60  ;;  %v7422_v54 = vpack.c.bf16 %v5784_v32, %v5783_v15  ;;  %v5736_v60 = vld [vmem:[%s10507_s17 + $0xe78] sm:$0xff] }
0x115f   :  { %v7392_v62 = vpack.c.bf16 %v5736_v60, %v5735_v52 }
0x1161   :  { %7377 = vmatpush3.bf16.msra.mxu1 %v7376_v4  ;;  %7409 = vmatpush3.bf16.msra.mxu0 %v7408_v9  ;;  %v4288_v4 = vmax.f32 %v4264_v0, 0.0  ;;  %v4193_v9 = vadd.f32 %v9977_v44, %v3623_v36 }
0x1162   :  { %7379 = vmatprep.subr.bf16.mxu1 %v7378_v30  ;;  %7411 = vmatprep.subr.bf16.mxu0 %v7410_v42  ;;  %v4304_v30 = vmax.f32 %v4270_v45, 0.0 }
0x1163   :  { %v4302_v7 = vmax.f32 %v4193_v9, 0.0 }
0x1165   :  { %7381 = vmatpush3.bf16.msra.mxu1 %v7380_v40  ;;  %7413 = vmatpush3.bf16.msra.mxu0 %v7412_v56 }
0x1166   :  { %7383 = vmatprep.subr.bf16.mxu1 %v7382_v63  ;;  %7415 = vmatprep.subr.bf16.mxu0 %v7414_v20 }
0x1169   :  { %7385 = vmatpush3.bf16.msra.mxu1 %v7384_v49  ;;  %7417 = vmatpush3.bf16.msra.mxu0 %v7416_v53 }
0x116a   :  { %7387 = vmatprep.subr.bf16.mxu1 %v7386_v2  ;;  %7419 = vmatprep.subr.bf16.mxu0 %v7418_v14 }
0x116d   :  { %7389 = vmatpush3.bf16.msra.mxu1 %v7388_v51  ;;  %7421 = vmatpush3.bf16.msra.mxu0 %v7420_v41 }
0x116e   :  { %7391 = vmatprep.subr.bf16.mxu1 %v7390_v48  ;;  %7423 = vmatprep.subr.bf16.mxu0 %v7422_v54 }
0x1171   :  { %7393 = vmatpush3.bf16.msra.mxu1 %v7392_v62  ;;  %7425 = vmatpush3.bf16.msra.mxu0 %v7424_v50 }
0x1174   :  { %5086 = vmatmul.mubr.f32.vlgmr.msra.gmra.mrb[84].mxu1 %v4286_v19  ;;  %5161 = vmatmul.mubr.f32.vlgmr.msra.gmra.mrb[86].mxu0 %v4288_v4 }
0x1175   :  { %5090 = vmatprep.mubr.f32.mxu1 %v4303_v16  ;;  %5165 = vmatprep.mubr.f32.mxu0 %v4305_v43 }
0x1178   :  { %5091 = vmatmul.mubr.f32.gmra.mrb[86].mxu1 %v4302_v7  ;;  %5166 = vmatmul.mubr.f32.gmra.mrb[88].mxu0 %v4304_v30 }
0x1179   :  { %6683 = vmatprep.mubr.msk.f32.mxu1 %vm7554_vm4, %v7552_v6  ;;  %v5790_v6 = vld [vmem:[%s10510_s20 + $0x1] ss:$0 sm:$0xff] }
0x11e5   :  { %v6227_v12 = vpop.f32.mrb[72].mxu1  ;;  %v6265_v33 = vpop.f32.mrb[74].mxu0 }
0x11e6   :  { %v6228_v55 = vpop.f32.mrb[73].mxu1  ;;  %v6266_v44 = vpop.f32.mrb[75].mxu0 }
0x11e7   :  { %v6229_v42 = vadd.f32 %v6228_v55, %v6227_v12  ;;  %v6267_v29 = vadd.f32 %v6266_v44, %v6265_v33 }
0x11e9   :  { %v4638_v34 = vadd.f32 %v6229_v42, %v5786_v57  ;;  %v6230_v58 = vpop.f32.mrb[74].mxu1  ;;  %v6268_v22 = vpop.f32.mrb[76].mxu0 }
0x11ea   :  { %v6231_v1 = vpop.f32.mrb[75].mxu1  ;;  %v6269_v23 = vpop.f32.mrb[77].mxu0 }
0x11eb   :  { %v4713_v37 = vadd.f32 %v6267_v29, %v4638_v34  ;;  %v6232_v40 = vadd.f32 %v6231_v1, %v6230_v58  ;;  %v6270_v56 = vadd.f32 %v6269_v23, %v6268_v22 }
0x11ed   :  { %v4643_v3 = vadd.f32 %v6232_v40, %v5786_v57 }
0x11ef   :  { %v4718_v5 = vadd.f32 %v6270_v56, %v4643_v3 }
0x1205   :  { %v6303_v63 = vpop.f32.mrb[76].mxu1  ;;  %v6341_v20 = vpop.f32.mrb[78].mxu0 }
0x1206   :  { %v6304_v8 = vpop.f32.mrb[77].mxu1  ;;  %v6342_v61 = vpop.f32.mrb[79].mxu0 }
0x1207   :  { %v6305_v13 = vadd.f32 %v6304_v8, %v6303_v63  ;;  %v6343_v26 = vadd.f32 %v6342_v61, %v6341_v20  ;;  %v5234_v63 = vld [vmem:[%s10511_s21 + $0x8] sm:$0xff]  ;;  %v5235_v20 = vld [vmem:[%s10511_s21 + $0x10] sm:$0xff]  ;;  %v7553_v8 = vmov 0.0|0.0  }
0x1208   :  { %7426 = vmatprep.subr.bf16.mxu1 %v7553_v8 }
0x1209   :  { %v4788_v17 = vadd.f32 %v6305_v13, %v4713_v37  ;;  %v6306_v18 = vpop.f32.mrb[78].mxu1  ;;  %v6344_v49 = vpop.f32.mrb[80].mxu0  ;;  %v5236_v13 = vld [vmem:[%s10511_s21 + $0x18] sm:$0xff] }
0x120a   :  { %v6307_v53 = vpop.f32.mrb[79].mxu1  ;;  %v6345_v46 = vpop.f32.mrb[81].mxu0 }
0x120b   :  { %v4863_v24 = vadd.f32 %v6343_v26, %v4788_v17  ;;  %v6308_v2 = vadd.f32 %v6307_v53, %v6306_v18  ;;  %v6346_v14 = vadd.f32 %v6345_v46, %v6344_v49  ;;  %v7430_v26 = vpack.c.bf16 %v5236_v13, %v5235_v20 }
0x120d   :  { %v4793_v31 = vadd.f32 %v6308_v2, %v4718_v5 }
0x120f   :  { %v4868_v59 = vadd.f32 %v6346_v14, %v4793_v31  ;;  %v5788_v14 = vld [vmem:[%s10509_s19 + $0x1] ss:$0 sm:$0xff] }
0x1226   :  { %v6379_v21 = vpop.f32.mrb[80].mxu1  ;;  %v6417_v27 = vpop.f32.mrb[82].mxu0 }
0x1227   :  { %v6380_v15 = vpop.f32.mrb[81].mxu1  ;;  %v6418_v32 = vpop.f32.mrb[83].mxu0 }
0x1228   :  { %v6381_v36 = vadd.f32 %v6380_v15, %v6379_v21  ;;  %v6419_v51 = vadd.f32 %v6418_v32, %v6417_v27 }
0x122a   :  { %v4938_v41 = vadd.f32 %v6381_v36, %v4863_v24  ;;  %v6382_v52 = vpop.f32.mrb[82].mxu1  ;;  %v6420_v47 = vpop.f32.mrb[84].mxu0 }
0x122b   :  { %v6383_v48 = vpop.f32.mrb[83].mxu1  ;;  %v6421_v54 = vpop.f32.mrb[85].mxu0 }
0x122c   :  { %v5013_v60 = vadd.f32 %v6419_v51, %v4938_v41  ;;  %v6384_v38 = vadd.f32 %v6383_v48, %v6382_v52  ;;  %v6422_v28 = vadd.f32 %v6421_v54, %v6420_v47 }
0x122e   :  { %v4943_v62 = vadd.f32 %v6384_v38, %v4868_v59 }
0x1230   :  { %v5018_v50 = vadd.f32 %v6422_v28, %v4943_v62 }
0x1247   :  { %v6455_v39 = vpop.f32.mrb[84].mxu1  ;;  %v6493_v0 = vpop.f32.mrb[86].mxu0 }
0x1248   :  { %v6456_v10 = vpop.f32.mrb[85].mxu1  ;;  %v6494_v11 = vpop.f32.mrb[87].mxu0 }
0x1249   :  { %v6457_v19 = vadd.f32 %v6456_v10, %v6455_v39  ;;  %v6495_v4 = vadd.f32 %v6494_v11, %v6493_v0 }
0x124b   :  { %v5088_v9 = vadd.f32 %v6457_v19, %v5013_v60  ;;  %v6458_v45 = vpop.f32.mrb[86].mxu1  ;;  %v6496_v16 = vpop.f32.mrb[88].mxu0  ;;  %v5791_v19 = vld [vmem:[%s10542_s9] ss:$0 sm:$0xff] }
0x124c   :  { %v6459_v43 = vpop.f32.mrb[87].mxu1  ;;  %v6497_v7 = vpop.f32.mrb[89].mxu0 }
0x124d   :  { %v5163_v30 = vadd.f32 %v6495_v4, %v5088_v9  ;;  %v6460_v12 = vadd.f32 %v6459_v43, %v6458_v45  ;;  %v6498_v33 = vadd.f32 %v6497_v7, %v6496_v16 }
0x124f   :  { %v5093_v57 = vadd.f32 %v6460_v12, %v5018_v50  ;;  %v5171_v55 = vadd.f32 %v5163_v30, %v9389_v25 }
0x1251   :  { %v5168_v44 = vadd.f32 %v6498_v33, %v5093_v57  ;;  %v5173_v42 = vsel %vm193_vm1, %v5171_v55, 0.0 }
0x1252   :  { %5174 = vadd.xlane.f32.xlu0 %v5173_v42 }
0x1253   :  { %v5172_v29 = vadd.f32 %v5168_v44, %v9419_v35  ;;  %v5233_v35 = vld [vmem:[%s10511_s21] sm:$0xff] }
0x1254   :  { %v7427_v61 = vpack.c.bf16 %v5234_v63, %v5233_v35 }
0x1255   :  { %v5176_v34 = vsel %vm193_vm1, %v5172_v29, 0.0 }
0x1256   :  { %5177 = vadd.xlane.f32.xlu1 %v5176_v34  ;;  %7428 = vmatpush3.bf16.msra.mxu1 %v7427_v61 }
0x1257   :  { %7429 = vmatprep.subr.bf16.mxu1 %v7553_v8 }
0x125a   :  { %7431 = vmatpush3.bf16.msra.mxu1 %v7430_v26 }
0x12df   :  { %v5175_v58 = vpop.xlane.xlu0 %5174 }
0x12e0   :  { %v5179_v22 = vmul.f32 0.03125, %v5175_v58 }
0x12e2   :  { %v5181_v1 = vsub.f32 %v5171_v55, %v5179_v22 }
0x12e3   :  { %v5178_v23 = vpop.xlane.xlu1 %5177 }
0x12e4   :  { %v5180_v37 = vmul.f32 0.03125, %v5178_v23  ;;  %v5183_v40 = vmul.f32 %v5181_v1, %v5181_v1 }
0x12e6   :  { %v5182_v56 = vsub.f32 %v5172_v29, %v5180_v37  ;;  %v5185_v3 = vsel %vm193_vm1, %v5183_v40, 0.0 }
0x12e7   :  { %5186 = vadd.xlane.f32.xlu0 %v5185_v3 }
0x12e8   :  { %v5184_v25 = vmul.f32 %v5182_v56, %v5182_v56 }
0x12ea   :  { %v5188_v5 = vsel %vm193_vm1, %v5184_v25, 0.0 }
0x12eb   :  { %5189 = vadd.xlane.f32.xlu1 %v5188_v5 }
0x1374   :  { %v5187_v17 = vpop.xlane.xlu0 %5186 }
0x1375   :  { %v5191_v18 = vmul.f32 0.03125, %v5187_v17 }
0x1377   :  { %v5193_v49 = vadd.f32 1e-05, %v5191_v18 }
0x1378   :  { %v5190_v53 = vpop.xlane.xlu1 %5189 }
0x1379   :  { %7512 = vrsqrt.f32 %v5193_v49  ;;  %v5192_v46 = vmul.f32 0.03125, %v5190_v53 }
0x137b   :  { %v5194_v24 = vadd.f32 1e-05, %v5192_v46 }
0x137d   :  { %7514 = vrsqrt.f32 %v5194_v24 }
0x1383   :  { %v7513_v2 = vpop.eup %7512 }
0x1384   :  { %v5197_v31 = vmul.f32 %v7513_v2, %v5181_v1 }
0x1386   :  { %v5207_v59 = vmul.f32 %v5788_v14, %v5197_v31 }
0x1387   :  { %v7515_v21 = vpop.eup %7514 }
0x1388   :  { %v5217_v27 = vadd.f32 %v5790_v6, %v5207_v59  ;;  %v5198_v15 = vmul.f32 %v7515_v21, %v5182_v56 }
0x138a   :  { %v5219_v32 = vsel %vm193_vm1, %v5217_v27, -inf  ;;  %v5208_v36 = vmul.f32 %v5788_v14, %v5198_v15 }
0x138b   :  { %v5220_v51 = vrot.slane %v5219_v32, 4 }
0x138c   :  { %v5218_v41 = vadd.f32 %v5790_v6, %v5208_v36 }
0x138d   :  { %v5221_v52 = vmax.f32 %v5219_v32, %v5220_v51 }
0x138e   :  { %v5226_v47 = vsel %vm193_vm1, %v5218_v41, -inf }
0x138f   :  { %v5227_v48 = vrot.slane %v5226_v47, 4  ;;  %v5222_v54 = vrot.slane %v5221_v52, 2 }
0x1391   :  { %v5223_v60 = vmax.f32 %v5221_v52, %v5222_v54  ;;  %v5228_v38 = vmax.f32 %v5226_v47, %v5227_v48 }
0x1393   :  { %v5229_v28 = vrot.slane %v5228_v38, 2  ;;  %v5224_v62 = vrot.slane %v5223_v60, 1 }
0x1395   :  { %v5230_v50 = vmax.f32 %v5228_v38, %v5229_v28  ;;  %v5225_v0 = vmax.f32 %v5223_v60, %v5224_v62 }
0x1397   :  { %v5231_v39 = vrot.slane %v5230_v50, 1 }
0x1399   :  { %v5232_v10 = vmax.f32 %v5230_v50, %v5231_v39 }
0x139b   :  { %v5247_v11 = vsel %vm5246_vm5, %v5232_v10, %v5225_v0 }
0x139c   :  { %6684 = vmatmul.mubr.msk.f32.vlgmr.msra.gmra.mrb[88].mxu1 %vm193_vm1, %v5247_v11 }
0x146f   :  { %v5316_v4 = vpop.f32.mrb[88].mxu1 }
0x1470   :  { %v5317_v9 = vadd.f32 %v5791_v19, %v5316_v4  ;;  %v6685_v45 = vpop.f32.mrb[89].mxu1 }
0x1472   :  { %5321 = vst.msk [vmem:[#allocation2] sm:$0x3] %vm5320_vm6, %v5317_v9 }
0x1473   :  { %7539 = shalt.err (!%p7536_p4)
}
0x1474   :  { %s10543_s4 = sld [smem:[#allocation14_spill]] }
0x147a   :  { %s7540_s0 = scalar_lea.hbm %s10543_s4, 32 }
0x147b   :  { %p7541_p5 = scmp.ne.s32.totalorder %s10543_s4, %s7540_s0  ;;  %p7544_p6 = scmp.lt.u32.totalorder %s7540_s0, %s10543_s4 }
0x147d   :  { %p7546_p7 = pnand %p7544_p6, %p7541_p5 }
0x147f   :  { %7549 = shalt.err (!%p7546_p7)
}
0x1480   :  { %5331 = dma.vmem_to_hbm [thread:$0]  %s5329_s8, 32, %s10543_s4, [#allocation3]  }
0x1481   :  { %7550 = dma.done.wait [#allocation3], 32  }
0x1482   :  { %7551 = vsyncadd [#allocation3], 4294967264 }
0x1483   :  { %5335 = vsyncpa [#allocation3], 1 }

</bundles_post_ra>
